<compile_context>
chip_gen: v7x
topology: tpu7x:2x2x1
jax: 0.10.0
libtpu: 0.0.40
codegen_flags: <defaults>
</compile_context>

<pallas_src>
import math
import jax
import jax.numpy as jnp
from jax.experimental import pallas as pl
from jax.experimental.pallas import tpu as pltpu

# ----------------------- small ViT configuration ---------------------------
IMAGE_SIZE = 16
PATCH_SIZE = 8
IN_CHANNELS = 3
HIDDEN_DIM = 32
MLP_DIM = 64
NUM_HEADS = 4
NUM_LAYERS = 3       # != 2 so the buggy `extra_norm`/ln3 branch of the reference
                     # (which returns None) is never taken.
NUM_CLASSES = 10
LN_EPS = 1e-6        # torchvision ViT uses LayerNorm(eps=1e-6)

N_PATCH_SIDE = IMAGE_SIZE // PATCH_SIZE
NUM_PATCHES = N_PATCH_SIDE * N_PATCH_SIDE
SEQ_LEN = NUM_PATCHES + 1            # + class token
HEAD_DIM = HIDDEN_DIM // NUM_HEADS
PATCH_DIM = IN_CHANNELS * PATCH_SIZE * PATCH_SIZE
OUT_PAD = 128                        # lane-dense padded classifier width


# --------------------------- helpers (traced inside kernel) -----------------
def _gelu(x):
    # tanh-approximate GELU: tanh runs on the EUP (separate VLIW slot) instead
    # of a ~10-op VPU erf polynomial.  Max abs deviation from torch's exact
    # (erf-based) GELU is ~3e-4 — acceptable (no bitwise torch parity asserted).
    c = math.sqrt(2.0 / math.pi)
    return 0.5 * x * (1.0 + jnp.tanh(c * (x + 0.044715 * x * x * x)))


def _layernorm(x, w, b):
    mu = jnp.mean(x, axis=-1, keepdims=True)
    xc = x - mu
    var = jnp.mean(xc * xc, axis=-1, keepdims=True)
    return xc * jax.lax.rsqrt(var + LN_EPS) * w + b


# --------------------------- the fused Pallas kernel ------------------------
def _vit_fused_kernel(patches_ref, conv_w_ref, embed_add_ref,
                      ln1_w_ref, ln1_b_ref, qkv_w_ref, qkv_b_ref,
                      out_w_ref, out_b_ref, ln2_w_ref, ln2_b_ref,
                      fc1_w_ref, fc1_b_ref, fc2_w_ref, fc2_b_ref,
                      head_w_ref, head_b_ref,
                      o_ref):
    n = o_ref.shape[0]                           # static batch size

    # ---- patch embedding + class token + positional embedding --------------
    # patches_ref has a zero row at every class-token position, so the dot
    # leaves those rows at 0 and embed_add supplies (cls_token + pos[0]);
    # patch rows get (conv bias + pos[1:]) from the same table.
    x = jnp.dot(patches_ref[...], conv_w_ref[...],
                preferred_element_type=jnp.float32) + embed_add_ref[...]  # (N*S, H)

    # ---- encoder layers (statically unrolled, weights already in VMEM) -----
    for l in range(NUM_LAYERS):
        # --- ln_1 + multi-head self-attention (qkv: whole batch, one dot) ---
        xn = _layernorm(x, ln1_w_ref[l], ln1_b_ref[l])
        # 1/sqrt(head_dim) is pre-folded into the Q columns of qkv_w / qkv_b.
        qkv = jnp.dot(xn, qkv_w_ref[l],
                      preferred_element_type=jnp.float32) + qkv_b_ref[l]  # (N*S, 3H)
        q = qkv[:, 0:HIDDEN_DIM]
        k = qkv[:, HIDDEN_DIM:2 * HIDDEN_DIM]
        v = qkv[:, 2 * HIDDEN_DIM:3 * HIDDEN_DIM]

        # per-(batch, head) attention; head/batch concat kept in registers
        batch_outs = []
        for b in range(n):
            r0, r1 = b * SEQ_LEN, (b + 1) * SEQ_LEN
            qb, kb, vb = q[r0:r1, :], k[r0:r1, :], v[r0:r1, :]
            head_outs = []
            for h in range(NUM_HEADS):
                lo, hi = h * HEAD_DIM, (h + 1) * HEAD_DIM
                s = jax.lax.dot_general(
                    qb[:, lo:hi], kb[:, lo:hi], (((1,), (1,)), ((), ())),
                    preferred_element_type=jnp.float32)                   # (S, S)
                s = s - jnp.max(s, axis=-1, keepdims=True)
                p = jnp.exp(s)
                p = p * pl.reciprocal(jnp.sum(p, axis=-1, keepdims=True),
                                      approx=True)
                head_outs.append(
                    jnp.dot(p, vb[:, lo:hi],
                            preferred_element_type=jnp.float32))          # (S, hd)
            batch_outs.append(jnp.concatenate(head_outs, axis=-1))        # (S, H)
        attn_cat = jnp.concatenate(batch_outs, axis=0)                    # (N*S, H)

        # single output projection for all heads and all batches
        attn = jnp.dot(attn_cat, out_w_ref[l],
                       preferred_element_type=jnp.float32) + out_b_ref[l]
        x = x + attn                                                      # residual 1

        # --- ln_2 + MLP (whole batch at once) -------------------------------
        yn = _layernorm(x, ln2_w_ref[l], ln2_b_ref[l])
        h1 = _gelu(jnp.dot(yn, fc1_w_ref[l],
                           preferred_element_type=jnp.float32) + fc1_b_ref[l])
        h2 = jnp.dot(h1, fc2_w_ref[l],
                     preferred_element_type=jnp.float32) + fc2_b_ref[l]
        x = x + h2                                                        # residual 2

    # TODO(synk): the reference's `extra_norm`/ln3 branch (lastOne) computes
    # ln3(x+y) but returns None; it is dead/buggy code and is not reproduced.

    # ---- classifier head on the class tokens (register gather, one matmul) -
    cls_rows = jnp.concatenate(
        [x[b * SEQ_LEN:b * SEQ_LEN + 1, :] for b in range(n)], axis=0)    # (N, H)
    # head weights are lane-padded to 128 -> unmasked lane-dense output store.
    o_ref[...] = jnp.dot(cls_rows, head_w_ref[...],
                         preferred_element_type=jnp.float32) + head_b_ref[...]


# --------------------------- plain-JAX glue ----------------------------------
def extract_patches(x):
    """NCHW image -> (N, num_patches, C*p*p) with (c, kh, kw) feature order,
    matching the reshape of the PyTorch conv weight (out, in, kh, kw)."""
    n, c, h, w = x.shape
    p = PATCH_SIZE
    nh, nw = h // p, w // p
    x = x.reshape(n, c, nh, p, nw, p)
    x = x.transpose(0, 2, 4, 1, 3, 5)          # (n, nh, nw, c, p, p)
    return x.reshape(n, nh * nw, c * p * p)


def prepare_params(params):
    """One-time weight prep: transpose every nn.Linear-style (O, K) weight to
    (K, O) so the MXU sees lane-dense LHS x RHS, fold the attention scale into
    the Q slice of the qkv projection, fold conv bias / class token / pos
    embedding into one additive table, pad the classifier to 128 lanes, and
    stack per-layer params along a leading layer axis so the whole model is a
    small fixed set of VMEM-resident operands."""
    layers = params["layers"]
    scale = 1.0 / math.sqrt(HEAD_DIM)

    def stack_w(name):           # (O, K) -> stacked (L, K, O)
        return jnp.stack([l[name].T for l in layers]).astype(jnp.float32)

    def stack_v(name):           # (dim,) -> stacked (L, 1, dim)
        return jnp.stack([l[name][None, :] for l in layers]).astype(jnp.float32)

    # qkv with 1/sqrt(head_dim) folded into the Q columns (weight and bias).
    qkv_w, qkv_b = [], []
    for l in layers:
        w = l["qkv_w"].T.astype(jnp.float32)              # (H, 3H), cols [q|k|v]
        w = w.at[:, :HIDDEN_DIM].multiply(scale)
        b = l["qkv_b"][None, :].astype(jnp.float32)       # (1, 3H)
        b = b.at[:, :HIDDEN_DIM].multiply(scale)
        qkv_w.append(w)
        qkv_b.append(b)

    # per-sequence additive table: row 0 = cls_token + pos[0];
    # rows 1.. = conv_bias + pos[1:].  Tiled over the batch in the wrapper.
    pos = params["pos_embedding"].reshape(SEQ_LEN, HIDDEN_DIM).astype(jnp.float32)
    cls = params["class_token"].reshape(1, HIDDEN_DIM).astype(jnp.float32)
    conv_b = params["conv_b"][None, :].astype(jnp.float32)
    embed_add_seq = jnp.concatenate(
        [cls + pos[0:1, :], pos[1:SEQ_LEN, :] + conv_b], axis=0)          # (S, H)

    # classifier padded to 128 output lanes (unmasked lane-dense store).
    head_w_pad = jnp.zeros((HIDDEN_DIM, OUT_PAD), jnp.float32)
    head_w_pad = head_w_pad.at[:, :NUM_CLASSES].set(
        params["head_w"].T.astype(jnp.float32))
    head_b_pad = jnp.zeros((1, OUT_PAD), jnp.float32)
    head_b_pad = head_b_pad.at[:, :NUM_CLASSES].set(
        params["head_b"][None, :].astype(jnp.float32))

    return {
        "conv_w_t": params["conv_w"].reshape(HIDDEN_DIM, PATCH_DIM).T
                          .astype(jnp.float32),                           # (PD, H)
        "embed_add_seq": embed_add_seq,                                   # (S, H)
        "ln1_w": stack_v("ln1_w"), "ln1_b": stack_v("ln1_b"),
        "qkv_w": jnp.stack(qkv_w), "qkv_b": jnp.stack(qkv_b),             # (L,H,3H)/(L,1,3H)
        "out_w": stack_w("out_w"), "out_b": stack_v("out_b"),             # (L,H,H)/(L,1,H)
        "ln2_w": stack_v("ln2_w"), "ln2_b": stack_v("ln2_b"),
        "fc1_w": stack_w("fc1_w"), "fc1_b": stack_v("fc1_b"),             # (L,H,M)/(L,1,M)
        "fc2_w": stack_w("fc2_w"), "fc2_b": stack_v("fc2_b"),             # (L,M,H)/(L,1,H)
        "head_w_pad": head_w_pad,                                         # (H, 128)
        "head_b_pad": head_b_pad,                                         # (1, 128)
    }


def vit_forward(x, fp):
    n = x.shape[0]
    assert x.shape[1:] == (IN_CHANNELS, IMAGE_SIZE, IMAGE_SIZE)

    # _process_input: conv_proj (kernel==stride==patch) as a patch flatten; a
    # zero row is inserted at every class-token position so the patch-embed dot
    # output is already (N*SEQ_LEN, H) and aligned with the additive table.
    patches = extract_patches(x)                                          # (N, P, PD)
    patches_pad = jnp.concatenate(
        [jnp.zeros((n, 1, PATCH_DIM), jnp.float32), patches], axis=1
    ).reshape(n * SEQ_LEN, PATCH_DIM)                                     # (N*S, PD)
    embed_add = jnp.tile(fp["embed_add_seq"], (n, 1))                     # (N*S, H)

    operands = (patches_pad,
                fp["conv_w_t"], embed_add,
                fp["ln1_w"], fp["ln1_b"], fp["qkv_w"], fp["qkv_b"],
                fp["out_w"], fp["out_b"], fp["ln2_w"], fp["ln2_b"],
                fp["fc1_w"], fp["fc1_b"], fp["fc2_w"], fp["fc2_b"],
                fp["head_w_pad"], fp["head_b_pad"])

    vmem = pl.BlockSpec(memory_space=pltpu.MemorySpace.VMEM)
    logits_pad = pl.pallas_call(
        _vit_fused_kernel,
        out_shape=jax.ShapeDtypeStruct((n, OUT_PAD), jnp.float32),
        in_specs=[vmem] * len(operands),
        out_specs=vmem,
        cost_estimate=pl.CostEstimate(flops=650_000, transcendentals=3_000,
                                      bytes_accessed=140_000),
    )(*operands)
    return logits_pad[:, :NUM_CLASSES]


# --------------------------- deterministic parameter init --------------------
def init_params(key):
    keys = iter(jax.random.split(key, 4 + 4 * NUM_LAYERS))

    def nrm(shape, std=0.05):
        return (std * jax.random.normal(next(keys), shape)).astype(jnp.float32)

    params = {
        "conv_w": nrm((HIDDEN_DIM, IN_CHANNELS, PATCH_SIZE, PATCH_SIZE)),
        "conv_b": jnp.zeros((HIDDEN_DIM,), jnp.float32),
        "class_token": jnp.zeros((1, 1, HIDDEN_DIM), jnp.float32),
        "pos_embedding": nrm((1, SEQ_LEN, HIDDEN_DIM), std=0.02),
        "head_w": nrm((NUM_CLASSES, HIDDEN_DIM)),
        "head_b": jnp.zeros((NUM_CLASSES,), jnp.float32),
        "layers": [],
    }
    for _ in range(NUM_LAYERS):
        params["layers"].append({
            "ln1_w": jnp.ones((HIDDEN_DIM,), jnp.float32),
            "ln1_b": jnp.zeros((HIDDEN_DIM,), jnp.float32),
            "qkv_w": nrm((3 * HIDDEN_DIM, HIDDEN_DIM)),
            "qkv_b": jnp.zeros((3 * HIDDEN_DIM,), jnp.float32),
            "out_w": nrm((HIDDEN_DIM, HIDDEN_DIM)),
            "out_b": jnp.zeros((HIDDEN_DIM,), jnp.float32),
            "ln2_w": jnp.ones((HIDDEN_DIM,), jnp.float32),
            "ln2_b": jnp.zeros((HIDDEN_DIM,), jnp.float32),
            "fc1_w": nrm((MLP_DIM, HIDDEN_DIM)),
            "fc1_b": jnp.zeros((MLP_DIM,), jnp.float32),
            "fc2_w": nrm((HIDDEN_DIM, MLP_DIM)),
            "fc2_b": jnp.zeros((HIDDEN_DIM,), jnp.float32),
        })
    return params


# --------------------------- main --------------------------------------------
if __name__ == "__main__":
    key = jax.random.PRNGKey(0)
    pkey, xkey = jax.random.split(key)
    params = init_params(pkey)
    fused_params = prepare_params(params)
    x = jax.random.normal(
        xkey, (2, IN_CHANNELS, IMAGE_SIZE, IMAGE_SIZE), jnp.float32)

    forward = jax.jit(vit_forward)
    logits = forward(x, fused_params)
    jax.block_until_ready(logits)

    assert logits.shape == (2, NUM_CLASSES)
    assert bool(jnp.all(jnp.isfinite(logits)))
    print("KERNEL_OK")
</pallas_src>

<mosaic_0001>
module attributes {stable_mosaic.version = 11 : i64} {
  func.func @_vit_fused_kernel(%arg0: memref<10x192xf32, #tpu.memory_space<vmem>>, %arg1: memref<192x32xf32, #tpu.memory_space<vmem>>, %arg2: memref<10x32xf32, #tpu.memory_space<vmem>>, %arg3: memref<3x1x32xf32, #tpu.memory_space<vmem>>, %arg4: memref<3x1x32xf32, #tpu.memory_space<vmem>>, %arg5: memref<3x32x96xf32, #tpu.memory_space<vmem>>, %arg6: memref<3x1x96xf32, #tpu.memory_space<vmem>>, %arg7: memref<3x32x32xf32, #tpu.memory_space<vmem>>, %arg8: memref<3x1x32xf32, #tpu.memory_space<vmem>>, %arg9: memref<3x1x32xf32, #tpu.memory_space<vmem>>, %arg10: memref<3x1x32xf32, #tpu.memory_space<vmem>>, %arg11: memref<3x32x64xf32, #tpu.memory_space<vmem>>, %arg12: memref<3x1x64xf32, #tpu.memory_space<vmem>>, %arg13: memref<3x64x32xf32, #tpu.memory_space<vmem>>, %arg14: memref<3x1x32xf32, #tpu.memory_space<vmem>>, %arg15: memref<32x128xf32, #tpu.memory_space<vmem>>, %arg16: memref<1x128xf32, #tpu.memory_space<vmem>>, %arg17: memref<2x128xf32, #tpu.memory_space<vmem>>) attributes {dimension_semantics = [], scalar_prefetch = 0 : i64, scratch_operands = 0 : i64, tpu.core_type = #tpu.core_type<tc>} {
    %c0 = arith.constant 0 : index
    %c0_0 = arith.constant 0 : index
    %0 = vector.load %arg0[%c0, %c0_0] : memref<10x192xf32, #tpu.memory_space<vmem>>, vector<10x192xf32>
    %c0_1 = arith.constant 0 : index
    %c0_2 = arith.constant 0 : index
    %1 = vector.load %arg1[%c0_1, %c0_2] : memref<192x32xf32, #tpu.memory_space<vmem>>, vector<192x32xf32>
    %cst = arith.constant dense<0.000000e+00> : vector<10x32xf32>
    %2 = tpu.matmul %0, %1, %cst {dimension_numbers = #tpu.dot_dimension_numbers<[1], [0], [0], [1], [0, 0, 1, 1], [], []>} : vector<10x192xf32>, vector<192x32xf32>, vector<10x32xf32> -> vector<10x32xf32>
    %c0_3 = arith.constant 0 : index
    %c0_4 = arith.constant 0 : index
    %3 = vector.load %arg2[%c0_3, %c0_4] : memref<10x32xf32, #tpu.memory_space<vmem>>, vector<10x32xf32>
    %4 = arith.addf %2, %3 : vector<10x32xf32>
    %c0_5 = arith.constant 0 : index
    %c0_6 = arith.constant 0 : index
    %c0_7 = arith.constant 0 : index
    %5 = vector.load %arg3[%c0_5, %c0_6, %c0_7] : memref<3x1x32xf32, #tpu.memory_space<vmem>>, vector<1x1x32xf32>
    %6 = vector.shape_cast %5 : vector<1x1x32xf32> to vector<1x32xf32>
    %c0_8 = arith.constant 0 : index
    %c0_9 = arith.constant 0 : index
    %c0_10 = arith.constant 0 : index
    %7 = vector.load %arg4[%c0_8, %c0_9, %c0_10] : memref<3x1x32xf32, #tpu.memory_space<vmem>>, vector<1x1x32xf32>
    %8 = vector.shape_cast %7 : vector<1x1x32xf32> to vector<1x32xf32>
    %cst_11 = arith.constant dense<0.000000e+00> : vector<10xf32>
    %9 = vector.multi_reduction <add>, %4, %cst_11 [1] : vector<10x32xf32> to vector<10xf32>
    %10 = vector.shape_cast %9 : vector<10xf32> to vector<10x1xf32>
    %cst_12 = arith.constant 3.200000e+01 : f32
    %11 = vector.broadcast %cst_12 : f32 to vector<10x1xf32>
    %12 = arith.divf %10, %11 : vector<10x1xf32>
    %13 = vector.broadcast %12 : vector<10x1xf32> to vector<10x32xf32>
    %14 = arith.subf %4, %13 : vector<10x32xf32>
    %15 = arith.mulf %14, %14 : vector<10x32xf32>
    %cst_13 = arith.constant dense<0.000000e+00> : vector<10xf32>
    %16 = vector.multi_reduction <add>, %15, %cst_13 [1] : vector<10x32xf32> to vector<10xf32>
    %17 = vector.shape_cast %16 : vector<10xf32> to vector<10x1xf32>
    %cst_14 = arith.constant 3.200000e+01 : f32
    %18 = vector.broadcast %cst_14 : f32 to vector<10x1xf32>
    %19 = arith.divf %17, %18 : vector<10x1xf32>
    %cst_15 = arith.constant 9.99999997E-7 : f32
    %20 = vector.broadcast %cst_15 : f32 to vector<10x1xf32>
    %21 = arith.addf %19, %20 : vector<10x1xf32>
    %22 = math.rsqrt %21 : vector<10x1xf32>
    %23 = vector.broadcast %22 : vector<10x1xf32> to vector<10x32xf32>
    %24 = arith.mulf %14, %23 : vector<10x32xf32>
    %25 = vector.broadcast %6 : vector<1x32xf32> to vector<10x32xf32>
    %26 = arith.mulf %24, %25 : vector<10x32xf32>
    %27 = vector.broadcast %8 : vector<1x32xf32> to vector<10x32xf32>
    %28 = arith.addf %26, %27 : vector<10x32xf32>
    %c0_16 = arith.constant 0 : index
    %c0_17 = arith.constant 0 : index
    %c0_18 = arith.constant 0 : index
    %29 = vector.load %arg5[%c0_16, %c0_17, %c0_18] : memref<3x32x96xf32, #tpu.memory_space<vmem>>, vector<1x32x96xf32>
    %30 = vector.shape_cast %29 : vector<1x32x96xf32> to vector<32x96xf32>
    %cst_19 = arith.constant dense<0.000000e+00> : vector<10x96xf32>
    %31 = tpu.matmul %28, %30, %cst_19 {dimension_numbers = #tpu.dot_dimension_numbers<[1], [0], [0], [1], [0, 0, 1, 1], [], []>} : vector<10x32xf32>, vector<32x96xf32>, vector<10x96xf32> -> vector<10x96xf32>
    %c0_20 = arith.constant 0 : index
    %c0_21 = arith.constant 0 : index
    %c0_22 = arith.constant 0 : index
    %32 = vector.load %arg6[%c0_20, %c0_21, %c0_22] : memref<3x1x96xf32, #tpu.memory_space<vmem>>, vector<1x1x96xf32>
    %33 = vector.shape_cast %32 : vector<1x1x96xf32> to vector<1x96xf32>
    %34 = vector.broadcast %33 : vector<1x96xf32> to vector<10x96xf32>
    %35 = arith.addf %31, %34 : vector<10x96xf32>
    %36 = vector.extract_strided_slice %35 {offsets = [0, 0], sizes = [10, 32], strides = [1, 1]} : vector<10x96xf32> to vector<10x32xf32>
    %37 = vector.extract_strided_slice %35 {offsets = [0, 32], sizes = [10, 32], strides = [1, 1]} : vector<10x96xf32> to vector<10x32xf32>
    %38 = vector.extract_strided_slice %35 {offsets = [0, 64], sizes = [10, 32], strides = [1, 1]} : vector<10x96xf32> to vector<10x32xf32>
    %39 = vector.extract_strided_slice %36 {offsets = [0, 0], sizes = [5, 32], strides = [1, 1]} : vector<10x32xf32> to vector<5x32xf32>
    %40 = vector.extract_strided_slice %37 {offsets = [0, 0], sizes = [5, 32], strides = [1, 1]} : vector<10x32xf32> to vector<5x32xf32>
    %41 = vector.extract_strided_slice %38 {offsets = [0, 0], sizes = [5, 32], strides = [1, 1]} : vector<10x32xf32> to vector<5x32xf32>
    %42 = vector.extract_strided_slice %39 {offsets = [0, 0], sizes = [5, 8], strides = [1, 1]} : vector<5x32xf32> to vector<5x8xf32>
    %43 = vector.extract_strided_slice %40 {offsets = [0, 0], sizes = [5, 8], strides = [1, 1]} : vector<5x32xf32> to vector<5x8xf32>
    %cst_23 = arith.constant dense<0.000000e+00> : vector<5x5xf32>
    %44 = tpu.matmul %42, %43, %cst_23 {dimension_numbers = #tpu.dot_dimension_numbers<[1], [1], [0], [0], [0, 0, 1, 0], [], []>} : vector<5x8xf32>, vector<5x8xf32>, vector<5x5xf32> -> vector<5x5xf32>
    %cst_24 = arith.constant dense<0xFF800000> : vector<5xf32>
    %45 = vector.multi_reduction <maximumf>, %44, %cst_24 [1] : vector<5x5xf32> to vector<5xf32>
    %46 = vector.shape_cast %45 : vector<5xf32> to vector<5x1xf32>
    %47 = vector.broadcast %46 : vector<5x1xf32> to vector<5x5xf32>
    %48 = arith.subf %44, %47 : vector<5x5xf32>
    %49 = math.exp %48 : vector<5x5xf32>
    %cst_25 = arith.constant dense<0.000000e+00> : vector<5xf32>
    %50 = vector.multi_reduction <add>, %49, %cst_25 [1] : vector<5x5xf32> to vector<5xf32>
    %51 = vector.shape_cast %50 : vector<5xf32> to vector<5x1xf32>
    %52 = tpu.reciprocal %51 {approx = true} : vector<5x1xf32> -> vector<5x1xf32>
    %53 = vector.broadcast %52 : vector<5x1xf32> to vector<5x5xf32>
    %54 = arith.mulf %49, %53 : vector<5x5xf32>
    %55 = vector.extract_strided_slice %41 {offsets = [0, 0], sizes = [5, 8], strides = [1, 1]} : vector<5x32xf32> to vector<5x8xf32>
    %cst_26 = arith.constant dense<0.000000e+00> : vector<5x8xf32>
    %56 = tpu.matmul %54, %55, %cst_26 {dimension_numbers = #tpu.dot_dimension_numbers<[1], [0], [0], [1], [0, 0, 1, 1], [], []>} : vector<5x5xf32>, vector<5x8xf32>, vector<5x8xf32> -> vector<5x8xf32>
    %57 = vector.extract_strided_slice %39 {offsets = [0, 8], sizes = [5, 8], strides = [1, 1]} : vector<5x32xf32> to vector<5x8xf32>
    %58 = vector.extract_strided_slice %40 {offsets = [0, 8], sizes = [5, 8], strides = [1, 1]} : vector<5x32xf32> to vector<5x8xf32>
    %cst_27 = arith.constant dense<0.000000e+00> : vector<5x5xf32>
    %59 = tpu.matmul %57, %58, %cst_27 {dimension_numbers = #tpu.dot_dimension_numbers<[1], [1], [0], [0], [0, 0, 1, 0], [], []>} : vector<5x8xf32>, vector<5x8xf32>, vector<5x5xf32> -> vector<5x5xf32>
    %cst_28 = arith.constant dense<0xFF800000> : vector<5xf32>
    %60 = vector.multi_reduction <maximumf>, %59, %cst_28 [1] : vector<5x5xf32> to vector<5xf32>
    %61 = vector.shape_cast %60 : vector<5xf32> to vector<5x1xf32>
    %62 = vector.broadcast %61 : vector<5x1xf32> to vector<5x5xf32>
    %63 = arith.subf %59, %62 : vector<5x5xf32>
    %64 = math.exp %63 : vector<5x5xf32>
    %cst_29 = arith.constant dense<0.000000e+00> : vector<5xf32>
    %65 = vector.multi_reduction <add>, %64, %cst_29 [1] : vector<5x5xf32> to vector<5xf32>
    %66 = vector.shape_cast %65 : vector<5xf32> to vector<5x1xf32>
    %67 = tpu.reciprocal %66 {approx = true} : vector<5x1xf32> -> vector<5x1xf32>
    %68 = vector.broadcast %67 : vector<5x1xf32> to vector<5x5xf32>
    %69 = arith.mulf %64, %68 : vector<5x5xf32>
    %70 = vector.extract_strided_slice %41 {offsets = [0, 8], sizes = [5, 8], strides = [1, 1]} : vector<5x32xf32> to vector<5x8xf32>
    %cst_30 = arith.constant dense<0.000000e+00> : vector<5x8xf32>
    %71 = tpu.matmul %69, %70, %cst_30 {dimension_numbers = #tpu.dot_dimension_numbers<[1], [0], [0], [1], [0, 0, 1, 1], [], []>} : vector<5x5xf32>, vector<5x8xf32>, vector<5x8xf32> -> vector<5x8xf32>
    %72 = vector.extract_strided_slice %39 {offsets = [0, 16], sizes = [5, 8], strides = [1, 1]} : vector<5x32xf32> to vector<5x8xf32>
    %73 = vector.extract_strided_slice %40 {offsets = [0, 16], sizes = [5, 8], strides = [1, 1]} : vector<5x32xf32> to vector<5x8xf32>
    %cst_31 = arith.constant dense<0.000000e+00> : vector<5x5xf32>
    %74 = tpu.matmul %72, %73, %cst_31 {dimension_numbers = #tpu.dot_dimension_numbers<[1], [1], [0], [0], [0, 0, 1, 0], [], []>} : vector<5x8xf32>, vector<5x8xf32>, vector<5x5xf32> -> vector<5x5xf32>
    %cst_32 = arith.constant dense<0xFF800000> : vector<5xf32>
    %75 = vector.multi_reduction <maximumf>, %74, %cst_32 [1] : vector<5x5xf32> to vector<5xf32>
    %76 = vector.shape_cast %75 : vector<5xf32> to vector<5x1xf32>
    %77 = vector.broadcast %76 : vector<5x1xf32> to vector<5x5xf32>
    %78 = arith.subf %74, %77 : vector<5x5xf32>
    %79 = math.exp %78 : vector<5x5xf32>
    %cst_33 = arith.constant dense<0.000000e+00> : vector<5xf32>
    %80 = vector.multi_reduction <add>, %79, %cst_33 [1] : vector<5x5xf32> to vector<5xf32>
    %81 = vector.shape_cast %80 : vector<5xf32> to vector<5x1xf32>
    %82 = tpu.reciprocal %81 {approx = true} : vector<5x1xf32> -> vector<5x1xf32>
    %83 = vector.broadcast %82 : vector<5x1xf32> to vector<5x5xf32>
    %84 = arith.mulf %79, %83 : vector<5x5xf32>
    %85 = vector.extract_strided_slice %41 {offsets = [0, 16], sizes = [5, 8], strides = [1, 1]} : vector<5x32xf32> to vector<5x8xf32>
    %cst_34 = arith.constant dense<0.000000e+00> : vector<5x8xf32>
    %86 = tpu.matmul %84, %85, %cst_34 {dimension_numbers = #tpu.dot_dimension_numbers<[1], [0], [0], [1], [0, 0, 1, 1], [], []>} : vector<5x5xf32>, vector<5x8xf32>, vector<5x8xf32> -> vector<5x8xf32>
    %87 = vector.extract_strided_slice %39 {offsets = [0, 24], sizes = [5, 8], strides = [1, 1]} : vector<5x32xf32> to vector<5x8xf32>
    %88 = vector.extract_strided_slice %40 {offsets = [0, 24], sizes = [5, 8], strides = [1, 1]} : vector<5x32xf32> to vector<5x8xf32>
    %cst_35 = arith.constant dense<0.000000e+00> : vector<5x5xf32>
    %89 = tpu.matmul %87, %88, %cst_35 {dimension_numbers = #tpu.dot_dimension_numbers<[1], [1], [0], [0], [0, 0, 1, 0], [], []>} : vector<5x8xf32>, vector<5x8xf32>, vector<5x5xf32> -> vector<5x5xf32>
    %cst_36 = arith.constant dense<0xFF800000> : vector<5xf32>
    %90 = vector.multi_reduction <maximumf>, %89, %cst_36 [1] : vector<5x5xf32> to vector<5xf32>
    %91 = vector.shape_cast %90 : vector<5xf32> to vector<5x1xf32>
    %92 = vector.broadcast %91 : vector<5x1xf32> to vector<5x5xf32>
    %93 = arith.subf %89, %92 : vector<5x5xf32>
    %94 = math.exp %93 : vector<5x5xf32>
    %cst_37 = arith.constant dense<0.000000e+00> : vector<5xf32>
    %95 = vector.multi_reduction <add>, %94, %cst_37 [1] : vector<5x5xf32> to vector<5xf32>
    %96 = vector.shape_cast %95 : vector<5xf32> to vector<5x1xf32>
    %97 = tpu.reciprocal %96 {approx = true} : vector<5x1xf32> -> vector<5x1xf32>
    %98 = vector.broadcast %97 : vector<5x1xf32> to vector<5x5xf32>
    %99 = arith.mulf %94, %98 : vector<5x5xf32>
    %100 = vector.extract_strided_slice %41 {offsets = [0, 24], sizes = [5, 8], strides = [1, 1]} : vector<5x32xf32> to vector<5x8xf32>
    %cst_38 = arith.constant dense<0.000000e+00> : vector<5x8xf32>
    %101 = tpu.matmul %99, %100, %cst_38 {dimension_numbers = #tpu.dot_dimension_numbers<[1], [0], [0], [1], [0, 0, 1, 1], [], []>} : vector<5x5xf32>, vector<5x8xf32>, vector<5x8xf32> -> vector<5x8xf32>
    %102 = tpu.concatenate %56, %71, %86, %101 in 1 : vector<5x8xf32>, vector<5x8xf32>, vector<5x8xf32>, vector<5x8xf32> -> vector<5x32xf32>
    %103 = vector.extract_strided_slice %36 {offsets = [5, 0], sizes = [5, 32], strides = [1, 1]} : vector<10x32xf32> to vector<5x32xf32>
    %104 = vector.extract_strided_slice %37 {offsets = [5, 0], sizes = [5, 32], strides = [1, 1]} : vector<10x32xf32> to vector<5x32xf32>
    %105 = vector.extract_strided_slice %38 {offsets = [5, 0], sizes = [5, 32], strides = [1, 1]} : vector<10x32xf32> to vector<5x32xf32>
    %106 = vector.extract_strided_slice %103 {offsets = [0, 0], sizes = [5, 8], strides = [1, 1]} : vector<5x32xf32> to vector<5x8xf32>
    %107 = vector.extract_strided_slice %104 {offsets = [0, 0], sizes = [5, 8], strides = [1, 1]} : vector<5x32xf32> to vector<5x8xf32>
    %cst_39 = arith.constant dense<0.000000e+00> : vector<5x5xf32>
    %108 = tpu.matmul %106, %107, %cst_39 {dimension_numbers = #tpu.dot_dimension_numbers<[1], [1], [0], [0], [0, 0, 1, 0], [], []>} : vector<5x8xf32>, vector<5x8xf32>, vector<5x5xf32> -> vector<5x5xf32>
    %cst_40 = arith.constant dense<0xFF800000> : vector<5xf32>
    %109 = vector.multi_reduction <maximumf>, %108, %cst_40 [1] : vector<5x5xf32> to vector<5xf32>
    %110 = vector.shape_cast %109 : vector<5xf32> to vector<5x1xf32>
    %111 = vector.broadcast %110 : vector<5x1xf32> to vector<5x5xf32>
    %112 = arith.subf %108, %111 : vector<5x5xf32>
    %113 = math.exp %112 : vector<5x5xf32>
    %cst_41 = arith.constant dense<0.000000e+00> : vector<5xf32>
    %114 = vector.multi_reduction <add>, %113, %cst_41 [1] : vector<5x5xf32> to vector<5xf32>
    %115 = vector.shape_cast %114 : vector<5xf32> to vector<5x1xf32>
    %116 = tpu.reciprocal %115 {approx = true} : vector<5x1xf32> -> vector<5x1xf32>
    %117 = vector.broadcast %116 : vector<5x1xf32> to vector<5x5xf32>
    %118 = arith.mulf %113, %117 : vector<5x5xf32>
    %119 = vector.extract_strided_slice %105 {offsets = [0, 0], sizes = [5, 8], strides = [1, 1]} : vector<5x32xf32> to vector<5x8xf32>
    %cst_42 = arith.constant dense<0.000000e+00> : vector<5x8xf32>
    %120 = tpu.matmul %118, %119, %cst_42 {dimension_numbers = #tpu.dot_dimension_numbers<[1], [0], [0], [1], [0, 0, 1, 1], [], []>} : vector<5x5xf32>, vector<5x8xf32>, vector<5x8xf32> -> vector<5x8xf32>
    %121 = vector.extract_strided_slice %103 {offsets = [0, 8], sizes = [5, 8], strides = [1, 1]} : vector<5x32xf32> to vector<5x8xf32>
    %122 = vector.extract_strided_slice %104 {offsets = [0, 8], sizes = [5, 8], strides = [1, 1]} : vector<5x32xf32> to vector<5x8xf32>
    %cst_43 = arith.constant dense<0.000000e+00> : vector<5x5xf32>
    %123 = tpu.matmul %121, %122, %cst_43 {dimension_numbers = #tpu.dot_dimension_numbers<[1], [1], [0], [0], [0, 0, 1, 0], [], []>} : vector<5x8xf32>, vector<5x8xf32>, vector<5x5xf32> -> vector<5x5xf32>
    %cst_44 = arith.constant dense<0xFF800000> : vector<5xf32>
    %124 = vector.multi_reduction <maximumf>, %123, %cst_44 [1] : vector<5x5xf32> to vector<5xf32>
    %125 = vector.shape_cast %124 : vector<5xf32> to vector<5x1xf32>
    %126 = vector.broadcast %125 : vector<5x1xf32> to vector<5x5xf32>
    %127 = arith.subf %123, %126 : vector<5x5xf32>
    %128 = math.exp %127 : vector<5x5xf32>
    %cst_45 = arith.constant dense<0.000000e+00> : vector<5xf32>
    %129 = vector.multi_reduction <add>, %128, %cst_45 [1] : vector<5x5xf32> to vector<5xf32>
    %130 = vector.shape_cast %129 : vector<5xf32> to vector<5x1xf32>
    %131 = tpu.reciprocal %130 {approx = true} : vector<5x1xf32> -> vector<5x1xf32>
    %132 = vector.broadcast %131 : vector<5x1xf32> to vector<5x5xf32>
    %133 = arith.mulf %128, %132 : vector<5x5xf32>
    %134 = vector.extract_strided_slice %105 {offsets = [0, 8], sizes = [5, 8], strides = [1, 1]} : vector<5x32xf32> to vector<5x8xf32>
    %cst_46 = arith.constant dense<0.000000e+00> : vector<5x8xf32>
    %135 = tpu.matmul %133, %134, %cst_46 {dimension_numbers = #tpu.dot_dimension_numbers<[1], [0], [0], [1], [0, 0, 1, 1], [], []>} : vector<5x5xf32>, vector<5x8xf32>, vector<5x8xf32> -> vector<5x8xf32>
    %136 = vector.extract_strided_slice %103 {offsets = [0, 16], sizes = [5, 8], strides = [1, 1]} : vector<5x32xf32> to vector<5x8xf32>
    %137 = vector.extract_strided_slice %104 {offsets = [0, 16], sizes = [5, 8], strides = [1, 1]} : vector<5x32xf32> to vector<5x8xf32>
    %cst_47 = arith.constant dense<0.000000e+00> : vector<5x5xf32>
    %138 = tpu.matmul %136, %137, %cst_47 {dimension_numbers = #tpu.dot_dimension_numbers<[1], [1], [0], [0], [0, 0, 1, 0], [], []>} : vector<5x8xf32>, vector<5x8xf32>, vector<5x5xf32> -> vector<5x5xf32>
    %cst_48 = arith.constant dense<0xFF800000> : vector<5xf32>
    %139 = vector.multi_reduction <maximumf>, %138, %cst_48 [1] : vector<5x5xf32> to vector<5xf32>
    %140 = vector.shape_cast %139 : vector<5xf32> to vector<5x1xf32>
    %141 = vector.broadcast %140 : vector<5x1xf32> to vector<5x5xf32>
    %142 = arith.subf %138, %141 : vector<5x5xf32>
    %143 = math.exp %142 : vector<5x5xf32>
    %cst_49 = arith.constant dense<0.000000e+00> : vector<5xf32>
    %144 = vector.multi_reduction <add>, %143, %cst_49 [1] : vector<5x5xf32> to vector<5xf32>
    %145 = vector.shape_cast %144 : vector<5xf32> to vector<5x1xf32>
    %146 = tpu.reciprocal %145 {approx = true} : vector<5x1xf32> -> vector<5x1xf32>
    %147 = vector.broadcast %146 : vector<5x1xf32> to vector<5x5xf32>
    %148 = arith.mulf %143, %147 : vector<5x5xf32>
    %149 = vector.extract_strided_slice %105 {offsets = [0, 16], sizes = [5, 8], strides = [1, 1]} : vector<5x32xf32> to vector<5x8xf32>
    %cst_50 = arith.constant dense<0.000000e+00> : vector<5x8xf32>
    %150 = tpu.matmul %148, %149, %cst_50 {dimension_numbers = #tpu.dot_dimension_numbers<[1], [0], [0], [1], [0, 0, 1, 1], [], []>} : vector<5x5xf32>, vector<5x8xf32>, vector<5x8xf32> -> vector<5x8xf32>
    %151 = vector.extract_strided_slice %103 {offsets = [0, 24], sizes = [5, 8], strides = [1, 1]} : vector<5x32xf32> to vector<5x8xf32>
    %152 = vector.extract_strided_slice %104 {offsets = [0, 24], sizes = [5, 8], strides = [1, 1]} : vector<5x32xf32> to vector<5x8xf32>
    %cst_51 = arith.constant dense<0.000000e+00> : vector<5x5xf32>
    %153 = tpu.matmul %151, %152, %cst_51 {dimension_numbers = #tpu.dot_dimension_numbers<[1], [1], [0], [0], [0, 0, 1, 0], [], []>} : vector<5x8xf32>, vector<5x8xf32>, vector<5x5xf32> -> vector<5x5xf32>
    %cst_52 = arith.constant dense<0xFF800000> : vector<5xf32>
    %154 = vector.multi_reduction <maximumf>, %153, %cst_52 [1] : vector<5x5xf32> to vector<5xf32>
    %155 = vector.shape_cast %154 : vector<5xf32> to vector<5x1xf32>
    %156 = vector.broadcast %155 : vector<5x1xf32> to vector<5x5xf32>
    %157 = arith.subf %153, %156 : vector<5x5xf32>
    %158 = math.exp %157 : vector<5x5xf32>
    %cst_53 = arith.constant dense<0.000000e+00> : vector<5xf32>
    %159 = vector.multi_reduction <add>, %158, %cst_53 [1] : vector<5x5xf32> to vector<5xf32>
    %160 = vector.shape_cast %159 : vector<5xf32> to vector<5x1xf32>
    %161 = tpu.reciprocal %160 {approx = true} : vector<5x1xf32> -> vector<5x1xf32>
    %162 = vector.broadcast %161 : vector<5x1xf32> to vector<5x5xf32>
    %163 = arith.mulf %158, %162 : vector<5x5xf32>
    %164 = vector.extract_strided_slice %105 {offsets = [0, 24], sizes = [5, 8], strides = [1, 1]} : vector<5x32xf32> to vector<5x8xf32>
    %cst_54 = arith.constant dense<0.000000e+00> : vector<5x8xf32>
    %165 = tpu.matmul %163, %164, %cst_54 {dimension_numbers = #tpu.dot_dimension_numbers<[1], [0], [0], [1], [0, 0, 1, 1], [], []>} : vector<5x5xf32>, vector<5x8xf32>, vector<5x8xf32> -> vector<5x8xf32>
    %166 = tpu.concatenate %120, %135, %150, %165 in 1 : vector<5x8xf32>, vector<5x8xf32>, vector<5x8xf32>, vector<5x8xf32> -> vector<5x32xf32>
    %167 = tpu.concatenate %102, %166 in 0 : vector<5x32xf32>, vector<5x32xf32> -> vector<10x32xf32>
    %c0_55 = arith.constant 0 : index
    %c0_56 = arith.constant 0 : index
    %c0_57 = arith.constant 0 : index
    %168 = vector.load %arg7[%c0_55, %c0_56, %c0_57] : memref<3x32x32xf32, #tpu.memory_space<vmem>>, vector<1x32x32xf32>
    %169 = vector.shape_cast %168 : vector<1x32x32xf32> to vector<32x32xf32>
    %cst_58 = arith.constant dense<0.000000e+00> : vector<10x32xf32>
    %170 = tpu.matmul %167, %169, %cst_58 {dimension_numbers = #tpu.dot_dimension_numbers<[1], [0], [0], [1], [0, 0, 1, 1], [], []>} : vector<10x32xf32>, vector<32x32xf32>, vector<10x32xf32> -> vector<10x32xf32>
    %c0_59 = arith.constant 0 : index
    %c0_60 = arith.constant 0 : index
    %c0_61 = arith.constant 0 : index
    %171 = vector.load %arg8[%c0_59, %c0_60, %c0_61] : memref<3x1x32xf32, #tpu.memory_space<vmem>>, vector<1x1x32xf32>
    %172 = vector.shape_cast %171 : vector<1x1x32xf32> to vector<1x32xf32>
    %173 = vector.broadcast %172 : vector<1x32xf32> to vector<10x32xf32>
    %174 = arith.addf %170, %173 : vector<10x32xf32>
    %175 = arith.addf %4, %174 : vector<10x32xf32>
    %c0_62 = arith.constant 0 : index
    %c0_63 = arith.constant 0 : index
    %c0_64 = arith.constant 0 : index
    %176 = vector.load %arg9[%c0_62, %c0_63, %c0_64] : memref<3x1x32xf32, #tpu.memory_space<vmem>>, vector<1x1x32xf32>
    %177 = vector.shape_cast %176 : vector<1x1x32xf32> to vector<1x32xf32>
    %c0_65 = arith.constant 0 : index
    %c0_66 = arith.constant 0 : index
    %c0_67 = arith.constant 0 : index
    %178 = vector.load %arg10[%c0_65, %c0_66, %c0_67] : memref<3x1x32xf32, #tpu.memory_space<vmem>>, vector<1x1x32xf32>
    %179 = vector.shape_cast %178 : vector<1x1x32xf32> to vector<1x32xf32>
    %cst_68 = arith.constant dense<0.000000e+00> : vector<10xf32>
    %180 = vector.multi_reduction <add>, %175, %cst_68 [1] : vector<10x32xf32> to vector<10xf32>
    %181 = vector.shape_cast %180 : vector<10xf32> to vector<10x1xf32>
    %cst_69 = arith.constant 3.200000e+01 : f32
    %182 = vector.broadcast %cst_69 : f32 to vector<10x1xf32>
    %183 = arith.divf %181, %182 : vector<10x1xf32>
    %184 = vector.broadcast %183 : vector<10x1xf32> to vector<10x32xf32>
    %185 = arith.subf %175, %184 : vector<10x32xf32>
    %186 = arith.mulf %185, %185 : vector<10x32xf32>
    %cst_70 = arith.constant dense<0.000000e+00> : vector<10xf32>
    %187 = vector.multi_reduction <add>, %186, %cst_70 [1] : vector<10x32xf32> to vector<10xf32>
    %188 = vector.shape_cast %187 : vector<10xf32> to vector<10x1xf32>
    %cst_71 = arith.constant 3.200000e+01 : f32
    %189 = vector.broadcast %cst_71 : f32 to vector<10x1xf32>
    %190 = arith.divf %188, %189 : vector<10x1xf32>
    %cst_72 = arith.constant 9.99999997E-7 : f32
    %191 = vector.broadcast %cst_72 : f32 to vector<10x1xf32>
    %192 = arith.addf %190, %191 : vector<10x1xf32>
    %193 = math.rsqrt %192 : vector<10x1xf32>
    %194 = vector.broadcast %193 : vector<10x1xf32> to vector<10x32xf32>
    %195 = arith.mulf %185, %194 : vector<10x32xf32>
    %196 = vector.broadcast %177 : vector<1x32xf32> to vector<10x32xf32>
    %197 = arith.mulf %195, %196 : vector<10x32xf32>
    %198 = vector.broadcast %179 : vector<1x32xf32> to vector<10x32xf32>
    %199 = arith.addf %197, %198 : vector<10x32xf32>
    %c0_73 = arith.constant 0 : index
    %c0_74 = arith.constant 0 : index
    %c0_75 = arith.constant 0 : index
    %200 = vector.load %arg11[%c0_73, %c0_74, %c0_75] : memref<3x32x64xf32, #tpu.memory_space<vmem>>, vector<1x32x64xf32>
    %201 = vector.shape_cast %200 : vector<1x32x64xf32> to vector<32x64xf32>
    %cst_76 = arith.constant dense<0.000000e+00> : vector<10x64xf32>
    %202 = tpu.matmul %199, %201, %cst_76 {dimension_numbers = #tpu.dot_dimension_numbers<[1], [0], [0], [1], [0, 0, 1, 1], [], []>} : vector<10x32xf32>, vector<32x64xf32>, vector<10x64xf32> -> vector<10x64xf32>
    %c0_77 = arith.constant 0 : index
    %c0_78 = arith.constant 0 : index
    %c0_79 = arith.constant 0 : index
    %203 = vector.load %arg12[%c0_77, %c0_78, %c0_79] : memref<3x1x64xf32, #tpu.memory_space<vmem>>, vector<1x1x64xf32>
    %204 = vector.shape_cast %203 : vector<1x1x64xf32> to vector<1x64xf32>
    %205 = vector.broadcast %204 : vector<1x64xf32> to vector<10x64xf32>
    %206 = arith.addf %202, %205 : vector<10x64xf32>
    %cst_80 = arith.constant 5.000000e-01 : f32
    %207 = vector.broadcast %cst_80 : f32 to vector<10x64xf32>
    %208 = arith.mulf %207, %206 : vector<10x64xf32>
    %cst_81 = arith.constant 4.471500e-02 : f32
    %209 = vector.broadcast %cst_81 : f32 to vector<10x64xf32>
    %210 = arith.mulf %209, %206 : vector<10x64xf32>
    %211 = arith.mulf %210, %206 : vector<10x64xf32>
    %212 = arith.mulf %211, %206 : vector<10x64xf32>
    %213 = arith.addf %206, %212 : vector<10x64xf32>
    %cst_82 = arith.constant 0.797884583 : f32
    %214 = vector.broadcast %cst_82 : f32 to vector<10x64xf32>
    %215 = arith.mulf %214, %213 : vector<10x64xf32>
    %216 = math.tanh %215 : vector<10x64xf32>
    %cst_83 = arith.constant 1.000000e+00 : f32
    %217 = vector.broadcast %cst_83 : f32 to vector<10x64xf32>
    %218 = arith.addf %217, %216 : vector<10x64xf32>
    %219 = arith.mulf %208, %218 : vector<10x64xf32>
    %c0_84 = arith.constant 0 : index
    %c0_85 = arith.constant 0 : index
    %c0_86 = arith.constant 0 : index
    %220 = vector.load %arg13[%c0_84, %c0_85, %c0_86] : memref<3x64x32xf32, #tpu.memory_space<vmem>>, vector<1x64x32xf32>
    %221 = vector.shape_cast %220 : vector<1x64x32xf32> to vector<64x32xf32>
    %cst_87 = arith.constant dense<0.000000e+00> : vector<10x32xf32>
    %222 = tpu.matmul %219, %221, %cst_87 {dimension_numbers = #tpu.dot_dimension_numbers<[1], [0], [0], [1], [0, 0, 1, 1], [], []>} : vector<10x64xf32>, vector<64x32xf32>, vector<10x32xf32> -> vector<10x32xf32>
    %c0_88 = arith.constant 0 : index
    %c0_89 = arith.constant 0 : index
    %c0_90 = arith.constant 0 : index
    %223 = vector.load %arg14[%c0_88, %c0_89, %c0_90] : memref<3x1x32xf32, #tpu.memory_space<vmem>>, vector<1x1x32xf32>
    %224 = vector.shape_cast %223 : vector<1x1x32xf32> to vector<1x32xf32>
    %225 = vector.broadcast %224 : vector<1x32xf32> to vector<10x32xf32>
    %226 = arith.addf %222, %225 : vector<10x32xf32>
    %227 = arith.addf %175, %226 : vector<10x32xf32>
    %c1 = arith.constant 1 : index
    %c0_91 = arith.constant 0 : index
    %c0_92 = arith.constant 0 : index
    %228 = vector.load %arg3[%c1, %c0_91, %c0_92] : memref<3x1x32xf32, #tpu.memory_space<vmem>>, vector<1x1x32xf32>
    %229 = vector.shape_cast %228 : vector<1x1x32xf32> to vector<1x32xf32>
    %c1_93 = arith.constant 1 : index
    %c0_94 = arith.constant 0 : index
    %c0_95 = arith.constant 0 : index
    %230 = vector.load %arg4[%c1_93, %c0_94, %c0_95] : memref<3x1x32xf32, #tpu.memory_space<vmem>>, vector<1x1x32xf32>
    %231 = vector.shape_cast %230 : vector<1x1x32xf32> to vector<1x32xf32>
    %cst_96 = arith.constant dense<0.000000e+00> : vector<10xf32>
    %232 = vector.multi_reduction <add>, %227, %cst_96 [1] : vector<10x32xf32> to vector<10xf32>
    %233 = vector.shape_cast %232 : vector<10xf32> to vector<10x1xf32>
    %cst_97 = arith.constant 3.200000e+01 : f32
    %234 = vector.broadcast %cst_97 : f32 to vector<10x1xf32>
    %235 = arith.divf %233, %234 : vector<10x1xf32>
    %236 = vector.broadcast %235 : vector<10x1xf32> to vector<10x32xf32>
    %237 = arith.subf %227, %236 : vector<10x32xf32>
    %238 = arith.mulf %237, %237 : vector<10x32xf32>
    %cst_98 = arith.constant dense<0.000000e+00> : vector<10xf32>
    %239 = vector.multi_reduction <add>, %238, %cst_98 [1] : vector<10x32xf32> to vector<10xf32>
    %240 = vector.shape_cast %239 : vector<10xf32> to vector<10x1xf32>
    %cst_99 = arith.constant 3.200000e+01 : f32
    %241 = vector.broadcast %cst_99 : f32 to vector<10x1xf32>
    %242 = arith.divf %240, %241 : vector<10x1xf32>
    %cst_100 = arith.constant 9.99999997E-7 : f32
    %243 = vector.broadcast %cst_100 : f32 to vector<10x1xf32>
    %244 = arith.addf %242, %243 : vector<10x1xf32>
    %245 = math.rsqrt %244 : vector<10x1xf32>
    %246 = vector.broadcast %245 : vector<10x1xf32> to vector<10x32xf32>
    %247 = arith.mulf %237, %246 : vector<10x32xf32>
    %248 = vector.broadcast %229 : vector<1x32xf32> to vector<10x32xf32>
    %249 = arith.mulf %247, %248 : vector<10x32xf32>
    %250 = vector.broadcast %231 : vector<1x32xf32> to vector<10x32xf32>
    %251 = arith.addf %249, %250 : vector<10x32xf32>
    %c1_101 = arith.constant 1 : index
    %c0_102 = arith.constant 0 : index
    %c0_103 = arith.constant 0 : index
    %252 = vector.load %arg5[%c1_101, %c0_102, %c0_103] : memref<3x32x96xf32, #tpu.memory_space<vmem>>, vector<1x32x96xf32>
    %253 = vector.shape_cast %252 : vector<1x32x96xf32> to vector<32x96xf32>
    %cst_104 = arith.constant dense<0.000000e+00> : vector<10x96xf32>
    %254 = tpu.matmul %251, %253, %cst_104 {dimension_numbers = #tpu.dot_dimension_numbers<[1], [0], [0], [1], [0, 0, 1, 1], [], []>} : vector<10x32xf32>, vector<32x96xf32>, vector<10x96xf32> -> vector<10x96xf32>
    %c1_105 = arith.constant 1 : index
    %c0_106 = arith.constant 0 : index
    %c0_107 = arith.constant 0 : index
    %255 = vector.load %arg6[%c1_105, %c0_106, %c0_107] : memref<3x1x96xf32, #tpu.memory_space<vmem>>, vector<1x1x96xf32>
    %256 = vector.shape_cast %255 : vector<1x1x96xf32> to vector<1x96xf32>
    %257 = vector.broadcast %256 : vector<1x96xf32> to vector<10x96xf32>
    %258 = arith.addf %254, %257 : vector<10x96xf32>
    %259 = vector.extract_strided_slice %258 {offsets = [0, 0], sizes = [10, 32], strides = [1, 1]} : vector<10x96xf32> to vector<10x32xf32>
    %260 = vector.extract_strided_slice %258 {offsets = [0, 32], sizes = [10, 32], strides = [1, 1]} : vector<10x96xf32> to vector<10x32xf32>
    %261 = vector.extract_strided_slice %258 {offsets = [0, 64], sizes = [10, 32], strides = [1, 1]} : vector<10x96xf32> to vector<10x32xf32>
    %262 = vector.extract_strided_slice %259 {offsets = [0, 0], sizes = [5, 32], strides = [1, 1]} : vector<10x32xf32> to vector<5x32xf32>
    %263 = vector.extract_strided_slice %260 {offsets = [0, 0], sizes = [5, 32], strides = [1, 1]} : vector<10x32xf32> to vector<5x32xf32>
    %264 = vector.extract_strided_slice %261 {offsets = [0, 0], sizes = [5, 32], strides = [1, 1]} : vector<10x32xf32> to vector<5x32xf32>
    %265 = vector.extract_strided_slice %262 {offsets = [0, 0], sizes = [5, 8], strides = [1, 1]} : vector<5x32xf32> to vector<5x8xf32>
    %266 = vector.extract_strided_slice %263 {offsets = [0, 0], sizes = [5, 8], strides = [1, 1]} : vector<5x32xf32> to vector<5x8xf32>
    %cst_108 = arith.constant dense<0.000000e+00> : vector<5x5xf32>
    %267 = tpu.matmul %265, %266, %cst_108 {dimension_numbers = #tpu.dot_dimension_numbers<[1], [1], [0], [0], [0, 0, 1, 0], [], []>} : vector<5x8xf32>, vector<5x8xf32>, vector<5x5xf32> -> vector<5x5xf32>
    %cst_109 = arith.constant dense<0xFF800000> : vector<5xf32>
    %268 = vector.multi_reduction <maximumf>, %267, %cst_109 [1] : vector<5x5xf32> to vector<5xf32>
    %269 = vector.shape_cast %268 : vector<5xf32> to vector<5x1xf32>
    %270 = vector.broadcast %269 : vector<5x1xf32> to vector<5x5xf32>
    %271 = arith.subf %267, %270 : vector<5x5xf32>
    %272 = math.exp %271 : vector<5x5xf32>
    %cst_110 = arith.constant dense<0.000000e+00> : vector<5xf32>
    %273 = vector.multi_reduction <add>, %272, %cst_110 [1] : vector<5x5xf32> to vector<5xf32>
    %274 = vector.shape_cast %273 : vector<5xf32> to vector<5x1xf32>
    %275 = tpu.reciprocal %274 {approx = true} : vector<5x1xf32> -> vector<5x1xf32>
    %276 = vector.broadcast %275 : vector<5x1xf32> to vector<5x5xf32>
    %277 = arith.mulf %272, %276 : vector<5x5xf32>
    %278 = vector.extract_strided_slice %264 {offsets = [0, 0], sizes = [5, 8], strides = [1, 1]} : vector<5x32xf32> to vector<5x8xf32>
    %cst_111 = arith.constant dense<0.000000e+00> : vector<5x8xf32>
    %279 = tpu.matmul %277, %278, %cst_111 {dimension_numbers = #tpu.dot_dimension_numbers<[1], [0], [0], [1], [0, 0, 1, 1], [], []>} : vector<5x5xf32>, vector<5x8xf32>, vector<5x8xf32> -> vector<5x8xf32>
    %280 = vector.extract_strided_slice %262 {offsets = [0, 8], sizes = [5, 8], strides = [1, 1]} : vector<5x32xf32> to vector<5x8xf32>
    %281 = vector.extract_strided_slice %263 {offsets = [0, 8], sizes = [5, 8], strides = [1, 1]} : vector<5x32xf32> to vector<5x8xf32>
    %cst_112 = arith.constant dense<0.000000e+00> : vector<5x5xf32>
    %282 = tpu.matmul %280, %281, %cst_112 {dimension_numbers = #tpu.dot_dimension_numbers<[1], [1], [0], [0], [0, 0, 1, 0], [], []>} : vector<5x8xf32>, vector<5x8xf32>, vector<5x5xf32> -> vector<5x5xf32>
    %cst_113 = arith.constant dense<0xFF800000> : vector<5xf32>
    %283 = vector.multi_reduction <maximumf>, %282, %cst_113 [1] : vector<5x5xf32> to vector<5xf32>
    %284 = vector.shape_cast %283 : vector<5xf32> to vector<5x1xf32>
    %285 = vector.broadcast %284 : vector<5x1xf32> to vector<5x5xf32>
    %286 = arith.subf %282, %285 : vector<5x5xf32>
    %287 = math.exp %286 : vector<5x5xf32>
    %cst_114 = arith.constant dense<0.000000e+00> : vector<5xf32>
    %288 = vector.multi_reduction <add>, %287, %cst_114 [1] : vector<5x5xf32> to vector<5xf32>
    %289 = vector.shape_cast %288 : vector<5xf32> to vector<5x1xf32>
    %290 = tpu.reciprocal %289 {approx = true} : vector<5x1xf32> -> vector<5x1xf32>
    %291 = vector.broadcast %290 : vector<5x1xf32> to vector<5x5xf32>
    %292 = arith.mulf %287, %291 : vector<5x5xf32>
    %293 = vector.extract_strided_slice %264 {offsets = [0, 8], sizes = [5, 8], strides = [1, 1]} : vector<5x32xf32> to vector<5x8xf32>
    %cst_115 = arith.constant dense<0.000000e+00> : vector<5x8xf32>
    %294 = tpu.matmul %292, %293, %cst_115 {dimension_numbers = #tpu.dot_dimension_numbers<[1], [0], [0], [1], [0, 0, 1, 1], [], []>} : vector<5x5xf32>, vector<5x8xf32>, vector<5x8xf32> -> vector<5x8xf32>
    %295 = vector.extract_strided_slice %262 {offsets = [0, 16], sizes = [5, 8], strides = [1, 1]} : vector<5x32xf32> to vector<5x8xf32>
    %296 = vector.extract_strided_slice %263 {offsets = [0, 16], sizes = [5, 8], strides = [1, 1]} : vector<5x32xf32> to vector<5x8xf32>
    %cst_116 = arith.constant dense<0.000000e+00> : vector<5x5xf32>
    %297 = tpu.matmul %295, %296, %cst_116 {dimension_numbers = #tpu.dot_dimension_numbers<[1], [1], [0], [0], [0, 0, 1, 0], [], []>} : vector<5x8xf32>, vector<5x8xf32>, vector<5x5xf32> -> vector<5x5xf32>
    %cst_117 = arith.constant dense<0xFF800000> : vector<5xf32>
    %298 = vector.multi_reduction <maximumf>, %297, %cst_117 [1] : vector<5x5xf32> to vector<5xf32>
    %299 = vector.shape_cast %298 : vector<5xf32> to vector<5x1xf32>
    %300 = vector.broadcast %299 : vector<5x1xf32> to vector<5x5xf32>
    %301 = arith.subf %297, %300 : vector<5x5xf32>
    %302 = math.exp %301 : vector<5x5xf32>
    %cst_118 = arith.constant dense<0.000000e+00> : vector<5xf32>
    %303 = vector.multi_reduction <add>, %302, %cst_118 [1] : vector<5x5xf32> to vector<5xf32>
    %304 = vector.shape_cast %303 : vector<5xf32> to vector<5x1xf32>
    %305 = tpu.reciprocal %304 {approx = true} : vector<5x1xf32> -> vector<5x1xf32>
    %306 = vector.broadcast %305 : vector<5x1xf32> to vector<5x5xf32>
    %307 = arith.mulf %302, %306 : vector<5x5xf32>
    %308 = vector.extract_strided_slice %264 {offsets = [0, 16], sizes = [5, 8], strides = [1, 1]} : vector<5x32xf32> to vector<5x8xf32>
    %cst_119 = arith.constant dense<0.000000e+00> : vector<5x8xf32>
    %309 = tpu.matmul %307, %308, %cst_119 {dimension_numbers = #tpu.dot_dimension_numbers<[1], [0], [0], [1], [0, 0, 1, 1], [], []>} : vector<5x5xf32>, vector<5x8xf32>, vector<5x8xf32> -> vector<5x8xf32>
    %310 = vector.extract_strided_slice %262 {offsets = [0, 24], sizes = [5, 8], strides = [1, 1]} : vector<5x32xf32> to vector<5x8xf32>
    %311 = vector.extract_strided_slice %263 {offsets = [0, 24], sizes = [5, 8], strides = [1, 1]} : vector<5x32xf32> to vector<5x8xf32>
    %cst_120 = arith.constant dense<0.000000e+00> : vector<5x5xf32>
    %312 = tpu.matmul %310, %311, %cst_120 {dimension_numbers = #tpu.dot_dimension_numbers<[1], [1], [0], [0], [0, 0, 1, 0], [], []>} : vector<5x8xf32>, vector<5x8xf32>, vector<5x5xf32> -> vector<5x5xf32>
    %cst_121 = arith.constant dense<0xFF800000> : vector<5xf32>
    %313 = vector.multi_reduction <maximumf>, %312, %cst_121 [1] : vector<5x5xf32> to vector<5xf32>
    %314 = vector.shape_cast %313 : vector<5xf32> to vector<5x1xf32>
    %315 = vector.broadcast %314 : vector<5x1xf32> to vector<5x5xf32>
    %316 = arith.subf %312, %315 : vector<5x5xf32>
    %317 = math.exp %316 : vector<5x5xf32>
    %cst_122 = arith.constant dense<0.000000e+00> : vector<5xf32>
    %318 = vector.multi_reduction <add>, %317, %cst_122 [1] : vector<5x5xf32> to vector<5xf32>
    %319 = vector.shape_cast %318 : vector<5xf32> to vector<5x1xf32>
    %320 = tpu.reciprocal %319 {approx = true} : vector<5x1xf32> -> vector<5x1xf32>
    %321 = vector.broadcast %320 : vector<5x1xf32> to vector<5x5xf32>
    %322 = arith.mulf %317, %321 : vector<5x5xf32>
    %323 = vector.extract_strided_slice %264 {offsets = [0, 24], sizes = [5, 8], strides = [1, 1]} : vector<5x32xf32> to vector<5x8xf32>
    %cst_123 = arith.constant dense<0.000000e+00> : vector<5x8xf32>
    %324 = tpu.matmul %322, %323, %cst_123 {dimension_numbers = #tpu.dot_dimension_numbers<[1], [0], [0], [1], [0, 0, 1, 1], [], []>} : vector<5x5xf32>, vector<5x8xf32>, vector<5x8xf32> -> vector<5x8xf32>
    %325 = tpu.concatenate %279, %294, %309, %324 in 1 : vector<5x8xf32>, vector<5x8xf32>, vector<5x8xf32>, vector<5x8xf32> -> vector<5x32xf32>
    %326 = vector.extract_strided_slice %259 {offsets = [5, 0], sizes = [5, 32], strides = [1, 1]} : vector<10x32xf32> to vector<5x32xf32>
    %327 = vector.extract_strided_slice %260 {offsets = [5, 0], sizes = [5, 32], strides = [1, 1]} : vector<10x32xf32> to vector<5x32xf32>
    %328 = vector.extract_strided_slice %261 {offsets = [5, 0], sizes = [5, 32], strides = [1, 1]} : vector<10x32xf32> to vector<5x32xf32>
    %329 = vector.extract_strided_slice %326 {offsets = [0, 0], sizes = [5, 8], strides = [1, 1]} : vector<5x32xf32> to vector<5x8xf32>
    %330 = vector.extract_strided_slice %327 {offsets = [0, 0], sizes = [5, 8], strides = [1, 1]} : vector<5x32xf32> to vector<5x8xf32>
    %cst_124 = arith.constant dense<0.000000e+00> : vector<5x5xf32>
    %331 = tpu.matmul %329, %330, %cst_124 {dimension_numbers = #tpu.dot_dimension_numbers<[1], [1], [0], [0], [0, 0, 1, 0], [], []>} : vector<5x8xf32>, vector<5x8xf32>, vector<5x5xf32> -> vector<5x5xf32>
    %cst_125 = arith.constant dense<0xFF800000> : vector<5xf32>
    %332 = vector.multi_reduction <maximumf>, %331, %cst_125 [1] : vector<5x5xf32> to vector<5xf32>
    %333 = vector.shape_cast %332 : vector<5xf32> to vector<5x1xf32>
    %334 = vector.broadcast %333 : vector<5x1xf32> to vector<5x5xf32>
    %335 = arith.subf %331, %334 : vector<5x5xf32>
    %336 = math.exp %335 : vector<5x5xf32>
    %cst_126 = arith.constant dense<0.000000e+00> : vector<5xf32>
    %337 = vector.multi_reduction <add>, %336, %cst_126 [1] : vector<5x5xf32> to vector<5xf32>
    %338 = vector.shape_cast %337 : vector<5xf32> to vector<5x1xf32>
    %339 = tpu.reciprocal %338 {approx = true} : vector<5x1xf32> -> vector<5x1xf32>
    %340 = vector.broadcast %339 : vector<5x1xf32> to vector<5x5xf32>
    %341 = arith.mulf %336, %340 : vector<5x5xf32>
    %342 = vector.extract_strided_slice %328 {offsets = [0, 0], sizes = [5, 8], strides = [1, 1]} : vector<5x32xf32> to vector<5x8xf32>
    %cst_127 = arith.constant dense<0.000000e+00> : vector<5x8xf32>
    %343 = tpu.matmul %341, %342, %cst_127 {dimension_numbers = #tpu.dot_dimension_numbers<[1], [0], [0], [1], [0, 0, 1, 1], [], []>} : vector<5x5xf32>, vector<5x8xf32>, vector<5x8xf32> -> vector<5x8xf32>
    %344 = vector.extract_strided_slice %326 {offsets = [0, 8], sizes = [5, 8], strides = [1, 1]} : vector<5x32xf32> to vector<5x8xf32>
    %345 = vector.extract_strided_slice %327 {offsets = [0, 8], sizes = [5, 8], strides = [1, 1]} : vector<5x32xf32> to vector<5x8xf32>
    %cst_128 = arith.constant dense<0.000000e+00> : vector<5x5xf32>
    %346 = tpu.matmul %344, %345, %cst_128 {dimension_numbers = #tpu.dot_dimension_numbers<[1], [1], [0], [0], [0, 0, 1, 0], [], []>} : vector<5x8xf32>, vector<5x8xf32>, vector<5x5xf32> -> vector<5x5xf32>
    %cst_129 = arith.constant dense<0xFF800000> : vector<5xf32>
    %347 = vector.multi_reduction <maximumf>, %346, %cst_129 [1] : vector<5x5xf32> to vector<5xf32>
    %348 = vector.shape_cast %347 : vector<5xf32> to vector<5x1xf32>
    %349 = vector.broadcast %348 : vector<5x1xf32> to vector<5x5xf32>
    %350 = arith.subf %346, %349 : vector<5x5xf32>
    %351 = math.exp %350 : vector<5x5xf32>
    %cst_130 = arith.constant dense<0.000000e+00> : vector<5xf32>
    %352 = vector.multi_reduction <add>, %351, %cst_130 [1] : vector<5x5xf32> to vector<5xf32>
    %353 = vector.shape_cast %352 : vector<5xf32> to vector<5x1xf32>
    %354 = tpu.reciprocal %353 {approx = true} : vector<5x1xf32> -> vector<5x1xf32>
    %355 = vector.broadcast %354 : vector<5x1xf32> to vector<5x5xf32>
    %356 = arith.mulf %351, %355 : vector<5x5xf32>
    %357 = vector.extract_strided_slice %328 {offsets = [0, 8], sizes = [5, 8], strides = [1, 1]} : vector<5x32xf32> to vector<5x8xf32>
    %cst_131 = arith.constant dense<0.000000e+00> : vector<5x8xf32>
    %358 = tpu.matmul %356, %357, %cst_131 {dimension_numbers = #tpu.dot_dimension_numbers<[1], [0], [0], [1], [0, 0, 1, 1], [], []>} : vector<5x5xf32>, vector<5x8xf32>, vector<5x8xf32> -> vector<5x8xf32>
    %359 = vector.extract_strided_slice %326 {offsets = [0, 16], sizes = [5, 8], strides = [1, 1]} : vector<5x32xf32> to vector<5x8xf32>
    %360 = vector.extract_strided_slice %327 {offsets = [0, 16], sizes = [5, 8], strides = [1, 1]} : vector<5x32xf32> to vector<5x8xf32>
    %cst_132 = arith.constant dense<0.000000e+00> : vector<5x5xf32>
    %361 = tpu.matmul %359, %360, %cst_132 {dimension_numbers = #tpu.dot_dimension_numbers<[1], [1], [0], [0], [0, 0, 1, 0], [], []>} : vector<5x8xf32>, vector<5x8xf32>, vector<5x5xf32> -> vector<5x5xf32>
    %cst_133 = arith.constant dense<0xFF800000> : vector<5xf32>
    %362 = vector.multi_reduction <maximumf>, %361, %cst_133 [1] : vector<5x5xf32> to vector<5xf32>
    %363 = vector.shape_cast %362 : vector<5xf32> to vector<5x1xf32>
    %364 = vector.broadcast %363 : vector<5x1xf32> to vector<5x5xf32>
    %365 = arith.subf %361, %364 : vector<5x5xf32>
    %366 = math.exp %365 : vector<5x5xf32>
    %cst_134 = arith.constant dense<0.000000e+00> : vector<5xf32>
    %367 = vector.multi_reduction <add>, %366, %cst_134 [1] : vector<5x5xf32> to vector<5xf32>
    %368 = vector.shape_cast %367 : vector<5xf32> to vector<5x1xf32>
    %369 = tpu.reciprocal %368 {approx = true} : vector<5x1xf32> -> vector<5x1xf32>
    %370 = vector.broadcast %369 : vector<5x1xf32> to vector<5x5xf32>
    %371 = arith.mulf %366, %370 : vector<5x5xf32>
    %372 = vector.extract_strided_slice %328 {offsets = [0, 16], sizes = [5, 8], strides = [1, 1]} : vector<5x32xf32> to vector<5x8xf32>
    %cst_135 = arith.constant dense<0.000000e+00> : vector<5x8xf32>
    %373 = tpu.matmul %371, %372, %cst_135 {dimension_numbers = #tpu.dot_dimension_numbers<[1], [0], [0], [1], [0, 0, 1, 1], [], []>} : vector<5x5xf32>, vector<5x8xf32>, vector<5x8xf32> -> vector<5x8xf32>
    %374 = vector.extract_strided_slice %326 {offsets = [0, 24], sizes = [5, 8], strides = [1, 1]} : vector<5x32xf32> to vector<5x8xf32>
    %375 = vector.extract_strided_slice %327 {offsets = [0, 24], sizes = [5, 8], strides = [1, 1]} : vector<5x32xf32> to vector<5x8xf32>
    %cst_136 = arith.constant dense<0.000000e+00> : vector<5x5xf32>
    %376 = tpu.matmul %374, %375, %cst_136 {dimension_numbers = #tpu.dot_dimension_numbers<[1], [1], [0], [0], [0, 0, 1, 0], [], []>} : vector<5x8xf32>, vector<5x8xf32>, vector<5x5xf32> -> vector<5x5xf32>
    %cst_137 = arith.constant dense<0xFF800000> : vector<5xf32>
    %377 = vector.multi_reduction <maximumf>, %376, %cst_137 [1] : vector<5x5xf32> to vector<5xf32>
    %378 = vector.shape_cast %377 : vector<5xf32> to vector<5x1xf32>
    %379 = vector.broadcast %378 : vector<5x1xf32> to vector<5x5xf32>
    %380 = arith.subf %376, %379 : vector<5x5xf32>
    %381 = math.exp %380 : vector<5x5xf32>
    %cst_138 = arith.constant dense<0.000000e+00> : vector<5xf32>
    %382 = vector.multi_reduction <add>, %381, %cst_138 [1] : vector<5x5xf32> to vector<5xf32>
    %383 = vector.shape_cast %382 : vector<5xf32> to vector<5x1xf32>
    %384 = tpu.reciprocal %383 {approx = true} : vector<5x1xf32> -> vector<5x1xf32>
    %385 = vector.broadcast %384 : vector<5x1xf32> to vector<5x5xf32>
    %386 = arith.mulf %381, %385 : vector<5x5xf32>
    %387 = vector.extract_strided_slice %328 {offsets = [0, 24], sizes = [5, 8], strides = [1, 1]} : vector<5x32xf32> to vector<5x8xf32>
    %cst_139 = arith.constant dense<0.000000e+00> : vector<5x8xf32>
    %388 = tpu.matmul %386, %387, %cst_139 {dimension_numbers = #tpu.dot_dimension_numbers<[1], [0], [0], [1], [0, 0, 1, 1], [], []>} : vector<5x5xf32>, vector<5x8xf32>, vector<5x8xf32> -> vector<5x8xf32>
    %389 = tpu.concatenate %343, %358, %373, %388 in 1 : vector<5x8xf32>, vector<5x8xf32>, vector<5x8xf32>, vector<5x8xf32> -> vector<5x32xf32>
    %390 = tpu.concatenate %325, %389 in 0 : vector<5x32xf32>, vector<5x32xf32> -> vector<10x32xf32>
    %c1_140 = arith.constant 1 : index
    %c0_141 = arith.constant 0 : index
    %c0_142 = arith.constant 0 : index
    %391 = vector.load %arg7[%c1_140, %c0_141, %c0_142] : memref<3x32x32xf32, #tpu.memory_space<vmem>>, vector<1x32x32xf32>
    %392 = vector.shape_cast %391 : vector<1x32x32xf32> to vector<32x32xf32>
    %cst_143 = arith.constant dense<0.000000e+00> : vector<10x32xf32>
    %393 = tpu.matmul %390, %392, %cst_143 {dimension_numbers = #tpu.dot_dimension_numbers<[1], [0], [0], [1], [0, 0, 1, 1], [], []>} : vector<10x32xf32>, vector<32x32xf32>, vector<10x32xf32> -> vector<10x32xf32>
    %c1_144 = arith.constant 1 : index
    %c0_145 = arith.constant 0 : index
    %c0_146 = arith.constant 0 : index
    %394 = vector.load %arg8[%c1_144, %c0_145, %c0_146] : memref<3x1x32xf32, #tpu.memory_space<vmem>>, vector<1x1x32xf32>
    %395 = vector.shape_cast %394 : vector<1x1x32xf32> to vector<1x32xf32>
    %396 = vector.broadcast %395 : vector<1x32xf32> to vector<10x32xf32>
    %397 = arith.addf %393, %396 : vector<10x32xf32>
    %398 = arith.addf %227, %397 : vector<10x32xf32>
    %c1_147 = arith.constant 1 : index
    %c0_148 = arith.constant 0 : index
    %c0_149 = arith.constant 0 : index
    %399 = vector.load %arg9[%c1_147, %c0_148, %c0_149] : memref<3x1x32xf32, #tpu.memory_space<vmem>>, vector<1x1x32xf32>
    %400 = vector.shape_cast %399 : vector<1x1x32xf32> to vector<1x32xf32>
    %c1_150 = arith.constant 1 : index
    %c0_151 = arith.constant 0 : index
    %c0_152 = arith.constant 0 : index
    %401 = vector.load %arg10[%c1_150, %c0_151, %c0_152] : memref<3x1x32xf32, #tpu.memory_space<vmem>>, vector<1x1x32xf32>
    %402 = vector.shape_cast %401 : vector<1x1x32xf32> to vector<1x32xf32>
    %cst_153 = arith.constant dense<0.000000e+00> : vector<10xf32>
    %403 = vector.multi_reduction <add>, %398, %cst_153 [1] : vector<10x32xf32> to vector<10xf32>
    %404 = vector.shape_cast %403 : vector<10xf32> to vector<10x1xf32>
    %cst_154 = arith.constant 3.200000e+01 : f32
    %405 = vector.broadcast %cst_154 : f32 to vector<10x1xf32>
    %406 = arith.divf %404, %405 : vector<10x1xf32>
    %407 = vector.broadcast %406 : vector<10x1xf32> to vector<10x32xf32>
    %408 = arith.subf %398, %407 : vector<10x32xf32>
    %409 = arith.mulf %408, %408 : vector<10x32xf32>
    %cst_155 = arith.constant dense<0.000000e+00> : vector<10xf32>
    %410 = vector.multi_reduction <add>, %409, %cst_155 [1] : vector<10x32xf32> to vector<10xf32>
    %411 = vector.shape_cast %410 : vector<10xf32> to vector<10x1xf32>
    %cst_156 = arith.constant 3.200000e+01 : f32
    %412 = vector.broadcast %cst_156 : f32 to vector<10x1xf32>
    %413 = arith.divf %411, %412 : vector<10x1xf32>
    %cst_157 = arith.constant 9.99999997E-7 : f32
    %414 = vector.broadcast %cst_157 : f32 to vector<10x1xf32>
    %415 = arith.addf %413, %414 : vector<10x1xf32>
    %416 = math.rsqrt %415 : vector<10x1xf32>
    %417 = vector.broadcast %416 : vector<10x1xf32> to vector<10x32xf32>
    %418 = arith.mulf %408, %417 : vector<10x32xf32>
    %419 = vector.broadcast %400 : vector<1x32xf32> to vector<10x32xf32>
    %420 = arith.mulf %418, %419 : vector<10x32xf32>
    %421 = vector.broadcast %402 : vector<1x32xf32> to vector<10x32xf32>
    %422 = arith.addf %420, %421 : vector<10x32xf32>
    %c1_158 = arith.constant 1 : index
    %c0_159 = arith.constant 0 : index
    %c0_160 = arith.constant 0 : index
    %423 = vector.load %arg11[%c1_158, %c0_159, %c0_160] : memref<3x32x64xf32, #tpu.memory_space<vmem>>, vector<1x32x64xf32>
    %424 = vector.shape_cast %423 : vector<1x32x64xf32> to vector<32x64xf32>
    %cst_161 = arith.constant dense<0.000000e+00> : vector<10x64xf32>
    %425 = tpu.matmul %422, %424, %cst_161 {dimension_numbers = #tpu.dot_dimension_numbers<[1], [0], [0], [1], [0, 0, 1, 1], [], []>} : vector<10x32xf32>, vector<32x64xf32>, vector<10x64xf32> -> vector<10x64xf32>
    %c1_162 = arith.constant 1 : index
    %c0_163 = arith.constant 0 : index
    %c0_164 = arith.constant 0 : index
    %426 = vector.load %arg12[%c1_162, %c0_163, %c0_164] : memref<3x1x64xf32, #tpu.memory_space<vmem>>, vector<1x1x64xf32>
    %427 = vector.shape_cast %426 : vector<1x1x64xf32> to vector<1x64xf32>
    %428 = vector.broadcast %427 : vector<1x64xf32> to vector<10x64xf32>
    %429 = arith.addf %425, %428 : vector<10x64xf32>
    %cst_165 = arith.constant 5.000000e-01 : f32
    %430 = vector.broadcast %cst_165 : f32 to vector<10x64xf32>
    %431 = arith.mulf %430, %429 : vector<10x64xf32>
    %cst_166 = arith.constant 4.471500e-02 : f32
    %432 = vector.broadcast %cst_166 : f32 to vector<10x64xf32>
    %433 = arith.mulf %432, %429 : vector<10x64xf32>
    %434 = arith.mulf %433, %429 : vector<10x64xf32>
    %435 = arith.mulf %434, %429 : vector<10x64xf32>
    %436 = arith.addf %429, %435 : vector<10x64xf32>
    %cst_167 = arith.constant 0.797884583 : f32
    %437 = vector.broadcast %cst_167 : f32 to vector<10x64xf32>
    %438 = arith.mulf %437, %436 : vector<10x64xf32>
    %439 = math.tanh %438 : vector<10x64xf32>
    %cst_168 = arith.constant 1.000000e+00 : f32
    %440 = vector.broadcast %cst_168 : f32 to vector<10x64xf32>
    %441 = arith.addf %440, %439 : vector<10x64xf32>
    %442 = arith.mulf %431, %441 : vector<10x64xf32>
    %c1_169 = arith.constant 1 : index
    %c0_170 = arith.constant 0 : index
    %c0_171 = arith.constant 0 : index
    %443 = vector.load %arg13[%c1_169, %c0_170, %c0_171] : memref<3x64x32xf32, #tpu.memory_space<vmem>>, vector<1x64x32xf32>
    %444 = vector.shape_cast %443 : vector<1x64x32xf32> to vector<64x32xf32>
    %cst_172 = arith.constant dense<0.000000e+00> : vector<10x32xf32>
    %445 = tpu.matmul %442, %444, %cst_172 {dimension_numbers = #tpu.dot_dimension_numbers<[1], [0], [0], [1], [0, 0, 1, 1], [], []>} : vector<10x64xf32>, vector<64x32xf32>, vector<10x32xf32> -> vector<10x32xf32>
    %c1_173 = arith.constant 1 : index
    %c0_174 = arith.constant 0 : index
    %c0_175 = arith.constant 0 : index
    %446 = vector.load %arg14[%c1_173, %c0_174, %c0_175] : memref<3x1x32xf32, #tpu.memory_space<vmem>>, vector<1x1x32xf32>
    %447 = vector.shape_cast %446 : vector<1x1x32xf32> to vector<1x32xf32>
    %448 = vector.broadcast %447 : vector<1x32xf32> to vector<10x32xf32>
    %449 = arith.addf %445, %448 : vector<10x32xf32>
    %450 = arith.addf %398, %449 : vector<10x32xf32>
    %c2 = arith.constant 2 : index
    %c0_176 = arith.constant 0 : index
    %c0_177 = arith.constant 0 : index
    %451 = vector.load %arg3[%c2, %c0_176, %c0_177] : memref<3x1x32xf32, #tpu.memory_space<vmem>>, vector<1x1x32xf32>
    %452 = vector.shape_cast %451 : vector<1x1x32xf32> to vector<1x32xf32>
    %c2_178 = arith.constant 2 : index
    %c0_179 = arith.constant 0 : index
    %c0_180 = arith.constant 0 : index
    %453 = vector.load %arg4[%c2_178, %c0_179, %c0_180] : memref<3x1x32xf32, #tpu.memory_space<vmem>>, vector<1x1x32xf32>
    %454 = vector.shape_cast %453 : vector<1x1x32xf32> to vector<1x32xf32>
    %cst_181 = arith.constant dense<0.000000e+00> : vector<10xf32>
    %455 = vector.multi_reduction <add>, %450, %cst_181 [1] : vector<10x32xf32> to vector<10xf32>
    %456 = vector.shape_cast %455 : vector<10xf32> to vector<10x1xf32>
    %cst_182 = arith.constant 3.200000e+01 : f32
    %457 = vector.broadcast %cst_182 : f32 to vector<10x1xf32>
    %458 = arith.divf %456, %457 : vector<10x1xf32>
    %459 = vector.broadcast %458 : vector<10x1xf32> to vector<10x32xf32>
    %460 = arith.subf %450, %459 : vector<10x32xf32>
    %461 = arith.mulf %460, %460 : vector<10x32xf32>
    %cst_183 = arith.constant dense<0.000000e+00> : vector<10xf32>
    %462 = vector.multi_reduction <add>, %461, %cst_183 [1] : vector<10x32xf32> to vector<10xf32>
    %463 = vector.shape_cast %462 : vector<10xf32> to vector<10x1xf32>
    %cst_184 = arith.constant 3.200000e+01 : f32
    %464 = vector.broadcast %cst_184 : f32 to vector<10x1xf32>
    %465 = arith.divf %463, %464 : vector<10x1xf32>
    %cst_185 = arith.constant 9.99999997E-7 : f32
    %466 = vector.broadcast %cst_185 : f32 to vector<10x1xf32>
    %467 = arith.addf %465, %466 : vector<10x1xf32>
    %468 = math.rsqrt %467 : vector<10x1xf32>
    %469 = vector.broadcast %468 : vector<10x1xf32> to vector<10x32xf32>
    %470 = arith.mulf %460, %469 : vector<10x32xf32>
    %471 = vector.broadcast %452 : vector<1x32xf32> to vector<10x32xf32>
    %472 = arith.mulf %470, %471 : vector<10x32xf32>
    %473 = vector.broadcast %454 : vector<1x32xf32> to vector<10x32xf32>
    %474 = arith.addf %472, %473 : vector<10x32xf32>
    %c2_186 = arith.constant 2 : index
    %c0_187 = arith.constant 0 : index
    %c0_188 = arith.constant 0 : index
    %475 = vector.load %arg5[%c2_186, %c0_187, %c0_188] : memref<3x32x96xf32, #tpu.memory_space<vmem>>, vector<1x32x96xf32>
    %476 = vector.shape_cast %475 : vector<1x32x96xf32> to vector<32x96xf32>
    %cst_189 = arith.constant dense<0.000000e+00> : vector<10x96xf32>
    %477 = tpu.matmul %474, %476, %cst_189 {dimension_numbers = #tpu.dot_dimension_numbers<[1], [0], [0], [1], [0, 0, 1, 1], [], []>} : vector<10x32xf32>, vector<32x96xf32>, vector<10x96xf32> -> vector<10x96xf32>
    %c2_190 = arith.constant 2 : index
    %c0_191 = arith.constant 0 : index
    %c0_192 = arith.constant 0 : index
    %478 = vector.load %arg6[%c2_190, %c0_191, %c0_192] : memref<3x1x96xf32, #tpu.memory_space<vmem>>, vector<1x1x96xf32>
    %479 = vector.shape_cast %478 : vector<1x1x96xf32> to vector<1x96xf32>
    %480 = vector.broadcast %479 : vector<1x96xf32> to vector<10x96xf32>
    %481 = arith.addf %477, %480 : vector<10x96xf32>
    %482 = vector.extract_strided_slice %481 {offsets = [0, 0], sizes = [10, 32], strides = [1, 1]} : vector<10x96xf32> to vector<10x32xf32>
    %483 = vector.extract_strided_slice %481 {offsets = [0, 32], sizes = [10, 32], strides = [1, 1]} : vector<10x96xf32> to vector<10x32xf32>
    %484 = vector.extract_strided_slice %481 {offsets = [0, 64], sizes = [10, 32], strides = [1, 1]} : vector<10x96xf32> to vector<10x32xf32>
    %485 = vector.extract_strided_slice %482 {offsets = [0, 0], sizes = [5, 32], strides = [1, 1]} : vector<10x32xf32> to vector<5x32xf32>
    %486 = vector.extract_strided_slice %483 {offsets = [0, 0], sizes = [5, 32], strides = [1, 1]} : vector<10x32xf32> to vector<5x32xf32>
    %487 = vector.extract_strided_slice %484 {offsets = [0, 0], sizes = [5, 32], strides = [1, 1]} : vector<10x32xf32> to vector<5x32xf32>
    %488 = vector.extract_strided_slice %485 {offsets = [0, 0], sizes = [5, 8], strides = [1, 1]} : vector<5x32xf32> to vector<5x8xf32>
    %489 = vector.extract_strided_slice %486 {offsets = [0, 0], sizes = [5, 8], strides = [1, 1]} : vector<5x32xf32> to vector<5x8xf32>
    %cst_193 = arith.constant dense<0.000000e+00> : vector<5x5xf32>
    %490 = tpu.matmul %488, %489, %cst_193 {dimension_numbers = #tpu.dot_dimension_numbers<[1], [1], [0], [0], [0, 0, 1, 0], [], []>} : vector<5x8xf32>, vector<5x8xf32>, vector<5x5xf32> -> vector<5x5xf32>
    %cst_194 = arith.constant dense<0xFF800000> : vector<5xf32>
    %491 = vector.multi_reduction <maximumf>, %490, %cst_194 [1] : vector<5x5xf32> to vector<5xf32>
    %492 = vector.shape_cast %491 : vector<5xf32> to vector<5x1xf32>
    %493 = vector.broadcast %492 : vector<5x1xf32> to vector<5x5xf32>
    %494 = arith.subf %490, %493 : vector<5x5xf32>
    %495 = math.exp %494 : vector<5x5xf32>
    %cst_195 = arith.constant dense<0.000000e+00> : vector<5xf32>
    %496 = vector.multi_reduction <add>, %495, %cst_195 [1] : vector<5x5xf32> to vector<5xf32>
    %497 = vector.shape_cast %496 : vector<5xf32> to vector<5x1xf32>
    %498 = tpu.reciprocal %497 {approx = true} : vector<5x1xf32> -> vector<5x1xf32>
    %499 = vector.broadcast %498 : vector<5x1xf32> to vector<5x5xf32>
    %500 = arith.mulf %495, %499 : vector<5x5xf32>
    %501 = vector.extract_strided_slice %487 {offsets = [0, 0], sizes = [5, 8], strides = [1, 1]} : vector<5x32xf32> to vector<5x8xf32>
    %cst_196 = arith.constant dense<0.000000e+00> : vector<5x8xf32>
    %502 = tpu.matmul %500, %501, %cst_196 {dimension_numbers = #tpu.dot_dimension_numbers<[1], [0], [0], [1], [0, 0, 1, 1], [], []>} : vector<5x5xf32>, vector<5x8xf32>, vector<5x8xf32> -> vector<5x8xf32>
    %503 = vector.extract_strided_slice %485 {offsets = [0, 8], sizes = [5, 8], strides = [1, 1]} : vector<5x32xf32> to vector<5x8xf32>
    %504 = vector.extract_strided_slice %486 {offsets = [0, 8], sizes = [5, 8], strides = [1, 1]} : vector<5x32xf32> to vector<5x8xf32>
    %cst_197 = arith.constant dense<0.000000e+00> : vector<5x5xf32>
    %505 = tpu.matmul %503, %504, %cst_197 {dimension_numbers = #tpu.dot_dimension_numbers<[1], [1], [0], [0], [0, 0, 1, 0], [], []>} : vector<5x8xf32>, vector<5x8xf32>, vector<5x5xf32> -> vector<5x5xf32>
    %cst_198 = arith.constant dense<0xFF800000> : vector<5xf32>
    %506 = vector.multi_reduction <maximumf>, %505, %cst_198 [1] : vector<5x5xf32> to vector<5xf32>
    %507 = vector.shape_cast %506 : vector<5xf32> to vector<5x1xf32>
    %508 = vector.broadcast %507 : vector<5x1xf32> to vector<5x5xf32>
    %509 = arith.subf %505, %508 : vector<5x5xf32>
    %510 = math.exp %509 : vector<5x5xf32>
    %cst_199 = arith.constant dense<0.000000e+00> : vector<5xf32>
    %511 = vector.multi_reduction <add>, %510, %cst_199 [1] : vector<5x5xf32> to vector<5xf32>
    %512 = vector.shape_cast %511 : vector<5xf32> to vector<5x1xf32>
    %513 = tpu.reciprocal %512 {approx = true} : vector<5x1xf32> -> vector<5x1xf32>
    %514 = vector.broadcast %513 : vector<5x1xf32> to vector<5x5xf32>
    %515 = arith.mulf %510, %514 : vector<5x5xf32>
    %516 = vector.extract_strided_slice %487 {offsets = [0, 8], sizes = [5, 8], strides = [1, 1]} : vector<5x32xf32> to vector<5x8xf32>
    %cst_200 = arith.constant dense<0.000000e+00> : vector<5x8xf32>
    %517 = tpu.matmul %515, %516, %cst_200 {dimension_numbers = #tpu.dot_dimension_numbers<[1], [0], [0], [1], [0, 0, 1, 1], [], []>} : vector<5x5xf32>, vector<5x8xf32>, vector<5x8xf32> -> vector<5x8xf32>
    %518 = vector.extract_strided_slice %485 {offsets = [0, 16], sizes = [5, 8], strides = [1, 1]} : vector<5x32xf32> to vector<5x8xf32>
    %519 = vector.extract_strided_slice %486 {offsets = [0, 16], sizes = [5, 8], strides = [1, 1]} : vector<5x32xf32> to vector<5x8xf32>
    %cst_201 = arith.constant dense<0.000000e+00> : vector<5x5xf32>
    %520 = tpu.matmul %518, %519, %cst_201 {dimension_numbers = #tpu.dot_dimension_numbers<[1], [1], [0], [0], [0, 0, 1, 0], [], []>} : vector<5x8xf32>, vector<5x8xf32>, vector<5x5xf32> -> vector<5x5xf32>
    %cst_202 = arith.constant dense<0xFF800000> : vector<5xf32>
    %521 = vector.multi_reduction <maximumf>, %520, %cst_202 [1] : vector<5x5xf32> to vector<5xf32>
    %522 = vector.shape_cast %521 : vector<5xf32> to vector<5x1xf32>
    %523 = vector.broadcast %522 : vector<5x1xf32> to vector<5x5xf32>
    %524 = arith.subf %520, %523 : vector<5x5xf32>
    %525 = math.exp %524 : vector<5x5xf32>
    %cst_203 = arith.constant dense<0.000000e+00> : vector<5xf32>
    %526 = vector.multi_reduction <add>, %525, %cst_203 [1] : vector<5x5xf32> to vector<5xf32>
    %527 = vector.shape_cast %526 : vector<5xf32> to vector<5x1xf32>
    %528 = tpu.reciprocal %527 {approx = true} : vector<5x1xf32> -> vector<5x1xf32>
    %529 = vector.broadcast %528 : vector<5x1xf32> to vector<5x5xf32>
    %530 = arith.mulf %525, %529 : vector<5x5xf32>
    %531 = vector.extract_strided_slice %487 {offsets = [0, 16], sizes = [5, 8], strides = [1, 1]} : vector<5x32xf32> to vector<5x8xf32>
    %cst_204 = arith.constant dense<0.000000e+00> : vector<5x8xf32>
    %532 = tpu.matmul %530, %531, %cst_204 {dimension_numbers = #tpu.dot_dimension_numbers<[1], [0], [0], [1], [0, 0, 1, 1], [], []>} : vector<5x5xf32>, vector<5x8xf32>, vector<5x8xf32> -> vector<5x8xf32>
    %533 = vector.extract_strided_slice %485 {offsets = [0, 24], sizes = [5, 8], strides = [1, 1]} : vector<5x32xf32> to vector<5x8xf32>
    %534 = vector.extract_strided_slice %486 {offsets = [0, 24], sizes = [5, 8], strides = [1, 1]} : vector<5x32xf32> to vector<5x8xf32>
    %cst_205 = arith.constant dense<0.000000e+00> : vector<5x5xf32>
    %535 = tpu.matmul %533, %534, %cst_205 {dimension_numbers = #tpu.dot_dimension_numbers<[1], [1], [0], [0], [0, 0, 1, 0], [], []>} : vector<5x8xf32>, vector<5x8xf32>, vector<5x5xf32> -> vector<5x5xf32>
    %cst_206 = arith.constant dense<0xFF800000> : vector<5xf32>
    %536 = vector.multi_reduction <maximumf>, %535, %cst_206 [1] : vector<5x5xf32> to vector<5xf32>
    %537 = vector.shape_cast %536 : vector<5xf32> to vector<5x1xf32>
    %538 = vector.broadcast %537 : vector<5x1xf32> to vector<5x5xf32>
    %539 = arith.subf %535, %538 : vector<5x5xf32>
    %540 = math.exp %539 : vector<5x5xf32>
    %cst_207 = arith.constant dense<0.000000e+00> : vector<5xf32>
    %541 = vector.multi_reduction <add>, %540, %cst_207 [1] : vector<5x5xf32> to vector<5xf32>
    %542 = vector.shape_cast %541 : vector<5xf32> to vector<5x1xf32>
    %543 = tpu.reciprocal %542 {approx = true} : vector<5x1xf32> -> vector<5x1xf32>
    %544 = vector.broadcast %543 : vector<5x1xf32> to vector<5x5xf32>
    %545 = arith.mulf %540, %544 : vector<5x5xf32>
    %546 = vector.extract_strided_slice %487 {offsets = [0, 24], sizes = [5, 8], strides = [1, 1]} : vector<5x32xf32> to vector<5x8xf32>
    %cst_208 = arith.constant dense<0.000000e+00> : vector<5x8xf32>
    %547 = tpu.matmul %545, %546, %cst_208 {dimension_numbers = #tpu.dot_dimension_numbers<[1], [0], [0], [1], [0, 0, 1, 1], [], []>} : vector<5x5xf32>, vector<5x8xf32>, vector<5x8xf32> -> vector<5x8xf32>
    %548 = tpu.concatenate %502, %517, %532, %547 in 1 : vector<5x8xf32>, vector<5x8xf32>, vector<5x8xf32>, vector<5x8xf32> -> vector<5x32xf32>
    %549 = vector.extract_strided_slice %482 {offsets = [5, 0], sizes = [5, 32], strides = [1, 1]} : vector<10x32xf32> to vector<5x32xf32>
    %550 = vector.extract_strided_slice %483 {offsets = [5, 0], sizes = [5, 32], strides = [1, 1]} : vector<10x32xf32> to vector<5x32xf32>
    %551 = vector.extract_strided_slice %484 {offsets = [5, 0], sizes = [5, 32], strides = [1, 1]} : vector<10x32xf32> to vector<5x32xf32>
    %552 = vector.extract_strided_slice %549 {offsets = [0, 0], sizes = [5, 8], strides = [1, 1]} : vector<5x32xf32> to vector<5x8xf32>
    %553 = vector.extract_strided_slice %550 {offsets = [0, 0], sizes = [5, 8], strides = [1, 1]} : vector<5x32xf32> to vector<5x8xf32>
    %cst_209 = arith.constant dense<0.000000e+00> : vector<5x5xf32>
    %554 = tpu.matmul %552, %553, %cst_209 {dimension_numbers = #tpu.dot_dimension_numbers<[1], [1], [0], [0], [0, 0, 1, 0], [], []>} : vector<5x8xf32>, vector<5x8xf32>, vector<5x5xf32> -> vector<5x5xf32>
    %cst_210 = arith.constant dense<0xFF800000> : vector<5xf32>
    %555 = vector.multi_reduction <maximumf>, %554, %cst_210 [1] : vector<5x5xf32> to vector<5xf32>
    %556 = vector.shape_cast %555 : vector<5xf32> to vector<5x1xf32>
    %557 = vector.broadcast %556 : vector<5x1xf32> to vector<5x5xf32>
    %558 = arith.subf %554, %557 : vector<5x5xf32>
    %559 = math.exp %558 : vector<5x5xf32>
    %cst_211 = arith.constant dense<0.000000e+00> : vector<5xf32>
    %560 = vector.multi_reduction <add>, %559, %cst_211 [1] : vector<5x5xf32> to vector<5xf32>
    %561 = vector.shape_cast %560 : vector<5xf32> to vector<5x1xf32>
    %562 = tpu.reciprocal %561 {approx = true} : vector<5x1xf32> -> vector<5x1xf32>
    %563 = vector.broadcast %562 : vector<5x1xf32> to vector<5x5xf32>
    %564 = arith.mulf %559, %563 : vector<5x5xf32>
    %565 = vector.extract_strided_slice %551 {offsets = [0, 0], sizes = [5, 8], strides = [1, 1]} : vector<5x32xf32> to vector<5x8xf32>
    %cst_212 = arith.constant dense<0.000000e+00> : vector<5x8xf32>
    %566 = tpu.matmul %564, %565, %cst_212 {dimension_numbers = #tpu.dot_dimension_numbers<[1], [0], [0], [1], [0, 0, 1, 1], [], []>} : vector<5x5xf32>, vector<5x8xf32>, vector<5x8xf32> -> vector<5x8xf32>
    %567 = vector.extract_strided_slice %549 {offsets = [0, 8], sizes = [5, 8], strides = [1, 1]} : vector<5x32xf32> to vector<5x8xf32>
    %568 = vector.extract_strided_slice %550 {offsets = [0, 8], sizes = [5, 8], strides = [1, 1]} : vector<5x32xf32> to vector<5x8xf32>
    %cst_213 = arith.constant dense<0.000000e+00> : vector<5x5xf32>
    %569 = tpu.matmul %567, %568, %cst_213 {dimension_numbers = #tpu.dot_dimension_numbers<[1], [1], [0], [0], [0, 0, 1, 0], [], []>} : vector<5x8xf32>, vector<5x8xf32>, vector<5x5xf32> -> vector<5x5xf32>
    %cst_214 = arith.constant dense<0xFF800000> : vector<5xf32>
    %570 = vector.multi_reduction <maximumf>, %569, %cst_214 [1] : vector<5x5xf32> to vector<5xf32>
    %571 = vector.shape_cast %570 : vector<5xf32> to vector<5x1xf32>
    %572 = vector.broadcast %571 : vector<5x1xf32> to vector<5x5xf32>
    %573 = arith.subf %569, %572 : vector<5x5xf32>
    %574 = math.exp %573 : vector<5x5xf32>
    %cst_215 = arith.constant dense<0.000000e+00> : vector<5xf32>
    %575 = vector.multi_reduction <add>, %574, %cst_215 [1] : vector<5x5xf32> to vector<5xf32>
    %576 = vector.shape_cast %575 : vector<5xf32> to vector<5x1xf32>
    %577 = tpu.reciprocal %576 {approx = true} : vector<5x1xf32> -> vector<5x1xf32>
    %578 = vector.broadcast %577 : vector<5x1xf32> to vector<5x5xf32>
    %579 = arith.mulf %574, %578 : vector<5x5xf32>
    %580 = vector.extract_strided_slice %551 {offsets = [0, 8], sizes = [5, 8], strides = [1, 1]} : vector<5x32xf32> to vector<5x8xf32>
    %cst_216 = arith.constant dense<0.000000e+00> : vector<5x8xf32>
    %581 = tpu.matmul %579, %580, %cst_216 {dimension_numbers = #tpu.dot_dimension_numbers<[1], [0], [0], [1], [0, 0, 1, 1], [], []>} : vector<5x5xf32>, vector<5x8xf32>, vector<5x8xf32> -> vector<5x8xf32>
    %582 = vector.extract_strided_slice %549 {offsets = [0, 16], sizes = [5, 8], strides = [1, 1]} : vector<5x32xf32> to vector<5x8xf32>
    %583 = vector.extract_strided_slice %550 {offsets = [0, 16], sizes = [5, 8], strides = [1, 1]} : vector<5x32xf32> to vector<5x8xf32>
    %cst_217 = arith.constant dense<0.000000e+00> : vector<5x5xf32>
    %584 = tpu.matmul %582, %583, %cst_217 {dimension_numbers = #tpu.dot_dimension_numbers<[1], [1], [0], [0], [0, 0, 1, 0], [], []>} : vector<5x8xf32>, vector<5x8xf32>, vector<5x5xf32> -> vector<5x5xf32>
    %cst_218 = arith.constant dense<0xFF800000> : vector<5xf32>
    %585 = vector.multi_reduction <maximumf>, %584, %cst_218 [1] : vector<5x5xf32> to vector<5xf32>
    %586 = vector.shape_cast %585 : vector<5xf32> to vector<5x1xf32>
    %587 = vector.broadcast %586 : vector<5x1xf32> to vector<5x5xf32>
    %588 = arith.subf %584, %587 : vector<5x5xf32>
    %589 = math.exp %588 : vector<5x5xf32>
    %cst_219 = arith.constant dense<0.000000e+00> : vector<5xf32>
    %590 = vector.multi_reduction <add>, %589, %cst_219 [1] : vector<5x5xf32> to vector<5xf32>
    %591 = vector.shape_cast %590 : vector<5xf32> to vector<5x1xf32>
    %592 = tpu.reciprocal %591 {approx = true} : vector<5x1xf32> -> vector<5x1xf32>
    %593 = vector.broadcast %592 : vector<5x1xf32> to vector<5x5xf32>
    %594 = arith.mulf %589, %593 : vector<5x5xf32>
    %595 = vector.extract_strided_slice %551 {offsets = [0, 16], sizes = [5, 8], strides = [1, 1]} : vector<5x32xf32> to vector<5x8xf32>
    %cst_220 = arith.constant dense<0.000000e+00> : vector<5x8xf32>
    %596 = tpu.matmul %594, %595, %cst_220 {dimension_numbers = #tpu.dot_dimension_numbers<[1], [0], [0], [1], [0, 0, 1, 1], [], []>} : vector<5x5xf32>, vector<5x8xf32>, vector<5x8xf32> -> vector<5x8xf32>
    %597 = vector.extract_strided_slice %549 {offsets = [0, 24], sizes = [5, 8], strides = [1, 1]} : vector<5x32xf32> to vector<5x8xf32>
    %598 = vector.extract_strided_slice %550 {offsets = [0, 24], sizes = [5, 8], strides = [1, 1]} : vector<5x32xf32> to vector<5x8xf32>
    %cst_221 = arith.constant dense<0.000000e+00> : vector<5x5xf32>
    %599 = tpu.matmul %597, %598, %cst_221 {dimension_numbers = #tpu.dot_dimension_numbers<[1], [1], [0], [0], [0, 0, 1, 0], [], []>} : vector<5x8xf32>, vector<5x8xf32>, vector<5x5xf32> -> vector<5x5xf32>
    %cst_222 = arith.constant dense<0xFF800000> : vector<5xf32>
    %600 = vector.multi_reduction <maximumf>, %599, %cst_222 [1] : vector<5x5xf32> to vector<5xf32>
    %601 = vector.shape_cast %600 : vector<5xf32> to vector<5x1xf32>
    %602 = vector.broadcast %601 : vector<5x1xf32> to vector<5x5xf32>
    %603 = arith.subf %599, %602 : vector<5x5xf32>
    %604 = math.exp %603 : vector<5x5xf32>
    %cst_223 = arith.constant dense<0.000000e+00> : vector<5xf32>
    %605 = vector.multi_reduction <add>, %604, %cst_223 [1] : vector<5x5xf32> to vector<5xf32>
    %606 = vector.shape_cast %605 : vector<5xf32> to vector<5x1xf32>
    %607 = tpu.reciprocal %606 {approx = true} : vector<5x1xf32> -> vector<5x1xf32>
    %608 = vector.broadcast %607 : vector<5x1xf32> to vector<5x5xf32>
    %609 = arith.mulf %604, %608 : vector<5x5xf32>
    %610 = vector.extract_strided_slice %551 {offsets = [0, 24], sizes = [5, 8], strides = [1, 1]} : vector<5x32xf32> to vector<5x8xf32>
    %cst_224 = arith.constant dense<0.000000e+00> : vector<5x8xf32>
    %611 = tpu.matmul %609, %610, %cst_224 {dimension_numbers = #tpu.dot_dimension_numbers<[1], [0], [0], [1], [0, 0, 1, 1], [], []>} : vector<5x5xf32>, vector<5x8xf32>, vector<5x8xf32> -> vector<5x8xf32>
    %612 = tpu.concatenate %566, %581, %596, %611 in 1 : vector<5x8xf32>, vector<5x8xf32>, vector<5x8xf32>, vector<5x8xf32> -> vector<5x32xf32>
    %613 = tpu.concatenate %548, %612 in 0 : vector<5x32xf32>, vector<5x32xf32> -> vector<10x32xf32>
    %c2_225 = arith.constant 2 : index
    %c0_226 = arith.constant 0 : index
    %c0_227 = arith.constant 0 : index
    %614 = vector.load %arg7[%c2_225, %c0_226, %c0_227] : memref<3x32x32xf32, #tpu.memory_space<vmem>>, vector<1x32x32xf32>
    %615 = vector.shape_cast %614 : vector<1x32x32xf32> to vector<32x32xf32>
    %cst_228 = arith.constant dense<0.000000e+00> : vector<10x32xf32>
    %616 = tpu.matmul %613, %615, %cst_228 {dimension_numbers = #tpu.dot_dimension_numbers<[1], [0], [0], [1], [0, 0, 1, 1], [], []>} : vector<10x32xf32>, vector<32x32xf32>, vector<10x32xf32> -> vector<10x32xf32>
    %c2_229 = arith.constant 2 : index
    %c0_230 = arith.constant 0 : index
    %c0_231 = arith.constant 0 : index
    %617 = vector.load %arg8[%c2_229, %c0_230, %c0_231] : memref<3x1x32xf32, #tpu.memory_space<vmem>>, vector<1x1x32xf32>
    %618 = vector.shape_cast %617 : vector<1x1x32xf32> to vector<1x32xf32>
    %619 = vector.broadcast %618 : vector<1x32xf32> to vector<10x32xf32>
    %620 = arith.addf %616, %619 : vector<10x32xf32>
    %621 = arith.addf %450, %620 : vector<10x32xf32>
    %c2_232 = arith.constant 2 : index
    %c0_233 = arith.constant 0 : index
    %c0_234 = arith.constant 0 : index
    %622 = vector.load %arg9[%c2_232, %c0_233, %c0_234] : memref<3x1x32xf32, #tpu.memory_space<vmem>>, vector<1x1x32xf32>
    %623 = vector.shape_cast %622 : vector<1x1x32xf32> to vector<1x32xf32>
    %c2_235 = arith.constant 2 : index
    %c0_236 = arith.constant 0 : index
    %c0_237 = arith.constant 0 : index
    %624 = vector.load %arg10[%c2_235, %c0_236, %c0_237] : memref<3x1x32xf32, #tpu.memory_space<vmem>>, vector<1x1x32xf32>
    %625 = vector.shape_cast %624 : vector<1x1x32xf32> to vector<1x32xf32>
    %cst_238 = arith.constant dense<0.000000e+00> : vector<10xf32>
    %626 = vector.multi_reduction <add>, %621, %cst_238 [1] : vector<10x32xf32> to vector<10xf32>
    %627 = vector.shape_cast %626 : vector<10xf32> to vector<10x1xf32>
    %cst_239 = arith.constant 3.200000e+01 : f32
    %628 = vector.broadcast %cst_239 : f32 to vector<10x1xf32>
    %629 = arith.divf %627, %628 : vector<10x1xf32>
    %630 = vector.broadcast %629 : vector<10x1xf32> to vector<10x32xf32>
    %631 = arith.subf %621, %630 : vector<10x32xf32>
    %632 = arith.mulf %631, %631 : vector<10x32xf32>
    %cst_240 = arith.constant dense<0.000000e+00> : vector<10xf32>
    %633 = vector.multi_reduction <add>, %632, %cst_240 [1] : vector<10x32xf32> to vector<10xf32>
    %634 = vector.shape_cast %633 : vector<10xf32> to vector<10x1xf32>
    %cst_241 = arith.constant 3.200000e+01 : f32
    %635 = vector.broadcast %cst_241 : f32 to vector<10x1xf32>
    %636 = arith.divf %634, %635 : vector<10x1xf32>
    %cst_242 = arith.constant 9.99999997E-7 : f32
    %637 = vector.broadcast %cst_242 : f32 to vector<10x1xf32>
    %638 = arith.addf %636, %637 : vector<10x1xf32>
    %639 = math.rsqrt %638 : vector<10x1xf32>
    %640 = vector.broadcast %639 : vector<10x1xf32> to vector<10x32xf32>
    %641 = arith.mulf %631, %640 : vector<10x32xf32>
    %642 = vector.broadcast %623 : vector<1x32xf32> to vector<10x32xf32>
    %643 = arith.mulf %641, %642 : vector<10x32xf32>
    %644 = vector.broadcast %625 : vector<1x32xf32> to vector<10x32xf32>
    %645 = arith.addf %643, %644 : vector<10x32xf32>
    %c2_243 = arith.constant 2 : index
    %c0_244 = arith.constant 0 : index
    %c0_245 = arith.constant 0 : index
    %646 = vector.load %arg11[%c2_243, %c0_244, %c0_245] : memref<3x32x64xf32, #tpu.memory_space<vmem>>, vector<1x32x64xf32>
    %647 = vector.shape_cast %646 : vector<1x32x64xf32> to vector<32x64xf32>
    %cst_246 = arith.constant dense<0.000000e+00> : vector<10x64xf32>
    %648 = tpu.matmul %645, %647, %cst_246 {dimension_numbers = #tpu.dot_dimension_numbers<[1], [0], [0], [1], [0, 0, 1, 1], [], []>} : vector<10x32xf32>, vector<32x64xf32>, vector<10x64xf32> -> vector<10x64xf32>
    %c2_247 = arith.constant 2 : index
    %c0_248 = arith.constant 0 : index
    %c0_249 = arith.constant 0 : index
    %649 = vector.load %arg12[%c2_247, %c0_248, %c0_249] : memref<3x1x64xf32, #tpu.memory_space<vmem>>, vector<1x1x64xf32>
    %650 = vector.shape_cast %649 : vector<1x1x64xf32> to vector<1x64xf32>
    %651 = vector.broadcast %650 : vector<1x64xf32> to vector<10x64xf32>
    %652 = arith.addf %648, %651 : vector<10x64xf32>
    %cst_250 = arith.constant 5.000000e-01 : f32
    %653 = vector.broadcast %cst_250 : f32 to vector<10x64xf32>
    %654 = arith.mulf %653, %652 : vector<10x64xf32>
    %cst_251 = arith.constant 4.471500e-02 : f32
    %655 = vector.broadcast %cst_251 : f32 to vector<10x64xf32>
    %656 = arith.mulf %655, %652 : vector<10x64xf32>
    %657 = arith.mulf %656, %652 : vector<10x64xf32>
    %658 = arith.mulf %657, %652 : vector<10x64xf32>
    %659 = arith.addf %652, %658 : vector<10x64xf32>
    %cst_252 = arith.constant 0.797884583 : f32
    %660 = vector.broadcast %cst_252 : f32 to vector<10x64xf32>
    %661 = arith.mulf %660, %659 : vector<10x64xf32>
    %662 = math.tanh %661 : vector<10x64xf32>
    %cst_253 = arith.constant 1.000000e+00 : f32
    %663 = vector.broadcast %cst_253 : f32 to vector<10x64xf32>
    %664 = arith.addf %663, %662 : vector<10x64xf32>
    %665 = arith.mulf %654, %664 : vector<10x64xf32>
    %c2_254 = arith.constant 2 : index
    %c0_255 = arith.constant 0 : index
    %c0_256 = arith.constant 0 : index
    %666 = vector.load %arg13[%c2_254, %c0_255, %c0_256] : memref<3x64x32xf32, #tpu.memory_space<vmem>>, vector<1x64x32xf32>
    %667 = vector.shape_cast %666 : vector<1x64x32xf32> to vector<64x32xf32>
    %cst_257 = arith.constant dense<0.000000e+00> : vector<10x32xf32>
    %668 = tpu.matmul %665, %667, %cst_257 {dimension_numbers = #tpu.dot_dimension_numbers<[1], [0], [0], [1], [0, 0, 1, 1], [], []>} : vector<10x64xf32>, vector<64x32xf32>, vector<10x32xf32> -> vector<10x32xf32>
    %c2_258 = arith.constant 2 : index
    %c0_259 = arith.constant 0 : index
    %c0_260 = arith.constant 0 : index
    %669 = vector.load %arg14[%c2_258, %c0_259, %c0_260] : memref<3x1x32xf32, #tpu.memory_space<vmem>>, vector<1x1x32xf32>
    %670 = vector.shape_cast %669 : vector<1x1x32xf32> to vector<1x32xf32>
    %671 = vector.broadcast %670 : vector<1x32xf32> to vector<10x32xf32>
    %672 = arith.addf %668, %671 : vector<10x32xf32>
    %673 = arith.addf %621, %672 : vector<10x32xf32>
    %674 = vector.extract_strided_slice %673 {offsets = [0, 0], sizes = [1, 32], strides = [1, 1]} : vector<10x32xf32> to vector<1x32xf32>
    %675 = vector.extract_strided_slice %673 {offsets = [5, 0], sizes = [1, 32], strides = [1, 1]} : vector<10x32xf32> to vector<1x32xf32>
    %676 = tpu.concatenate %674, %675 in 0 : vector<1x32xf32>, vector<1x32xf32> -> vector<2x32xf32>
    %c0_261 = arith.constant 0 : index
    %c0_262 = arith.constant 0 : index
    %677 = vector.load %arg15[%c0_261, %c0_262] : memref<32x128xf32, #tpu.memory_space<vmem>>, vector<32x128xf32>
    %cst_263 = arith.constant dense<0.000000e+00> : vector<2x128xf32>
    %678 = tpu.matmul %676, %677, %cst_263 {dimension_numbers = #tpu.dot_dimension_numbers<[1], [0], [0], [1], [0, 0, 1, 1], [], []>} : vector<2x32xf32>, vector<32x128xf32>, vector<2x128xf32> -> vector<2x128xf32>
    %c0_264 = arith.constant 0 : index
    %c0_265 = arith.constant 0 : index
    %679 = vector.load %arg16[%c0_264, %c0_265] : memref<1x128xf32, #tpu.memory_space<vmem>>, vector<1x128xf32>
    %680 = vector.broadcast %679 : vector<1x128xf32> to vector<2x128xf32>
    %681 = arith.addf %678, %680 : vector<2x128xf32>
    %c0_266 = arith.constant 0 : index
    %c0_267 = arith.constant 0 : index
    %682 = vector.load %arg17[%c0_266, %c0_267] : memref<2x128xf32, #tpu.memory_space<vmem>>, vector<2x128xf32>
    tpu.vector_store %arg17[%c0_266, %c0_267], %681 {strides = array<i32>} : memref<2x128xf32, #tpu.memory_space<vmem>>, vector<2x128xf32>,
    return
  }
}

</mosaic_0001>

<bundles_post_ra>
// kernel: tile.9
= control target key start
LH: loop header
LB: loop body
LE: loop exit
PB: predicated region body
PF: predicated region fallthrough
CT: control target
= control target key end

     0   :  { %vm3_vm0 = vcmask 261120   ;;  %s34_s0 = inlined_call_operand.vmem [shape: f32[2,5,32], index: 0, kind: input, shape index: {}]   ;;  %s35_s1 = inlined_call_operand.vmem [shape: f32[10,32], index: 1, kind: output, shape index: {}]  }
   0x1   :  { %v2_v0 = vld [vmem:[%s34_s0] sm:$0x1f]   ;;  %v10_v1 = vld [vmem:[%s34_s0 + $0x8] sm:$0x1f]  }
   0x2   :  { %4 = vst.msk [vmem:[%s35_s1] sm:$0x1f] %vm3_vm0, %v2_v0   ;;  %11 = vst.msk [vmem:[%s35_s1 + $0x5] sm:$0x1f] %vm3_vm0, %v10_v1  }

// kernel: vit_forward.1
= control target key start
LH: loop header
LB: loop body
LE: loop exit
PB: predicated region body
PF: predicated region fallthrough
CT: control target
= control target key end

     0   :  { %s8101_s0 = inlined_call_operand.vmem [shape: f32[10,192], index: 0, kind: input, shape index: {}]   ;;  %s8102_s1 = inlined_call_operand.vmem [shape: f32[192,32], index: 1, kind: input, shape index: {}]   ;;  %s8103_s2 = inlined_call_operand.vmem [shape: f32[10,32], index: 2, kind: input, shape index: {}]   ;;  %s8104_s3 = inlined_call_operand.vmem [shape: f32[3,1,32], index: 3, kind: input, shape index: {}]   ;;  %s8105_s4 = inlined_call_operand.vmem [shape: f32[3,1,32], index: 4, kind: input, shape index: {}]   ;;  %s8106_s5 = inlined_call_operand.vmem [shape: f32[3,32,96], index: 5, kind: input, shape index: {}]   ;;  %s8107_s6 = inlined_call_operand.vmem [shape: f32[3,1,96], index: 6, kind: input, shape index: {}]   ;;  %s8108_s7 = inlined_call_operand.vmem [shape: f32[3,32,32], index: 7, kind: input, shape index: {}]   ;;  %s8109_s8 = inlined_call_operand.vmem [shape: f32[3,1,32], index: 8, kind: input, shape index: {}]   ;;  %s8110_s9 = inlined_call_operand.vmem [shape: f32[3,1,32], index: 9, kind: input, shape index: {}]   ;;  %s8111_s10 = inlined_call_operand.vmem [shape: f32[3,1,32], index: 10, kind: input, shape index: {}]   ;;  %s8112_s11 = inlined_call_operand.vmem [shape: f32[3,32,64], index: 11, kind: input, shape index: {}]   ;;  %s8113_s12 = inlined_call_operand.vmem [shape: f32[3,1,64], index: 12, kind: input, shape index: {}]   ;;  %s8114_s13 = inlined_call_operand.vmem [shape: f32[3,64,32], index: 13, kind: input, shape index: {}]   ;;  %s8115_s14 = inlined_call_operand.vmem [shape: f32[3,1,32], index: 14, kind: input, shape index: {}]   ;;  %s8116_s15 = inlined_call_operand.vmem [shape: f32[32,128], index: 15, kind: input, shape index: {}]   ;;  %s8117_s16 = inlined_call_operand.vmem [shape: f32[1,128], index: 16, kind: input, shape index: {}]   ;;  %s8118_s17 = inlined_call_operand.hbm [shape: f32[2,128], index: 17, kind: output, shape index: {}]  }
   0x1   :  { %8150 = sst [smem:[#allocation5_spill]] %s8101_s0 }
   0x2   :  { %8151 = sst [smem:[#allocation6_spill]] %s8102_s1 }
   0x3   :  { %8152 = sst [smem:[#allocation7_spill]] %s8117_s16 }
   0x4   :  { %8153 = sst [smem:[#allocation8_spill]] %s8118_s17 }
   0x5   :  { %s8154_s26 = sld [smem:[#allocation6_spill]]  ;;  %v6969_v3 = vmov 0.0|0.0   ;;  %vm87_vm0 = vcmask 523264   ;;  %s8155_s29 = sld [smem:[#allocation5_spill]] }
   0x6   :  { %6633 = vmatprep.subr.bf16.mxu0 %v6969_v3 }
   0xb   :  { %v61_v0 = vld [vmem:[%s8154_s26] sm:$0xff]  ;;  %v62_v1 = vld [vmem:[%s8154_s26 + $0x8] sm:$0xff]  ;;  %v63_v2 = vld [vmem:[%s8154_s26 + $0x10] sm:$0xff] }
   0xc   :  { %v6634_v4 = vpack.c.bf16 %v62_v1, %v61_v0  ;;  %v64_v5 = vld [vmem:[%s8154_s26 + $0x18] sm:$0xff]  ;;  %v65_v7 = vld [vmem:[%s8154_s26 + $0x20] sm:$0xff]  ;;  %v66_v8 = vld [vmem:[%s8154_s26 + $0x28] sm:$0xff] }
   0xd   :  { %v6637_v6 = vpack.c.bf16 %v64_v5, %v63_v2  ;;  %v6640_v9 = vpack.c.bf16 %v66_v8, %v65_v7  ;;  %v67_v10 = vld [vmem:[%s8154_s26 + $0x30] sm:$0xff]  ;;  %v68_v11 = vld [vmem:[%s8154_s26 + $0x38] sm:$0xff]  ;;  %v58_v12 = vld [vmem:[%s8155_s29 + $0x8] sm:$0xff] }
   0xe   :  { %6635 = vmatpush1.bf16.msra.mxu0 %v6634_v4  ;;  %5837 = vmatprep.mubr.msk.f32.mxu0 %vm87_vm0, %v58_v12 }
   0xf   :  { %6636 = vmatprep.subr.bf16.mxu0 %v6969_v3 }
  0x12   :  { %6638 = vmatpush1.bf16.msra.mxu0 %v6637_v6 }
  0x13   :  { %6639 = vmatprep.subr.bf16.mxu0 %v6969_v3 }
  0x14   :  { %22 = vsyncpa [#allocation3], 0  ;;  %v6643_v13 = vpack.c.bf16 %v68_v11, %v67_v10  ;;  %v69_v14 = vld [vmem:[%s8154_s26 + $0x40] sm:$0xff]  ;;  %v70_v15 = vld [vmem:[%s8154_s26 + $0x48] sm:$0xff]  ;;  %vm171_vm1 = vcmask 261120   ;;  %vm175_vm2 = vcmask 254976  }
  0x15   :  { %v6646_v16 = vpack.c.bf16 %v70_v15, %v69_v14  ;;  %v71_v17 = vld [vmem:[%s8154_s26 + $0x50] sm:$0xff]  ;;  %v72_v18 = vld [vmem:[%s8154_s26 + $0x58] sm:$0xff]  ;;  %v73_v20 = vld [vmem:[%s8154_s26 + $0x60] sm:$0xff]  ;;  %vm6971_vm3 = vmmov 0   ;;  %s8145_s0 = smov 96   ;;  %s8147_s30 = smov 88  }
  0x16   :  { %6641 = vmatpush1.bf16.msra.mxu0 %v6640_v9  ;;  %v6649_v19 = vpack.c.bf16 %v72_v18, %v71_v17  ;;  %v74_v21 = vld [vmem:[%s8154_s26 + $0x68] sm:$0xff]  ;;  %v75_v23 = vld [vmem:[%s8154_s26 + $0x70] sm:$0xff]  ;;  %v76_v24 = vld [vmem:[%s8154_s26 + $0x78] sm:$0xff]  ;;  %vm311_vm4 = vcmask 64512   ;;  %vm386_vm5 = vcmask 36864   ;;  %vm404_vm6 = vcmask 1044480  }
  0x17   :  { %6642 = vmatprep.subr.bf16.mxu0 %v6969_v3  ;;  %v6652_v22 = vpack.c.bf16 %v74_v21, %v73_v20  ;;  %v6655_v25 = vpack.c.bf16 %v76_v24, %v75_v23  ;;  %v77_v26 = vld [vmem:[%s8154_s26 + $0x80] sm:$0xff]  ;;  %v78_v27 = vld [vmem:[%s8154_s26 + $0x88] sm:$0xff]  ;;  %v79_v29 = vld [vmem:[%s8154_s26 + $0x90] sm:$0xff]  ;;  %v6970_v20 = vmov 0.0   ;;  %vm400_vm7 = vcmask 39936   ;;  %s8121_s18 = smov 56  }
  0x18   :  { %v6658_v28 = vpack.c.bf16 %v78_v27, %v77_v26  ;;  %v80_v30 = vld [vmem:[%s8154_s26 + $0x98] sm:$0xff]  ;;  %v81_v32 = vld [vmem:[%s8154_s26 + $0xa0] sm:$0xff]  ;;  %v82_v33 = vld [vmem:[%s8154_s26 + $0xa8] sm:$0xff]  ;;  %s8141_s19 = smov 112   ;;  %s8139_s1 = smov 80   ;;  %vm993_vm8 = vcmask 1042432  }
  0x19   :  { %v6661_v31 = vpack.c.bf16 %v80_v30, %v79_v29  ;;  %v6664_v34 = vpack.c.bf16 %v82_v33, %v81_v32  ;;  %v83_v35 = vld [vmem:[%s8154_s26 + $0xb0] sm:$0xff]  ;;  %v84_v36 = vld [vmem:[%s8154_s26 + $0xb8] sm:$0xff]  ;;  %v57_v38 = vld [vmem:[%s8155_s29] sm:$0xff]  ;;  %s8129_s20 = smov 72   ;;  %s8137_s21 = smov 104   ;;  %vm990_vm9 = vcmask 195584  }
  0x1a   :  { %6644 = vmatpush1.bf16.msra.mxu0 %v6643_v13  ;;  %v6667_v37 = vpack.c.bf16 %v84_v36, %v83_v35  ;;  %v60_v39 = vld [vmem:[%s8155_s29 + $0x18] sm:$0x3]  ;;  %v59_v40 = vld [vmem:[%s8155_s29 + $0x10] sm:$0x3]  ;;  %v85_v41 = vld [vmem:[%s8103_s2] sm:$0xff]  ;;  %s8143_s29 = smov 120  }
  0x1b   :  { %6645 = vmatprep.subr.bf16.mxu0 %v6969_v3  ;;  %v86_v45 = vld [vmem:[%s8103_s2 + $0x8] sm:$0x3]  ;;  %v216_v61 = vld [vmem:[%s8106_s5] sm:$0xff]  ;;  %v218_v63 = vld [vmem:[%s8106_s5 + $0x10] sm:$0xff]  ;;  %s8127_s2 = smov 64   ;;  %s8125_s22 = smov 48  }
  0x1c   :  { %v217_v62 = vld [vmem:[%s8106_s5 + $0x8] sm:$0xff]  ;;  %v219_v1 = vld [vmem:[%s8106_s5 + $0x18] sm:$0xff]  ;;  %v5839_v11 = vld [vmem:[%s8104_s3] ss:$0 sm:$0xff]  ;;  %s8123_s23 = smov 40   ;;  %s8135_s24 = smov 8  }
  0x1d   :  { %v6669_v0 = vpack.c.bf16 %v217_v62, %v216_v61  ;;  %v6673_v2 = vpack.c.bf16 %v219_v1, %v218_v63  ;;  %v5840_v13 = vld [vmem:[%s8105_s4] ss:$0 sm:$0xff]  ;;  %s8133_s25 = smov 16   ;;  %vm988_vm10 = vcmask 130048   ;;  %s8161_s27 = smov 8   ;;  %vm5736_vm11 = vcmask 1040384  }
  0x1e   :  { %6647 = vmatpush1.bf16.msra.mxu0 %v6646_v16  ;;  %v5841_v21 = vld [vmem:[%s8107_s6] ss:$0 sm:$0xff]  ;;  %s8162_s26 = smov 16   ;;  %s8169_s28 = smov 104  }
  0x1f   :  { %6648 = vmatprep.subr.bf16.mxu0 %v6969_v3  ;;  %6670 = vmatprep.subr.bf16.mxu1 %v6669_v0 }
  0x20   :  { %6672 = vmatpush3.bf16.msra.mxu1 %v6669_v0 }
  0x21   :  { %6674 = vmatprep.subr.bf16.mxu1 %v6673_v2 }
  0x22   :  { %6650 = vmatpush1.bf16.msra.mxu0 %v6649_v19 }
  0x23   :  { %6651 = vmatprep.subr.bf16.mxu0 %v6969_v3 }
  0x24   :  { %6676 = vmatpush3.bf16.msra.mxu1 %v6673_v2 }
  0x25   :  { %6237 = vmatprep.subr.mxu1 %v6970_v20 }
  0x26   :  { %6653 = vmatpush1.bf16.msra.mxu0 %v6652_v22 }
  0x27   :  { %6654 = vmatprep.subr.bf16.mxu0 %v6969_v3 }
  0x2a   :  { %6656 = vmatpush1.bf16.msra.mxu0 %v6655_v25 }
  0x2b   :  { %6657 = vmatprep.subr.bf16.mxu0 %v6969_v3 }
  0x2e   :  { %6659 = vmatpush1.bf16.msra.mxu0 %v6658_v28 }
  0x2f   :  { %6660 = vmatprep.subr.bf16.mxu0 %v6969_v3 }
  0x32   :  { %6662 = vmatpush1.bf16.msra.mxu0 %v6661_v31 }
  0x33   :  { %6663 = vmatprep.subr.bf16.mxu0 %v6969_v3 }
  0x36   :  { %6665 = vmatpush1.bf16.msra.mxu0 %v6664_v34 }
  0x37   :  { %6666 = vmatprep.subr.bf16.mxu0 %v6969_v3 }
  0x3a   :  { %6668 = vmatpush1.bf16.msra.mxu0 %v6667_v37 }
  0x3b   :  { %6292 = vmatprep.subr.mxu0 %v6970_v20 }
  0x3d   :  { %159 = vmatmul.mubr.f32.vlgmr.msra.gmra.mrb[0].mxu0 %v57_v38 }
  0x3e   :  { %5838 = vmatprep.mubr.msk.f32.mxu0 %vm87_vm0, %v60_v39 }
  0x41   :  { %164 = vmatmul.mubr.f32.gmra.mrb[2].mxu0 %v59_v40 }
  0x42   :  { %6294 = vmatprep.mubr.msk.f32.mxu0 %vm6971_vm3, %v6970_v20 }
 0x110   :  { %v160_v42 = vpop.f32.mrb[0].mxu0 }
 0x111   :  { %v7178_v43 = vadd.f32 %v160_v42, %v85_v41  ;;  %v162_v44 = vpop.f32.mrb[1].mxu0 }
 0x113   :  { %v172_v46 = vsel %vm171_vm1, %v7178_v43, 0.0 }
 0x114   :  { %v165_v47 = vpop.f32.mrb[2].mxu0  ;;  %173 = vadd.xlane.f32.xlu0 %v172_v46 }
 0x115   :  { %v7185_v48 = vadd.f32 %v165_v47, %v86_v45  ;;  %v167_v49 = vpop.f32.mrb[3].mxu0 }
 0x117   :  { %v176_v50 = vsel %vm175_vm2, %v7185_v48, 0.0 }
 0x118   :  { %177 = vadd.xlane.f32.xlu0 %v176_v50 }
 0x1a1   :  { %v174_v51 = vpop.xlane.xlu0 %173 }
 0x1a2   :  { %v180_v52 = vmul.f32 0.03125, %v174_v51 }
 0x1a4   :  { %v182_v53 = vsub.f32 %v7178_v43, %v180_v52 }
 0x1a5   :  { %v178_v54 = vpop.xlane.xlu0 %177 }
 0x1a6   :  { %v181_v55 = vmul.f32 0.03125, %v178_v54  ;;  %v184_v56 = vmul.f32 %v182_v53, %v182_v53 }
 0x1a8   :  { %v183_v57 = vsub.f32 %v7185_v48, %v181_v55  ;;  %v186_v58 = vsel %vm171_vm1, %v184_v56, 0.0 }
 0x1a9   :  { %187 = vadd.xlane.f32.xlu1 %v186_v58 }
 0x1aa   :  { %v185_v59 = vmul.f32 %v183_v57, %v183_v57 }
 0x1ac   :  { %v189_v60 = vsel %vm175_vm2, %v185_v59, 0.0 }
 0x1ad   :  { %190 = vadd.xlane.f32.xlu1 %v189_v60 }
 0x236   :  { %v188_v4 = vpop.xlane.xlu1 %187 }
 0x237   :  { %v192_v5 = vmul.f32 0.03125, %v188_v4 }
 0x239   :  { %v194_v6 = vadd.f32 1e-06, %v192_v5 }
 0x23a   :  { %v191_v7 = vpop.xlane.xlu1 %190 }
 0x23b   :  { %6813 = vrsqrt.f32 %v194_v6  ;;  %v193_v8 = vmul.f32 0.03125, %v191_v7 }
 0x23d   :  { %v195_v9 = vadd.f32 1e-06, %v193_v8 }
 0x23f   :  { %6815 = vrsqrt.f32 %v195_v9 }
 0x245   :  { %v6814_v10 = vpop.eup %6813 }
 0x246   :  { %v198_v12 = vmul.f32 %v6814_v10, %v182_v53 }
 0x248   :  { %v206_v14 = vmul.f32 %v5839_v11, %v198_v12 }
 0x249   :  { %v6816_v15 = vpop.eup %6815 }
 0x24a   :  { %v199_v16 = vmul.f32 %v6816_v15, %v183_v57  ;;  %v214_v17 = vadd.f32 %v5840_v13, %v206_v14 }
 0x24c   :  { %v207_v18 = vmul.f32 %v5839_v11, %v199_v16  ;;  %6234 = vmatprep.mubr.msk.f32.mxu1 %vm171_vm1, %v214_v17 }
 0x24e   :  { %v215_v19 = vadd.f32 %v5840_v13, %v207_v18 }
 0x250   :  { %6235 = vmatmul.mubr.msk.f32.vlgmr.msra.gmra.mrb[0].mxu1 %vm171_vm1, %v215_v19 }
 0x251   :  { %6239 = vmatprep.mubr.msk.f32.mxu1 %vm6971_vm3, %v6970_v20 }
 0x323   :  { %v6236_v22 = vpop.f32.mrb[0].mxu1 }
 0x324   :  { %v7222_v23 = vadd.f32 %v6236_v22, %v5841_v21  ;;  %v299_v24 = vpop.f32.mrb[1].mxu1 }
 0x325   :  { %v7224_v25 = vadd.f32 %v5841_v21, %v299_v24 }
 0x327   :  { %309 = vrot.lane.b32.xlu0 %v7224_v25, %s8145_s0 }
 0x32b   :  { %479 = vrot.lane.b32.xlu0 %v7224_v25, %s8147_s30 }
 0x399   :  { %v310_v26 = vpop.permute.xlu0 %309 }
 0x39a   :  { %6238 = vmatpush3.xpose.msk.msra.mxu1 %vm311_vm4, %v310_v26  ;;  %v995_v26 = vrot.slane %v7222_v23, 5 }
 0x39b   :  { %6242 = vmatprep.subr.mxu1 %v6970_v20 }
 0x39d   :  { %6240 = vmatmul.mubr.msk.f32.vlgmr.msra.gmra.mrb[2].mxu1 %vm311_vm4, %v7224_v25  ;;  %v480_v39 = vpop.permute.xlu0 %479 }
 0x39e   :  { %6244 = vmatprep.mubr.msk.f32.mxu1 %vm6971_vm3, %v6970_v20 }
 0x470   :  { %v382_v27 = vpop.f32.mrb[2].mxu1 }
 0x471   :  { %v6241_v28 = vpop.f32.mrb[3].mxu1  ;;  %v387_v29 = vsel %vm386_vm5, %v382_v27, -inf }
 0x472   :  { %388 = vmax.xlane.f32.xlu1 %v387_v29 }
 0x483   :  { %398 = vrot.lane.b32.xlu1 %v7224_v25, %s8127_s2 }
 0x4ff   :  { %v389_v30 = vpop.xlane.xlu1 %388 }
 0x500   :  { %v390_v31 = vsub.f32 %v382_v27, %v389_v30  ;;  %v994_v27 = vrot.slane %v7224_v25, 5 }
 0x502   :  { %v391_v32 = vmul.f32 1.442695, %v390_v31  ;;  %v7303_v28 = vsel %vm993_vm8, %v994_v27, %v995_v26 }
 0x503   :  { %v399_v33 = vpop.permute.xlu1 %398 }
 0x504   :  { %6817 = vpow2.f32 %v391_v32  ;;  %6243 = vmatpush3.msk.msra.mxu1 %vm404_vm6, %v399_v33 }
 0x505   :  { %6247 = vmatprep.subr.mxu1 %v6970_v20 }
 0x50e   :  { %v6818_v34 = vpop.eup %6817 }
 0x50f   :  { %v393_v35 = vsel %vm386_vm5, %v6818_v34, 0.0 }
 0x510   :  { %394 = vadd.xlane.f32.xlu1 %v393_v35 }
 0x521   :  { %477 = vrot.lane.b32.xlu1 %v7224_v25, %s8143_s29 }
 0x59d   :  { %v395_v36 = vpop.xlane.xlu1 %394 }
 0x59e   :  { %6819 = vrcp.f32 %v395_v36 }
 0x5a1   :  { %v478_v40 = vpop.permute.xlu1 %477 }
 0x5a8   :  { %v6820_v37 = vpop.eup %6819 }
 0x5a9   :  { %v397_v38 = vmul.f32 %v6820_v37, %v6818_v34 }
 0x5ab   :  { %6245 = vmatmul.mubr.msk.f32.vlgmr.msra.gmra.mrb[4].mxu1 %vm400_vm7, %v397_v38 }
 0x5ac   :  { %6248 = vmatpush3.xpose.msk.msra.mxu1 %vm311_vm4, %v480_v39  ;;  %6249 = vmatprep.mubr.msk.f32.mxu1 %vm6971_vm3, %v6970_v20 }
 0x5ad   :  { %6252 = vmatprep.subr.mxu1 %v6970_v20 }
 0x5af   :  { %6250 = vmatmul.mubr.msk.f32.vlgmr.msra.gmra.mrb[6].mxu1 %vm311_vm4, %v478_v40 }
 0x5b0   :  { %6254 = vmatprep.mubr.msk.f32.mxu1 %vm6971_vm3, %v6970_v20 }
 0x67e   :  { %v7252_v41 = vpop.f32.mrb[4].mxu1 }
 0x67f   :  { %v6246_v42 = vpop.f32.mrb[5].mxu1 }
 0x682   :  { %v551_v44 = vpop.f32.mrb[6].mxu1 }
 0x683   :  { %v6251_v45 = vpop.f32.mrb[7].mxu1  ;;  %v555_v46 = vsel %vm386_vm5, %v551_v44, -inf }
 0x684   :  { %556 = vmax.xlane.f32.xlu0 %v555_v46 }
 0x69a   :  { %566 = vrot.lane.b32.xlu0 %v7224_v25, %s8121_s18 }
 0x69e   :  { %643 = vrot.lane.b32.xlu0 %v7224_v25, %s8141_s19 }
 0x711   :  { %v557_v47 = vpop.xlane.xlu0 %556 }
 0x712   :  { %v558_v49 = vsub.f32 %v551_v44, %v557_v47 }
 0x714   :  { %v559_v50 = vmul.f32 1.442695, %v558_v49 }
 0x715   :  { %v567_v51 = vpop.permute.xlu0 %566 }
 0x716   :  { %6821 = vpow2.f32 %v559_v50  ;;  %6253 = vmatpush3.msk.msra.mxu1 %vm404_vm6, %v567_v51 }
 0x717   :  { %6257 = vmatprep.subr.mxu1 %v6970_v20 }
 0x719   :  { %v644_v58 = vpop.permute.xlu0 %643 }
 0x720   :  { %v6822_v52 = vpop.eup %6821 }
 0x721   :  { %v561_v53 = vsel %vm386_vm5, %v6822_v52, 0.0 }
 0x722   :  { %562 = vadd.xlane.f32.xlu1 %v561_v53 }
 0x733   :  { %645 = vrot.lane.b32.xlu1 %v7224_v25, %s8139_s1 }
 0x7af   :  { %v563_v54 = vpop.xlane.xlu1 %562 }
 0x7b0   :  { %6823 = vrcp.f32 %v563_v54 }
 0x7b3   :  { %v646_v57 = vpop.permute.xlu1 %645 }
 0x7ba   :  { %v6824_v55 = vpop.eup %6823 }
 0x7bb   :  { %v565_v56 = vmul.f32 %v6824_v55, %v6822_v52 }
 0x7bd   :  { %6255 = vmatmul.mubr.msk.f32.vlgmr.msra.gmra.mrb[8].mxu1 %vm400_vm7, %v565_v56 }
 0x7be   :  { %6258 = vmatpush3.xpose.msk.msra.mxu1 %vm311_vm4, %v646_v57  ;;  %6259 = vmatprep.mubr.msk.f32.mxu1 %vm6971_vm3, %v6970_v20 }
 0x7bf   :  { %6262 = vmatprep.subr.mxu1 %v6970_v20 }
 0x7c1   :  { %6260 = vmatmul.mubr.msk.f32.vlgmr.msra.gmra.mrb[10].mxu1 %vm311_vm4, %v644_v58 }
 0x7c2   :  { %6264 = vmatprep.mubr.msk.f32.mxu1 %vm6971_vm3, %v6970_v20 }
 0x890   :  { %v7272_v59 = vpop.f32.mrb[8].mxu1 }
 0x891   :  { %v6256_v60 = vpop.f32.mrb[9].mxu1 }
 0x894   :  { %v717_v61 = vpop.f32.mrb[10].mxu1 }
 0x895   :  { %v6261_v62 = vpop.f32.mrb[11].mxu1  ;;  %v721_v63 = vsel %vm386_vm5, %v717_v61, -inf }
 0x896   :  { %722 = vmax.xlane.f32.xlu1 %v721_v63 }
 0x8a7   :  { %811 = vrot.lane.b32.xlu1 %v7224_v25, %s8129_s20 }
 0x8ab   :  { %809 = vrot.lane.b32.xlu1 %v7224_v25, %s8137_s21 }
 0x923   :  { %v723_v0 = vpop.xlane.xlu1 %722 }
 0x924   :  { %v724_v1 = vsub.f32 %v717_v61, %v723_v0 }
 0x926   :  { %v725_v2 = vmul.f32 1.442695, %v724_v1 }
 0x927   :  { %v812_v9 = vpop.permute.xlu1 %811 }
 0x928   :  { %6825 = vpow2.f32 %v725_v2 }
 0x92b   :  { %v810_v11 = vpop.permute.xlu1 %809 }
 0x932   :  { %v6826_v4 = vpop.eup %6825 }
 0x933   :  { %v727_v5 = vsel %vm386_vm5, %v6826_v4, 0.0 }
 0x934   :  { %728 = vadd.xlane.f32.xlu0 %v727_v5 }
 0x94a   :  { %732 = vrot.lane.b32.xlu0 %v7224_v25, %s8125_s22 }
 0x9c1   :  { %v729_v6 = vpop.xlane.xlu0 %728 }
 0x9c2   :  { %6827 = vrcp.f32 %v729_v6 }
 0x9c5   :  { %v733_v7 = vpop.permute.xlu0 %732 }
 0x9c6   :  { %6263 = vmatpush3.msk.msra.mxu1 %vm404_vm6, %v733_v7 }
 0x9c7   :  { %6267 = vmatprep.subr.mxu1 %v6970_v20 }
 0x9cc   :  { %v6828_v8 = vpop.eup %6827 }
 0x9cd   :  { %v731_v10 = vmul.f32 %v6828_v8, %v6826_v4 }
 0x9cf   :  { %6265 = vmatmul.mubr.msk.f32.vlgmr.msra.gmra.mrb[12].mxu1 %vm400_vm7, %v731_v10 }
 0x9d0   :  { %6268 = vmatpush3.xpose.msk.msra.mxu1 %vm311_vm4, %v812_v9  ;;  %6269 = vmatprep.mubr.msk.f32.mxu1 %vm6971_vm3, %v6970_v20 }
 0x9d1   :  { %6272 = vmatprep.subr.mxu1 %v6970_v20 }
 0x9d3   :  { %6270 = vmatmul.mubr.msk.f32.vlgmr.msra.gmra.mrb[14].mxu1 %vm311_vm4, %v810_v11 }
 0x9d4   :  { %6274 = vmatprep.mubr.msk.f32.mxu1 %vm6971_vm3, %v6970_v20 }
 0xaa2   :  { %v7292_v12 = vpop.f32.mrb[12].mxu1 }
 0xaa3   :  { %v6266_v13 = vpop.f32.mrb[13].mxu1 }
 0xaa6   :  { %v883_v14 = vpop.f32.mrb[14].mxu1 }
 0xaa7   :  { %v6271_v15 = vpop.f32.mrb[15].mxu1  ;;  %v887_v16 = vsel %vm386_vm5, %v883_v14, -inf }
 0xaa8   :  { %888 = vmax.xlane.f32.xlu0 %v887_v16 }
 0xabe   :  { %898 = vrot.lane.b32.xlu0 %v7224_v25, %s8123_s23 }
 0xb35   :  { %v889_v17 = vpop.xlane.xlu0 %888 }
 0xb36   :  { %v890_v18 = vsub.f32 %v883_v14, %v889_v17 }
 0xb38   :  { %v891_v19 = vmul.f32 1.442695, %v890_v18 }
 0xb39   :  { %v899_v21 = vpop.permute.xlu0 %898 }
 0xb3a   :  { %6829 = vpow2.f32 %v891_v19  ;;  %6273 = vmatpush3.msk.msra.mxu1 %vm404_vm6, %v899_v21 }
 0xb3b   :  { %6277 = vmatprep.subr.mxu1 %v6970_v20 }
 0xb44   :  { %v6830_v22 = vpop.eup %6829 }
 0xb45   :  { %v893_v24 = vsel %vm386_vm5, %v6830_v22, 0.0 }
 0xb46   :  { %894 = vadd.xlane.f32.xlu1 %v893_v24 }
 0xb57   :  { %997 = vrot.lane.b32.xlu1 %v7303_v28, %s8145_s0 }
 0xb5b   :  { %1163 = vrot.lane.b32.xlu1 %v7303_v28, %s8147_s30 }
 0xb5f   :  { %1329 = vrot.lane.b32.xlu1 %v7303_v28, %s8139_s1 }
 0xbd3   :  { %v895_v29 = vpop.xlane.xlu1 %894 }
 0xbd4   :  { %6831 = vrcp.f32 %v895_v29 }
 0xbd7   :  { %v998_v23 = vpop.permute.xlu1 %997 }
 0xbdb   :  { %v1164_v44 = vpop.permute.xlu1 %1163 }
 0xbde   :  { %v6832_v30 = vpop.eup %6831 }
 0xbdf   :  { %v897_v31 = vmul.f32 %v6832_v30, %v6830_v22  ;;  %v1330_v45 = vpop.permute.xlu1 %1329 }
 0xbe1   :  { %6275 = vmatmul.mubr.msk.f32.vlgmr.msra.gmra.mrb[16].mxu1 %vm400_vm7, %v897_v31 }
 0xbe2   :  { %6278 = vmatpush3.xpose.msk.msra.mxu1 %vm311_vm4, %v998_v23  ;;  %6279 = vmatprep.mubr.msk.f32.mxu1 %vm6971_vm3, %v6970_v20  ;;  %v1678_v23 = vld [vmem:[%s8108_s7] sm:$0xff] }
 0xbe3   :  { %6282 = vmatprep.subr.mxu1 %v6970_v20 }
 0xbe5   :  { %6280 = vmatmul.mubr.msk.f32.vlgmr.msra.gmra.mrb[18].mxu1 %vm311_vm4, %v7303_v28 }
 0xbe6   :  { %6284 = vmatprep.mubr.msk.f32.mxu1 %vm6971_vm3, %v6970_v20 }
 0xcb4   :  { %v7320_v25 = vpop.f32.mrb[16].mxu1 }
 0xcb5   :  { %v6276_v32 = vpop.f32.mrb[17].mxu1 }
 0xcb6   :  { %v1679_v32 = vld [vmem:[%s8108_s7 + $0x8] sm:$0xff] }
 0xcb8   :  { %v1069_v33 = vpop.f32.mrb[18].mxu1 }
 0xcb9   :  { %v6281_v34 = vpop.f32.mrb[19].mxu1  ;;  %v1073_v35 = vsel %vm386_vm5, %v1069_v33, -inf }
 0xcba   :  { %1074 = vmax.xlane.f32.xlu0 %v1073_v35  ;;  %v1680_v34 = vld [vmem:[%s8108_s7 + $0x10] sm:$0xff]  ;;  %v1681_v35 = vld [vmem:[%s8108_s7 + $0x18] sm:$0xff] }
 0xcd0   :  { %1084 = vrot.lane.b32.xlu0 %v7303_v28, %s8127_s2 }
 0xcd4   :  { %1161 = vrot.lane.b32.xlu0 %v7303_v28, %s8143_s29 }
 0xcd8   :  { %1327 = vrot.lane.b32.xlu0 %v7303_v28, %s8141_s19 }
 0xcdc   :  { %1493 = vrot.lane.b32.xlu0 %v7303_v28, %s8137_s21 }
 0xd47   :  { %v1075_v36 = vpop.xlane.xlu0 %1074 }
 0xd48   :  { %v1076_v37 = vsub.f32 %v1069_v33, %v1075_v36  ;;  %v6677_v33 = vpack.c.bf16 %v1679_v32, %v1678_v23  ;;  %v6681_v36 = vpack.c.bf16 %v1681_v35, %v1680_v34 }
 0xd4a   :  { %v1077_v38 = vmul.f32 1.442695, %v1076_v37 }
 0xd4b   :  { %v1085_v39 = vpop.permute.xlu0 %1084 }
 0xd4c   :  { %6833 = vpow2.f32 %v1077_v38  ;;  %6283 = vmatpush3.msk.msra.mxu1 %vm404_vm6, %v1085_v39 }
 0xd4d   :  { %6287 = vmatprep.subr.mxu1 %v6970_v20 }
 0xd4f   :  { %v1162_v50 = vpop.permute.xlu0 %1161 }
 0xd53   :  { %v1328_v51 = vpop.permute.xlu0 %1327 }
 0xd56   :  { %v6834_v40 = vpop.eup %6833 }
 0xd57   :  { %v1079_v42 = vsel %vm386_vm5, %v6834_v40, 0.0  ;;  %v1494_v53 = vpop.permute.xlu0 %1493 }
 0xd58   :  { %1080 = vadd.xlane.f32.xlu1 %v1079_v42 }
 0xd69   :  { %1495 = vrot.lane.b32.xlu1 %v7303_v28, %s8129_s20 }
 0xde5   :  { %v1081_v46 = vpop.xlane.xlu1 %1080 }
 0xde6   :  { %6835 = vrcp.f32 %v1081_v46 }
 0xde9   :  { %v1496_v52 = vpop.permute.xlu1 %1495 }
 0xdf0   :  { %v6836_v47 = vpop.eup %6835 }
 0xdf1   :  { %v1083_v49 = vmul.f32 %v6836_v47, %v6834_v40 }
 0xdf3   :  { %6285 = vmatmul.mubr.msk.f32.vlgmr.msra.gmra.mrb[20].mxu1 %vm400_vm7, %v1083_v49 }
 0xdf4   :  { %6288 = vmatpush3.xpose.msk.msra.mxu1 %vm311_vm4, %v1164_v44  ;;  %6289 = vmatprep.mubr.msk.f32.mxu1 %vm6971_vm3, %v6970_v20 }
 0xdf5   :  { %6297 = vmatprep.subr.mxu1 %v6970_v20 }
 0xdf7   :  { %6290 = vmatmul.mubr.msk.f32.vlgmr.msra.gmra.mrb[22].mxu1 %vm311_vm4, %v1162_v50 }
 0xdf8   :  { %6298 = vmatpush3.xpose.msk.msra.mxu1 %vm311_vm4, %v1330_v45  ;;  %6299 = vmatprep.mubr.msk.f32.mxu1 %vm6971_vm3, %v6970_v20 }
 0xdf9   :  { %6307 = vmatprep.subr.mxu1 %v6970_v20 }
 0xdfb   :  { %6300 = vmatmul.mubr.msk.f32.vlgmr.msra.gmra.mrb[24].mxu1 %vm311_vm4, %v1328_v51 }
 0xdfc   :  { %6308 = vmatpush3.xpose.msk.msra.mxu1 %vm311_vm4, %v1496_v52  ;;  %6309 = vmatprep.mubr.msk.f32.mxu1 %vm6971_vm3, %v6970_v20 }
 0xdfd   :  { %6678 = vmatprep.subr.bf16.mxu1 %v6677_v33 }
 0xdff   :  { %6310 = vmatmul.mubr.msk.f32.vlgmr.msra.gmra.mrb[26].mxu1 %vm311_vm4, %v1494_v53 }
 0xe00   :  { %6680 = vmatpush3.bf16.msra.mxu1 %v6677_v33 }
 0xe01   :  { %6682 = vmatprep.subr.bf16.mxu1 %v6681_v36 }
 0xe04   :  { %6684 = vmatpush3.bf16.msra.mxu1 %v6681_v36  ;;  %v1925_v36 = vld [vmem:[%s8114_s13] sm:$0xff] }
 0xec6   :  { %v7351_v54 = vpop.f32.mrb[20].mxu1 }
 0xec7   :  { %v6286_v55 = vpop.f32.mrb[21].mxu1 }
 0xeca   :  { %v1235_v56 = vpop.f32.mrb[22].mxu1 }
 0xecb   :  { %v6291_v57 = vpop.f32.mrb[23].mxu1  ;;  %v1239_v58 = vsel %vm386_vm5, %v1235_v56, -inf }
 0xecc   :  { %1240 = vmax.xlane.f32.xlu1 %v1239_v58 }
 0xece   :  { %v1401_v60 = vpop.f32.mrb[24].mxu1 }
 0xecf   :  { %v6301_v61 = vpop.f32.mrb[25].mxu1  ;;  %v1405_v62 = vsel %vm386_vm5, %v1401_v60, -inf }
 0xed0   :  { %1406 = vmax.xlane.f32.xlu0 %v1405_v62 }
 0xed2   :  { %v1567_v63 = vpop.f32.mrb[26].mxu1 }
 0xed3   :  { %v6311_v0 = vpop.f32.mrb[27].mxu1  ;;  %v1571_v1 = vsel %vm386_vm5, %v1567_v63, -inf }
 0xed4   :  { %1572 = vmax.xlane.f32.xlu0 %v1571_v1 }
 0xedd   :  { %1250 = vrot.lane.b32.xlu1 %v7303_v28, %s8121_s18  ;;  %s8131_s18 = smov 24  }
 0xf59   :  { %v1241_v2 = vpop.xlane.xlu1 %1240 }
 0xf5a   :  { %v1242_v4 = vsub.f32 %v1235_v56, %v1241_v2 }
 0xf5c   :  { %v1243_v5 = vmul.f32 1.442695, %v1242_v4 }
 0xf5d   :  { %v1407_v6 = vpop.xlane.xlu0 %1406  ;;  %v1251_v7 = vpop.permute.xlu1 %1250 }
 0xf5e   :  { %6837 = vpow2.f32 %v1243_v5  ;;  %v1408_v8 = vsub.f32 %v1401_v60, %v1407_v6  ;;  %6293 = vmatpush3.msk.msra.mxu0 %vm404_vm6, %v1251_v7 }
 0xf5f   :  { %6302 = vmatprep.subr.mxu0 %v6970_v20 }
 0xf60   :  { %v1409_v9 = vmul.f32 1.442695, %v1408_v8 }
 0xf61   :  { %v1573_v10 = vpop.xlane.xlu0 %1572 }
 0xf62   :  { %6839 = vpow2.f32 %v1409_v9  ;;  %v1574_v11 = vsub.f32 %v1567_v63, %v1573_v10 }
 0xf64   :  { %v1575_v13 = vmul.f32 1.442695, %v1574_v11 }
 0xf66   :  { %6841 = vpow2.f32 %v1575_v13 }
 0xf68   :  { %v6838_v14 = vpop.eup %6837 }
 0xf69   :  { %v1245_v15 = vsel %vm386_vm5, %v6838_v14, 0.0 }
 0xf6a   :  { %1246 = vadd.xlane.f32.xlu0 %v1245_v15  ;;  %v1816_v15 = vld [vmem:[%s8112_s11 + $0x8] sm:$0xff] }
 0xf6c   :  { %v6840_v16 = vpop.eup %6839 }
 0xf6d   :  { %v1411_v17 = vsel %vm386_vm5, %v6840_v16, 0.0 }
 0xf6e   :  { %1412 = vadd.xlane.f32.xlu1 %v1411_v17 }
 0xf70   :  { %v6842_v18 = vpop.eup %6841 }
 0xf71   :  { %v1577_v19 = vsel %vm386_vm5, %v6842_v18, 0.0 }
 0xf72   :  { %1578 = vadd.xlane.f32.xlu0 %v1577_v19 }
 0xf7f   :  { %1582 = vrot.lane.b32.xlu1 %v7303_v28, %s8123_s23  ;;  %s8157_s23 = smov 64  }
 0xf88   :  { %1416 = vrot.lane.b32.xlu0 %v7303_v28, %s8125_s22  ;;  %s8156_s22 = smov 72  }
 0xf8c   :  { %976 = vrot.lane.b32.xlu0 %v7272_v59, %s8135_s24 }
 0xf90   :  { %980 = vrot.lane.b32.xlu0 %v7292_v12, %s8133_s25 }
 0xff7   :  { %v1247_v21 = vpop.xlane.xlu0 %1246 }
 0xff8   :  { %6843 = vrcp.f32 %v1247_v21 }
 0xffb   :  { %v1413_v22 = vpop.xlane.xlu1 %1412 }
 0xffc   :  { %6845 = vrcp.f32 %v1413_v22 }
 0xfff   :  { %v1579_v24 = vpop.xlane.xlu0 %1578  ;;  %v1583_v12 = vpop.permute.xlu1 %1582 }
0x1000   :  { %6847 = vrcp.f32 %v1579_v24 }
0x1002   :  { %v6844_v26 = vpop.eup %6843 }
0x1003   :  { %v1249_v27 = vmul.f32 %v6844_v26, %v6838_v14  ;;  %v1417_v29 = vpop.permute.xlu0 %1416  ;;  %v1815_v14 = vld [vmem:[%s8112_s11] sm:$0xff] }
0x1004   :  { %v6685_v17 = vpack.c.bf16 %v1816_v15, %v1815_v14 }
0x1005   :  { %6295 = vmatmul.mubr.msk.f32.vlgmr.msra.gmra.mrb[4].mxu0 %vm400_vm7, %v1249_v27 }
0x1006   :  { %v6846_v28 = vpop.eup %6845  ;;  %6303 = vmatpush3.msk.msra.mxu0 %vm404_vm6, %v1417_v29  ;;  %6304 = vmatprep.mubr.msk.f32.mxu0 %vm6971_vm3, %v6970_v20 }
0x1007   :  { %6312 = vmatprep.subr.mxu0 %v6970_v20  ;;  %v1415_v59 = vmul.f32 %v6846_v28, %v6840_v16  ;;  %v977_v46 = vpop.permute.xlu0 %976  ;;  %v1817_v16 = vld [vmem:[%s8112_s11 + $0x10] sm:$0xff] }
0x1008   :  { %v987_v55 = vsel %vm311_vm4, %v7252_v41, %v977_v46 }
0x1009   :  { %6305 = vmatmul.mubr.msk.f32.vlgmr.msra.gmra.mrb[6].mxu0 %vm400_vm7, %v1415_v59  ;;  %v5879_v59 = vld [vmem:[%s8110_s9] ss:$0 sm:$0xff] }
0x100a   :  { %v6848_v30 = vpop.eup %6847  ;;  %6313 = vmatpush3.msk.msra.mxu0 %vm404_vm6, %v1583_v12  ;;  %6314 = vmatprep.mubr.msk.f32.mxu0 %vm6971_vm3, %v6970_v20 }
0x100b   :  { %v1581_v31 = vmul.f32 %v6848_v30, %v6842_v18  ;;  %v981_v52 = vpop.permute.xlu0 %980  ;;  %v1818_v18 = vld [vmem:[%s8112_s11 + $0x18] sm:$0xff]  ;;  %6686 = vmatprep.subr.bf16.mxu0 %v6685_v17  ;;  %v5880_v30 = vld [vmem:[%s8111_s10] ss:$0 sm:$0xff] }
0x100c   :  { %v989_v56 = vsel %vm988_vm10, %v987_v55, %v981_v52  ;;  %v6689_v19 = vpack.c.bf16 %v1818_v18, %v1817_v16 }
0x100d   :  { %6315 = vmatmul.mubr.msk.f32.vlgmr.msra.gmra.mrb[8].mxu0 %vm400_vm7, %v1581_v31 }
0x100e   :  { %6688 = vmatpush3.bf16.msra.mxu0 %v6685_v17 }
0x100f   :  { %6690 = vmatprep.subr.bf16.mxu0 %v6689_v19 }
0x1012   :  { %6692 = vmatpush3.bf16.msra.mxu0 %v6689_v19 }
0x10d8   :  { %v1323_v37 = vpop.f32.mrb[4].mxu0 }
0x10d9   :  { %1660 = vrot.lane.b32.xlu1 %v1323_v37, %s8135_s24  ;;  %v6296_v38 = vpop.f32.mrb[5].mxu0  ;;  %v1926_v37 = vld [vmem:[%s8114_s13 + $0x8] sm:$0xff]  ;;  %s8158_s24 = smov 48  }
0x10da   :  { %v6693_v38 = vpack.c.bf16 %v1926_v37, %v1925_v36 }
0x10dc   :  { %v1489_v39 = vpop.f32.mrb[6].mxu0  ;;  %6694 = vmatprep.subr.bf16.mxu1 %v6693_v38 }
0x10dd   :  { %1664 = vrot.lane.b32.xlu1 %v1489_v39, %s8133_s25  ;;  %v6306_v40 = vpop.f32.mrb[7].mxu0  ;;  %v1927_v39 = vld [vmem:[%s8114_s13 + $0x10] sm:$0xff]  ;;  %s8159_s25 = smov 40  }
0x10de   :  { %v1928_v40 = vld [vmem:[%s8114_s13 + $0x18] sm:$0xff] }
0x10e0   :  { %v1655_v42 = vpop.f32.mrb[8].mxu0 }
0x10e1   :  { %1668 = vrot.lane.b32.xlu1 %v1655_v42, %s8131_s18  ;;  %v6316_v44 = vpop.f32.mrb[9].mxu0  ;;  %v6697_v42 = vpack.c.bf16 %v1928_v40, %v1927_v39 }
0x10e2   :  { %v1929_v44 = vld [vmem:[%s8114_s13 + $0x20] sm:$0xff] }
0x10e5   :  { %984 = vrot.lane.b32.xlu1 %v7320_v25, %s8131_s18  ;;  %s8160_s18 = smov 56  }
0x114b   :  { %v1661_v45 = vpop.permute.xlu1 %1660 }
0x114c   :  { %v1671_v49 = vsel %vm311_vm4, %v7351_v54, %v1661_v45  ;;  %v5876_v54 = vld [vmem:[%s8109_s8] ss:$0 sm:$0xff]  ;;  %v1930_v45 = vld [vmem:[%s8114_s13 + $0x28] sm:$0xff] }
0x114d   :  { %v6701_v46 = vpack.c.bf16 %v1930_v45, %v1929_v44 }
0x114f   :  { %v1665_v47 = vpop.permute.xlu1 %1664 }
0x1150   :  { %v1672_v50 = vsel %vm988_vm10, %v1671_v49, %v1665_v47  ;;  %v1931_v47 = vld [vmem:[%s8114_s13 + $0x30] sm:$0xff]  ;;  %v1932_v49 = vld [vmem:[%s8114_s13 + $0x38] sm:$0xff] }
0x1153   :  { %v1669_v51 = vpop.permute.xlu1 %1668 }
0x1154   :  { %v1673_v53 = vsel %vm990_vm9, %v1672_v50, %v1669_v51  ;;  %v6705_v50 = vpack.c.bf16 %v1932_v49, %v1931_v47  ;;  %v5881_v51 = vld [vmem:[%s8113_s12] ss:$0 sm:$0xff]  ;;  %v5890_v47 = vld [vmem:[%s8105_s4 + $0x1] ss:$0 sm:$0xff] }
0x1155   :  { %v1675_v25 = vrot.slane %v1673_v53, 3 }
0x1157   :  { %v985_v57 = vpop.permute.xlu1 %984 }
0x1158   :  { %v991_v58 = vsel %vm990_vm9, %v989_v56, %v985_v57 }
0x1159   :  { %v1677_v60 = vsel %vm404_vm6, %v991_v58, %v1675_v25 }
0x115a   :  { %6325 = vmatprep.mubr.msk.f32.mxu1 %vm171_vm1, %v1677_v60 }
0x115b   :  { %6326 = vmatmul.mubr.msk.f32.vlgmr.msra.gmra.mrb[28].mxu1 %vm171_vm1, %v1675_v25 }
0x115c   :  { %6696 = vmatpush3.bf16.msra.mxu1 %v6693_v38 }
0x115d   :  { %6698 = vmatprep.subr.bf16.mxu1 %v6697_v42 }
0x1160   :  { %6700 = vmatpush3.bf16.msra.mxu1 %v6697_v42  ;;  %v5889_v42 = vld [vmem:[%s8104_s3 + $0x1] ss:$0 sm:$0xff] }
0x1161   :  { %6702 = vmatprep.subr.bf16.mxu1 %v6701_v46 }
0x1164   :  { %6704 = vmatpush3.bf16.msra.mxu1 %v6701_v46 }
0x1165   :  { %6706 = vmatprep.subr.bf16.mxu1 %v6705_v50 }
0x1168   :  { %6708 = vmatpush3.bf16.msra.mxu1 %v6705_v50 }
0x1169   :  { %6379 = vmatprep.subr.mxu1 %v6970_v20 }
0x122e   :  { %v6327_v61 = vpop.f32.mrb[28].mxu1 }
0x122f   :  { %v1766_v62 = vadd.f32 %v6327_v61, %v5876_v54  ;;  %v1760_v63 = vpop.f32.mrb[29].mxu1 }
0x1230   :  { %v1761_v41 = vadd.f32 %v5876_v54, %v1760_v63 }
0x1231   :  { %v7413_v0 = vadd.f32 %v1766_v62, %v7185_v48 }
0x1232   :  { %v7416_v1 = vadd.f32 %v1761_v41, %v7178_v43 }
0x1233   :  { %v1776_v2 = vsel %vm175_vm2, %v7413_v0, 0.0 }
0x1234   :  { %1777 = vadd.xlane.f32.xlu1 %v1776_v2  ;;  %v1773_v4 = vsel %vm171_vm1, %v7416_v1, 0.0 }
0x1235   :  { %1774 = vadd.xlane.f32.xlu0 %v1773_v4 }
0x12c1   :  { %v1778_v5 = vpop.xlane.xlu1 %1777 }
0x12c2   :  { %v1780_v6 = vmul.f32 0.03125, %v1778_v5  ;;  %v1775_v7 = vpop.xlane.xlu0 %1774 }
0x12c3   :  { %v1779_v8 = vmul.f32 0.03125, %v1775_v7 }
0x12c4   :  { %v1782_v9 = vsub.f32 %v7413_v0, %v1780_v6 }
0x12c5   :  { %v1781_v48 = vsub.f32 %v7416_v1, %v1779_v8 }
0x12c6   :  { %v1784_v11 = vmul.f32 %v1782_v9, %v1782_v9 }
0x12c7   :  { %v1783_v10 = vmul.f32 %v1781_v48, %v1781_v48 }
0x12c8   :  { %v1788_v13 = vsel %vm175_vm2, %v1784_v11, 0.0 }
0x12c9   :  { %v1785_v43 = vsel %vm171_vm1, %v1783_v10, 0.0 }
0x12ca   :  { %1786 = vadd.xlane.f32.xlu0 %v1785_v43  ;;  %v5884_v43 = vld [vmem:[%s8115_s14] ss:$0 sm:$0xff] }
0x12ce   :  { %1789 = vadd.xlane.f32.xlu0 %v1788_v13 }
0x1357   :  { %v1787_v21 = vpop.xlane.xlu0 %1786 }
0x1358   :  { %v1791_v22 = vmul.f32 0.03125, %v1787_v21 }
0x135a   :  { %v1793_v24 = vadd.f32 1e-06, %v1791_v22 }
0x135b   :  { %v1790_v26 = vpop.xlane.xlu0 %1789 }
0x135c   :  { %6849 = vrsqrt.f32 %v1793_v24  ;;  %v1792_v27 = vmul.f32 0.03125, %v1790_v26 }
0x135e   :  { %v1794_v29 = vadd.f32 1e-06, %v1792_v27 }
0x1360   :  { %6851 = vrsqrt.f32 %v1794_v29 }
0x1366   :  { %v6850_v28 = vpop.eup %6849 }
0x1367   :  { %v1797_v12 = vmul.f32 %v6850_v28, %v1781_v48 }
0x1369   :  { %v1805_v31 = vmul.f32 %v5879_v59, %v1797_v12  ;;  %v5891_v12 = vld [vmem:[%s8106_s5 + $0x20] sm:$0xff] }
0x136a   :  { %v6852_v23 = vpop.eup %6851 }
0x136b   :  { %v1798_v32 = vmul.f32 %v6852_v23, %v1782_v9  ;;  %v1813_v33 = vadd.f32 %v5880_v30, %v1805_v31  ;;  %v5893_v31 = vld [vmem:[%s8106_s5 + $0x30] sm:$0xff] }
0x136d   :  { %v1806_v34 = vmul.f32 %v5879_v59, %v1798_v32  ;;  %6336 = vmatprep.mubr.msk.f32.mxu0 %vm171_vm1, %v1813_v33  ;;  %v5894_v32 = vld [vmem:[%s8106_s5 + $0x38] sm:$0xff] }
0x136e   :  { %v6713_v33 = vpack.c.bf16 %v5894_v32, %v5893_v31 }
0x136f   :  { %v1814_v35 = vadd.f32 %v5880_v30, %v1806_v34  ;;  %v5892_v30 = vld [vmem:[%s8106_s5 + $0x28] sm:$0xff] }
0x1370   :  { %v6709_v23 = vpack.c.bf16 %v5892_v30, %v5891_v12 }
0x1371   :  { %6337 = vmatmul.mubr.msk.f32.vlgmr.msra.gmra.mrb[10].mxu0 %vm171_vm1, %v1814_v35 }
0x1372   :  { %6710 = vmatprep.subr.bf16.mxu0 %v6709_v23 }
0x1373   :  { %6712 = vmatpush3.bf16.msra.mxu0 %v6709_v23 }
0x1374   :  { %6714 = vmatprep.subr.bf16.mxu0 %v6713_v33 }
0x1377   :  { %6716 = vmatpush3.bf16.msra.mxu0 %v6713_v33 }
0x1378   :  { %6369 = vmatprep.subr.mxu0 %v6970_v20 }
0x1444   :  { %v6338_v52 = vpop.f32.mrb[10].mxu0 }
0x1445   :  { %v1904_v53 = vadd.f32 %v6338_v52, %v5881_v51  ;;  %v1898_v55 = vpop.f32.mrb[11].mxu0 }
0x1446   :  { %v1899_v56 = vadd.f32 %v5881_v51, %v1898_v55 }
0x1447   :  { %v1910_v25 = vmul.f32 0.044715, %v1904_v53  ;;  %v1908_v9 = vmul.f32 0.5, %v1904_v53 }
0x1448   :  { %v1909_v57 = vmul.f32 0.044715, %v1899_v56  ;;  %v1907_v7 = vmul.f32 0.5, %v1899_v56 }
0x1449   :  { %v1912_v58 = vmul.f32 %v1910_v25, %v1904_v53 }
0x144a   :  { %v1911_v60 = vmul.f32 %v1909_v57, %v1899_v56 }
0x144b   :  { %v1914_v54 = vmul.f32 %v1912_v58, %v1904_v53 }
0x144c   :  { %v1913_v61 = vmul.f32 %v1911_v60, %v1899_v56 }
0x144d   :  { %v1916_v62 = vadd.f32 %v1914_v54, %v1904_v53  ;;  %v5896_v53 = vld [vmem:[%s8107_s6 + $0x1] ss:$0 sm:$0xff] }
0x144e   :  { %v1915_v63 = vadd.f32 %v1913_v61, %v1899_v56 }
0x144f   :  { %v1918_v41 = vmul.f32 0.7978846, %v1916_v62 }
0x1450   :  { %v1917_v2 = vmul.f32 0.7978846, %v1915_v63 }
0x1451   :  { %6853 = vtanh.f32 %v1918_v41 }
0x1452   :  { %6855 = vtanh.f32 %v1917_v2 }
0x145b   :  { %v6854_v4 = vpop.eup %6853 }
0x145c   :  { %v6856_v5 = vpop.eup %6855  ;;  %v1922_v6 = vadd.f32 1.0, %v6854_v4 }
0x145d   :  { %v1921_v8 = vadd.f32 1.0, %v6856_v5 }
0x145e   :  { %v1924_v10 = vmul.f32 %v1922_v6, %v1908_v9 }
0x145f   :  { %v1923_v48 = vmul.f32 %v1921_v8, %v1907_v7 }
0x1461   :  { %6355 = vmatprep.mubr.msk.f32.mxu1 %vm87_vm0, %v1923_v48 }
0x1462   :  { %6356 = vmatmul.mubr.msk.f32.vlgmr.msra.gmra.mrb[30].mxu1 %vm87_vm0, %v1924_v10 }
0x1463   :  { %6381 = vmatprep.mubr.msk.f32.mxu1 %vm6971_vm3, %v6970_v20 }
0x1535   :  { %v6357_v11 = vpop.f32.mrb[30].mxu1 }
0x1536   :  { %v2018_v13 = vadd.f32 %v6357_v11, %v5884_v43  ;;  %v2012_v14 = vpop.f32.mrb[31].mxu1 }
0x1537   :  { %v2013_v15 = vadd.f32 %v5884_v43, %v2012_v14 }
0x1538   :  { %v7482_v16 = vadd.f32 %v2018_v13, %v7413_v0 }
0x1539   :  { %v7485_v17 = vadd.f32 %v2013_v15, %v7416_v1 }
0x153a   :  { %v2030_v18 = vsel %vm175_vm2, %v7482_v16, 0.0 }
0x153b   :  { %2031 = vadd.xlane.f32.xlu1 %v2030_v18  ;;  %v2027_v19 = vsel %vm171_vm1, %v7485_v17, 0.0 }
0x153c   :  { %2028 = vadd.xlane.f32.xlu0 %v2027_v19 }
0x15c8   :  { %v2032_v21 = vpop.xlane.xlu1 %2031 }
0x15c9   :  { %v2034_v22 = vmul.f32 0.03125, %v2032_v21  ;;  %v2029_v24 = vpop.xlane.xlu0 %2028 }
0x15ca   :  { %v2033_v26 = vmul.f32 0.03125, %v2029_v24 }
0x15cb   :  { %v2036_v27 = vsub.f32 %v7482_v16, %v2034_v22 }
0x15cc   :  { %v2035_v0 = vsub.f32 %v7485_v17, %v2033_v26 }
0x15cd   :  { %v2038_v29 = vmul.f32 %v2036_v27, %v2036_v27 }
0x15ce   :  { %v2037_v28 = vmul.f32 %v2035_v0, %v2035_v0 }
0x15cf   :  { %v2042_v1 = vsel %vm175_vm2, %v2038_v29, 0.0 }
0x15d0   :  { %2043 = vadd.xlane.f32.xlu1 %v2042_v1  ;;  %v2039_v59 = vsel %vm171_vm1, %v2037_v28, 0.0 }
0x15d1   :  { %2040 = vadd.xlane.f32.xlu0 %v2039_v59 }
0x165d   :  { %v2044_v34 = vpop.xlane.xlu1 %2043 }
0x165e   :  { %v2046_v35 = vmul.f32 0.03125, %v2044_v34  ;;  %v2041_v36 = vpop.xlane.xlu0 %2040 }
0x165f   :  { %v2045_v37 = vmul.f32 0.03125, %v2041_v36 }
0x1660   :  { %v2048_v38 = vadd.f32 1e-06, %v2046_v35 }
0x1661   :  { %v2047_v39 = vadd.f32 1e-06, %v2045_v37 }
0x1662   :  { %6857 = vrsqrt.f32 %v2048_v38 }
0x1663   :  { %6859 = vrsqrt.f32 %v2047_v39 }
0x166c   :  { %v6858_v40 = vpop.eup %6857 }
0x166d   :  { %v6860_v44 = vpop.eup %6859  ;;  %v2052_v45 = vmul.f32 %v6858_v40, %v2036_v27 }
0x166e   :  { %v2051_v46 = vmul.f32 %v6860_v44, %v2035_v0 }
0x166f   :  { %v2060_v49 = vmul.f32 %v5889_v42, %v2052_v45 }
0x1670   :  { %v2059_v50 = vmul.f32 %v5889_v42, %v2051_v46 }
0x1671   :  { %v2068_v52 = vadd.f32 %v5890_v47, %v2060_v49 }
0x1672   :  { %v2067_v51 = vadd.f32 %v5890_v47, %v2059_v50 }
0x1674   :  { %6366 = vmatprep.mubr.msk.f32.mxu0 %vm171_vm1, %v2067_v51 }
0x1675   :  { %6367 = vmatmul.mubr.msk.f32.vlgmr.msra.gmra.mrb[12].mxu0 %vm171_vm1, %v2068_v52 }
0x1676   :  { %6371 = vmatprep.mubr.msk.f32.mxu0 %vm6971_vm3, %v6970_v20 }
0x1748   :  { %v6368_v55 = vpop.f32.mrb[12].mxu0 }
0x1749   :  { %v2154_v56 = vpop.f32.mrb[13].mxu0  ;;  %v2160_v57 = vadd.f32 %v6368_v55, %v5896_v53 }
0x174a   :  { %v7521_v25 = vadd.f32 %v5896_v53, %v2154_v56 }
0x174b   :  { %v2843_v58 = vrot.slane %v2160_v57, 5 }
0x174c   :  { %2330 = vrot.lane.b32.xlu1 %v7521_v25, %s8147_s30  ;;  %2164 = vrot.lane.b32.xlu0 %v7521_v25, %s8145_s0  ;;  %v2842_v60 = vrot.slane %v7521_v25, 5 }
0x174e   :  { %v7537_v54 = vsel %vm993_vm8, %v2842_v60, %v2843_v58 }
0x1750   :  { %2328 = vrot.lane.b32.xlu1 %v7521_v25, %s8143_s29  ;;  %2494 = vrot.lane.b32.xlu0 %v7521_v25, %s8141_s19 }
0x1754   :  { %2496 = vrot.lane.b32.xlu1 %v7521_v25, %s8139_s1  ;;  %2660 = vrot.lane.b32.xlu0 %v7521_v25, %s8137_s21 }
0x1758   :  { %2662 = vrot.lane.b32.xlu1 %v7521_v25, %s8156_s22  ;;  %3011 = vrot.lane.b32.xlu0 %v7537_v54, %s8147_s30 }
0x175c   :  { %3177 = vrot.lane.b32.xlu0 %v7537_v54, %s8139_s1  ;;  %2845 = vrot.lane.b32.xlu1 %v7537_v54, %s8145_s0  ;;  %s8163_s1 = smov 24  }
0x1760   :  { %3343 = vrot.lane.b32.xlu0 %v7537_v54, %s8156_s22  ;;  %3009 = vrot.lane.b32.xlu1 %v7537_v54, %s8143_s29  ;;  %s8165_s29 = smov 96  }
0x1764   :  { %3175 = vrot.lane.b32.xlu1 %v7537_v54, %s8141_s19  ;;  %s8166_s19 = smov 120  }
0x1768   :  { %3341 = vrot.lane.b32.xlu1 %v7537_v54, %s8137_s21  ;;  %s8167_s21 = smov 112  }
0x17be   :  { %v2331_v61 = vpop.permute.xlu1 %2330  ;;  %v2165_v62 = vpop.permute.xlu0 %2164 }
0x17bf   :  { %6370 = vmatpush3.xpose.msk.msra.mxu0 %vm311_vm4, %v2165_v62  ;;  %6380 = vmatpush3.xpose.msk.msra.mxu1 %vm311_vm4, %v2331_v61 }
0x17c0   :  { %6389 = vmatprep.subr.mxu1 %v6970_v20  ;;  %6374 = vmatprep.subr.mxu0 %v6970_v20 }
0x17c2   :  { %v2329_v63 = vpop.permute.xlu1 %2328  ;;  %6372 = vmatmul.mubr.msk.f32.vlgmr.msra.gmra.mrb[14].mxu0 %vm311_vm4, %v7521_v25  ;;  %v2495_v41 = vpop.permute.xlu0 %2494 }
0x17c3   :  { %6382 = vmatmul.mubr.msk.f32.vlgmr.msra.gmra.mrb[32].mxu1 %vm311_vm4, %v2329_v63  ;;  %6376 = vmatprep.mubr.msk.f32.mxu0 %vm6971_vm3, %v6970_v20 }
0x17c4   :  { %6391 = vmatprep.mubr.msk.f32.mxu1 %vm6971_vm3, %v6970_v20 }
0x17c6   :  { %v2497_v2 = vpop.permute.xlu1 %2496  ;;  %v2661_v4 = vpop.permute.xlu0 %2660 }
0x17c7   :  { %6390 = vmatpush3.xpose.msk.msra.mxu1 %vm311_vm4, %v2497_v2 }
0x17c8   :  { %6399 = vmatprep.subr.mxu1 %v6970_v20 }
0x17ca   :  { %v2663_v5 = vpop.permute.xlu1 %2662  ;;  %6392 = vmatmul.mubr.msk.f32.vlgmr.msra.gmra.mrb[34].mxu1 %vm311_vm4, %v2495_v41  ;;  %v3012_v6 = vpop.permute.xlu0 %3011 }
0x17cb   :  { %6400 = vmatpush3.xpose.msk.msra.mxu1 %vm311_vm4, %v2663_v5  ;;  %6401 = vmatprep.mubr.msk.f32.mxu1 %vm6971_vm3, %v6970_v20 }
0x17cc   :  { %6409 = vmatprep.subr.mxu1 %v6970_v20 }
0x17ce   :  { %6402 = vmatmul.mubr.msk.f32.vlgmr.msra.gmra.mrb[36].mxu1 %vm311_vm4, %v2661_v4  ;;  %v2846_v7 = vpop.permute.xlu1 %2845  ;;  %v3178_v9 = vpop.permute.xlu0 %3177 }
0x17cf   :  { %6410 = vmatpush3.xpose.msk.msra.mxu1 %vm311_vm4, %v2846_v7  ;;  %6411 = vmatprep.mubr.msk.f32.mxu1 %vm6971_vm3, %v6970_v20 }
0x17d0   :  { %6419 = vmatprep.subr.mxu1 %v6970_v20 }
0x17d2   :  { %6412 = vmatmul.mubr.msk.f32.vlgmr.msra.gmra.mrb[38].mxu1 %vm311_vm4, %v7537_v54  ;;  %v3010_v8 = vpop.permute.xlu1 %3009  ;;  %v3344_v10 = vpop.permute.xlu0 %3343 }
0x17d3   :  { %6420 = vmatpush3.xpose.msk.msra.mxu1 %vm311_vm4, %v3012_v6  ;;  %6421 = vmatprep.mubr.msk.f32.mxu1 %vm6971_vm3, %v6970_v20 }
0x17d4   :  { %6429 = vmatprep.subr.mxu1 %v6970_v20 }
0x17d6   :  { %6422 = vmatmul.mubr.msk.f32.vlgmr.msra.gmra.mrb[40].mxu1 %vm311_vm4, %v3010_v8  ;;  %v3176_v48 = vpop.permute.xlu1 %3175 }
0x17d7   :  { %6430 = vmatpush3.xpose.msk.msra.mxu1 %vm311_vm4, %v3178_v9  ;;  %6431 = vmatprep.mubr.msk.f32.mxu1 %vm6971_vm3, %v6970_v20 }
0x17d8   :  { %6439 = vmatprep.subr.mxu1 %v6970_v20 }
0x17da   :  { %6432 = vmatmul.mubr.msk.f32.vlgmr.msra.gmra.mrb[42].mxu1 %vm311_vm4, %v3176_v48  ;;  %v3342_v43 = vpop.permute.xlu1 %3341 }
0x17db   :  { %6440 = vmatpush3.xpose.msk.msra.mxu1 %vm311_vm4, %v3344_v10  ;;  %6441 = vmatprep.mubr.msk.f32.mxu1 %vm6971_vm3, %v6970_v20 }
0x17de   :  { %6442 = vmatmul.mubr.msk.f32.vlgmr.msra.gmra.mrb[44].mxu1 %vm311_vm4, %v3342_v43 }
0x1895   :  { %v2236_v11 = vpop.f32.mrb[14].mxu0 }
0x1896   :  { %v6373_v13 = vpop.f32.mrb[15].mxu0  ;;  %v2402_v14 = vpop.f32.mrb[32].mxu1  ;;  %v2240_v15 = vsel %vm386_vm5, %v2236_v11, -inf }
0x1897   :  { %v6383_v18 = vpop.f32.mrb[33].mxu1  ;;  %2241 = vmax.xlane.f32.xlu0 %v2240_v15  ;;  %v2406_v19 = vsel %vm386_vm5, %v2402_v14, -inf }
0x1898   :  { %2407 = vmax.xlane.f32.xlu1 %v2406_v19 }
0x189d   :  { %v2568_v21 = vpop.f32.mrb[34].mxu1 }
0x189e   :  { %v6393_v22 = vpop.f32.mrb[35].mxu1  ;;  %v2572_v24 = vsel %vm386_vm5, %v2568_v21, -inf }
0x189f   :  { %2573 = vmax.xlane.f32.xlu0 %v2572_v24 }
0x18a1   :  { %v2734_v26 = vpop.f32.mrb[36].mxu1 }
0x18a2   :  { %v6403_v27 = vpop.f32.mrb[37].mxu1  ;;  %v2738_v0 = vsel %vm386_vm5, %v2734_v26, -inf }
0x18a3   :  { %2739 = vmax.xlane.f32.xlu0 %v2738_v0 }
0x18a5   :  { %v2917_v29 = vpop.f32.mrb[38].mxu1 }
0x18a6   :  { %v6413_v28 = vpop.f32.mrb[39].mxu1  ;;  %v2921_v1 = vsel %vm386_vm5, %v2917_v29, -inf }
0x18a7   :  { %2922 = vmax.xlane.f32.xlu0 %v2921_v1 }
0x18a9   :  { %v3083_v59 = vpop.f32.mrb[40].mxu1 }
0x18aa   :  { %v6423_v12 = vpop.f32.mrb[41].mxu1  ;;  %v3087_v30 = vsel %vm386_vm5, %v3083_v59, -inf }
0x18ab   :  { %3088 = vmax.xlane.f32.xlu1 %v3087_v30 }
0x18ad   :  { %v3249_v31 = vpop.f32.mrb[42].mxu1 }
0x18ae   :  { %v6433_v23 = vpop.f32.mrb[43].mxu1  ;;  %v3253_v32 = vsel %vm386_vm5, %v3249_v31, -inf }
0x18af   :  { %3254 = vmax.xlane.f32.xlu0 %v3253_v32 }
0x18b1   :  { %v3415_v33 = vpop.f32.mrb[44].mxu1 }
0x18b2   :  { %v6443_v34 = vpop.f32.mrb[45].mxu1  ;;  %v3419_v35 = vsel %vm386_vm5, %v3415_v33, -inf }
0x18bc   :  { %2251 = vrot.lane.b32.xlu1 %v7521_v25, %s8157_s23 }
0x18e0   :  { %3420 = vmax.xlane.f32.xlu1 %v3419_v35 }
0x18f1   :  { %2583 = vrot.lane.b32.xlu1 %v7521_v25, %s8158_s24 }
0x18f5   :  { %2749 = vrot.lane.b32.xlu1 %v7521_v25, %s8159_s25 }
0x18f9   :  { %2932 = vrot.lane.b32.xlu1 %v7537_v54, %s8157_s23 }
0x1924   :  { %v2242_v36 = vpop.xlane.xlu0 %2241 }
0x1925   :  { %v2243_v37 = vsub.f32 %v2236_v11, %v2242_v36  ;;  %v2408_v38 = vpop.xlane.xlu1 %2407 }
0x1926   :  { %v2409_v39 = vsub.f32 %v2402_v14, %v2408_v38 }
0x1927   :  { %v2244_v40 = vmul.f32 1.442695, %v2243_v37 }
0x1928   :  { %v2410_v42 = vmul.f32 1.442695, %v2409_v39 }
0x1929   :  { %6861 = vpow2.f32 %v2244_v40 }
0x192a   :  { %6863 = vpow2.f32 %v2410_v42 }
0x192c   :  { %v2574_v44 = vpop.xlane.xlu0 %2573 }
0x192d   :  { %v2575_v58 = vsub.f32 %v2568_v21, %v2574_v44 }
0x192f   :  { %v2576_v61 = vmul.f32 1.442695, %v2575_v58 }
0x1930   :  { %v2740_v45 = vpop.xlane.xlu0 %2739 }
0x1931   :  { %v2741_v46 = vsub.f32 %v2734_v26, %v2740_v45 }
0x1933   :  { %v6862_v47 = vpop.eup %6861  ;;  %v2742_v49 = vmul.f32 1.442695, %v2741_v46 }
0x1934   :  { %v7610_v50 = vpop.eup %6863  ;;  %v2246_v51 = vsel %vm386_vm5, %v6862_v47, 0.0  ;;  %v2923_v60 = vpop.xlane.xlu0 %2922 }
0x1935   :  { %6865 = vpow2.f32 %v2742_v49  ;;  %2247 = vadd.xlane.f32.xlu0 %v2246_v51  ;;  %v2412_v52 = vsel %vm386_vm5, %v7610_v50, 0.0  ;;  %v2924_v62 = vsub.f32 %v2917_v29, %v2923_v60  ;;  %v5931_v60 = vld [vmem:[%s8108_s7 + $0x20] sm:$0xff] }
0x1936   :  { %2413 = vadd.xlane.f32.xlu1 %v2412_v52  ;;  %6867 = vpow2.f32 %v2576_v61  ;;  %v5932_v61 = vld [vmem:[%s8108_s7 + $0x28] sm:$0xff] }
0x1937   :  { %v2925_v41 = vmul.f32 1.442695, %v2924_v62 }
0x1938   :  { %v3089_v53 = vpop.xlane.xlu1 %3088 }
0x1939   :  { %6869 = vpow2.f32 %v2925_v41  ;;  %v3090_v4 = vsub.f32 %v3083_v59, %v3089_v53 }
0x193b   :  { %v3091_v6 = vmul.f32 1.442695, %v3090_v4  ;;  %v5933_v4 = vld [vmem:[%s8108_s7 + $0x30] sm:$0xff] }
0x193c   :  { %v2252_v55 = vpop.permute.xlu1 %2251  ;;  %v3255_v63 = vpop.xlane.xlu0 %3254 }
0x193d   :  { %6375 = vmatpush3.msk.msra.mxu0 %vm404_vm6, %v2252_v55  ;;  %v3256_v2 = vsub.f32 %v3249_v31, %v3255_v63  ;;  %v6717_v63 = vpack.c.bf16 %v5932_v61, %v5931_v60  ;;  %v5942_v61 = vld [vmem:[%s8111_s10 + $0x1] ss:$0 sm:$0xff] }
0x193e   :  { %6384 = vmatprep.subr.mxu0 %v6970_v20 }
0x193f   :  { %v7617_v56 = vpop.eup %6865  ;;  %v3257_v5 = vmul.f32 1.442695, %v3256_v2  ;;  %6718 = vmatprep.subr.bf16.mxu1 %v6717_v63 }
0x1940   :  { %v2744_v57 = vsel %vm386_vm5, %v7617_v56, 0.0  ;;  %v6868_v7 = vpop.eup %6867  ;;  %6720 = vmatpush3.bf16.msra.mxu1 %v6717_v63 }
0x1941   :  { %2745 = vadd.xlane.f32.xlu1 %v2744_v57  ;;  %6871 = vpow2.f32 %v3257_v5  ;;  %v5934_v5 = vld [vmem:[%s8108_s7 + $0x38] sm:$0xff] }
0x1942   :  { %6873 = vpow2.f32 %v3091_v6  ;;  %v6721_v6 = vpack.c.bf16 %v5934_v5, %v5933_v4 }
0x1943   :  { %v6870_v8 = vpop.eup %6869 }
0x1944   :  { %v2927_v48 = vsel %vm386_vm5, %v6870_v8, 0.0  ;;  %6722 = vmatprep.subr.bf16.mxu1 %v6721_v6 }
0x1945   :  { %6724 = vmatpush3.bf16.msra.mxu1 %v6721_v6  ;;  %v5951_v6 = vld [vmem:[%s8114_s13 + $0x40] sm:$0xff] }
0x194b   :  { %2417 = vrot.lane.b32.xlu0 %v7521_v25, %s8160_s18  ;;  %v2578_v25 = vsel %vm386_vm5, %v6868_v7, 0.0  ;;  %v7627_v10 = vpop.eup %6871 }
0x194c   :  { %v3259_v13 = vsel %vm386_vm5, %v7627_v10, 0.0  ;;  %v6874_v14 = vpop.eup %6873 }
0x194d   :  { %v3093_v15 = vsel %vm386_vm5, %v6874_v14, 0.0 }
0x1952   :  { %3098 = vrot.lane.b32.xlu1 %v7537_v54, %s8160_s18 }
0x196a   :  { %2579 = vadd.xlane.f32.xlu0 %v2578_v25 }
0x196d   :  { %v3421_v9 = vpop.xlane.xlu1 %3420 }
0x196e   :  { %v3422_v43 = vsub.f32 %v3415_v33, %v3421_v9  ;;  %2928 = vadd.xlane.f32.xlu0 %v2927_v48 }
0x1970   :  { %v3423_v11 = vmul.f32 1.442695, %v3422_v43 }
0x1971   :  { %v2584_v21 = vpop.permute.xlu1 %2583 }
0x1972   :  { %6875 = vpow2.f32 %v3423_v11  ;;  %3260 = vadd.xlane.f32.xlu0 %v3259_v13 }
0x1975   :  { %v2750_v22 = vpop.permute.xlu1 %2749 }
0x1976   :  { %3094 = vadd.xlane.f32.xlu1 %v3093_v15 }
0x1979   :  { %v2933_v24 = vpop.permute.xlu1 %2932 }
0x197c   :  { %v7632_v18 = vpop.eup %6875 }
0x197d   :  { %v3425_v19 = vsel %vm386_vm5, %v7632_v18, 0.0 }
0x197e   :  { %3426 = vadd.xlane.f32.xlu0 %v3425_v19 }
0x1987   :  { %3430 = vrot.lane.b32.xlu1 %v7537_v54, %s8159_s25 }
0x1994   :  { %3264 = vrot.lane.b32.xlu0 %v7537_v54, %s8158_s24 }
0x19c2   :  { %v2248_v26 = vpop.xlane.xlu0 %2247 }
0x19c3   :  { %6877 = vrcp.f32 %v2248_v26  ;;  %v2414_v27 = vpop.xlane.xlu1 %2413 }
0x19c4   :  { %6879 = vrcp.f32 %v2414_v27 }
0x19c6   :  { %v2418_v1 = vpop.permute.xlu0 %2417 }
0x19cd   :  { %v6878_v0 = vpop.eup %6877 }
0x19ce   :  { %v2250_v29 = vmul.f32 %v6878_v0, %v6862_v47  ;;  %v6880_v28 = vpop.eup %6879  ;;  %v2746_v59 = vpop.xlane.xlu1 %2745 }
0x19cf   :  { %v2416_v54 = vmul.f32 %v6880_v28, %v7610_v50  ;;  %v5936_v28 = vld [vmem:[%s8109_s8 + $0x1] ss:$0 sm:$0xff] }
0x19d0   :  { %6377 = vmatmul.mubr.msk.f32.vlgmr.msra.gmra.mrb[16].mxu0 %vm400_vm7, %v2250_v29 }
0x19d1   :  { %6385 = vmatpush3.msk.msra.mxu0 %vm404_vm6, %v2418_v1  ;;  %6386 = vmatprep.mubr.msk.f32.mxu0 %vm6971_vm3, %v6970_v20 }
0x19d2   :  { %6394 = vmatprep.subr.mxu0 %v6970_v20  ;;  %v3099_v31 = vpop.permute.xlu1 %3098 }
0x19d4   :  { %6387 = vmatmul.mubr.msk.f32.vlgmr.msra.gmra.mrb[18].mxu0 %vm400_vm7, %v2416_v54 }
0x19d5   :  { %6395 = vmatpush3.msk.msra.mxu0 %vm404_vm6, %v2584_v21  ;;  %6396 = vmatprep.mubr.msk.f32.mxu0 %vm6971_vm3, %v6970_v20 }
0x19d6   :  { %6404 = vmatprep.subr.mxu0 %v6970_v20 }
0x19f7   :  { %v2580_v12 = vpop.xlane.xlu0 %2579 }
0x19f8   :  { %6881 = vrcp.f32 %v2580_v12 }
0x19f9   :  { %6883 = vrcp.f32 %v2746_v59 }
0x19fb   :  { %v2929_v30 = vpop.xlane.xlu0 %2928 }
0x19fc   :  { %6885 = vrcp.f32 %v2929_v30 }
0x19ff   :  { %v3261_v33 = vpop.xlane.xlu0 %3260 }
0x1a02   :  { %v6882_v23 = vpop.eup %6881 }
0x1a03   :  { %v2582_v32 = vmul.f32 %v6882_v23, %v6868_v7  ;;  %v3095_v34 = vpop.xlane.xlu1 %3094  ;;  %v6884_v35 = vpop.eup %6883 }
0x1a04   :  { %6887 = vrcp.f32 %v3095_v34  ;;  %v2748_v36 = vmul.f32 %v6884_v35, %v7617_v56 }
0x1a05   :  { %6397 = vmatmul.mubr.msk.f32.vlgmr.msra.gmra.mrb[20].mxu0 %vm400_vm7, %v2582_v32  ;;  %6889 = vrcp.f32 %v3261_v33 }
0x1a06   :  { %6405 = vmatpush3.msk.msra.mxu0 %vm404_vm6, %v2750_v22  ;;  %6406 = vmatprep.mubr.msk.f32.mxu0 %vm6971_vm3, %v6970_v20  ;;  %v6886_v37 = vpop.eup %6885 }
0x1a07   :  { %6414 = vmatprep.subr.mxu0 %v6970_v20  ;;  %v2931_v38 = vmul.f32 %v6886_v37, %v6870_v8  ;;  %v3431_v47 = vpop.permute.xlu1 %3430 }
0x1a09   :  { %6407 = vmatmul.mubr.msk.f32.vlgmr.msra.gmra.mrb[22].mxu0 %vm400_vm7, %v2748_v36 }
0x1a0a   :  { %6415 = vmatpush3.msk.msra.mxu0 %vm404_vm6, %v2933_v24  ;;  %6416 = vmatprep.mubr.msk.f32.mxu0 %vm6971_vm3, %v6970_v20 }
0x1a0b   :  { %v3427_v39 = vpop.xlane.xlu0 %3426  ;;  %6424 = vmatprep.subr.mxu0 %v6970_v20 }
0x1a0c   :  { %6891 = vrcp.f32 %v3427_v39 }
0x1a0d   :  { %6417 = vmatmul.mubr.msk.f32.vlgmr.msra.gmra.mrb[24].mxu0 %vm400_vm7, %v2931_v38 }
0x1a0e   :  { %v6888_v40 = vpop.eup %6887  ;;  %6425 = vmatpush3.msk.msra.mxu0 %vm404_vm6, %v3099_v31  ;;  %6426 = vmatprep.mubr.msk.f32.mxu0 %vm6971_vm3, %v6970_v20 }
0x1a0f   :  { %v3097_v42 = vmul.f32 %v6888_v40, %v6874_v14  ;;  %v3265_v44 = vpop.permute.xlu0 %3264  ;;  %6434 = vmatprep.subr.mxu0 %v6970_v20  ;;  %v6890_v45 = vpop.eup %6889 }
0x1a10   :  { %v3263_v46 = vmul.f32 %v6890_v45, %v7627_v10 }
0x1a11   :  { %6427 = vmatmul.mubr.msk.f32.vlgmr.msra.gmra.mrb[26].mxu0 %vm400_vm7, %v3097_v42  ;;  %v5943_v42 = vld [vmem:[%s8112_s11 + $0x20] sm:$0xff] }
0x1a12   :  { %6435 = vmatpush3.msk.msra.mxu0 %vm404_vm6, %v3265_v44  ;;  %6436 = vmatprep.mubr.msk.f32.mxu0 %vm6971_vm3, %v6970_v20  ;;  %v5944_v44 = vld [vmem:[%s8112_s11 + $0x28] sm:$0xff] }
0x1a13   :  { %6444 = vmatprep.subr.mxu0 %v6970_v20  ;;  %v6725_v45 = vpack.c.bf16 %v5944_v44, %v5943_v42 }
0x1a15   :  { %6437 = vmatmul.mubr.msk.f32.vlgmr.msra.gmra.mrb[28].mxu0 %vm400_vm7, %v3263_v46  ;;  %v5945_v46 = vld [vmem:[%s8112_s11 + $0x30] sm:$0xff] }
0x1a16   :  { %v6892_v49 = vpop.eup %6891  ;;  %6445 = vmatpush3.msk.msra.mxu0 %vm404_vm6, %v3431_v47  ;;  %6446 = vmatprep.mubr.msk.f32.mxu0 %vm6971_vm3, %v6970_v20  ;;  %v5946_v47 = vld [vmem:[%s8112_s11 + $0x38] sm:$0xff] }
0x1a17   :  { %v3429_v50 = vmul.f32 %v6892_v49, %v7632_v18  ;;  %6726 = vmatprep.subr.bf16.mxu0 %v6725_v45  ;;  %v6729_v49 = vpack.c.bf16 %v5946_v47, %v5945_v46 }
0x1a19   :  { %6447 = vmatmul.mubr.msk.f32.vlgmr.msra.gmra.mrb[30].mxu0 %vm400_vm7, %v3429_v50 }
0x1a1a   :  { %6728 = vmatpush3.bf16.msra.mxu0 %v6725_v45 }
0x1a1b   :  { %6730 = vmatprep.subr.bf16.mxu0 %v6729_v49 }
0x1a1e   :  { %6732 = vmatpush3.bf16.msra.mxu0 %v6729_v49 }
0x1aa3   :  { %v2324_v51 = vpop.f32.mrb[16].mxu0 }
0x1aa4   :  { %v6378_v52 = vpop.f32.mrb[17].mxu0 }
0x1aa7   :  { %v2490_v53 = vpop.f32.mrb[18].mxu0 }
0x1aa8   :  { %2827 = vrot.lane.b32.xlu0 %v2490_v53, %s8161_s27  ;;  %v6388_v55 = vpop.f32.mrb[19].mxu0 }
0x1ad8   :  { %v2656_v56 = vpop.f32.mrb[20].mxu0 }
0x1ad9   :  { %v6398_v57 = vpop.f32.mrb[21].mxu0 }
0x1adc   :  { %v2822_v58 = vpop.f32.mrb[22].mxu0 }
0x1add   :  { %v6408_v62 = vpop.f32.mrb[23].mxu0 }
0x1ae0   :  { %v3005_v41 = vpop.f32.mrb[24].mxu0 }
0x1ae1   :  { %v6418_v2 = vpop.f32.mrb[25].mxu0 }
0x1ae4   :  { %v3171_v7 = vpop.f32.mrb[26].mxu0 }
0x1ae5   :  { %3508 = vrot.lane.b32.xlu0 %v3171_v7, %s8161_s27  ;;  %v6428_v25 = vpop.f32.mrb[27].mxu0  ;;  %v5952_v7 = vld [vmem:[%s8114_s13 + $0x48] sm:$0xff] }
0x1ae6   :  { %v6733_v25 = vpack.c.bf16 %v5952_v7, %v5951_v6 }
0x1ae8   :  { %v3337_v8 = vpop.f32.mrb[28].mxu0  ;;  %6734 = vmatprep.subr.bf16.mxu1 %v6733_v25 }
0x1ae9   :  { %2831 = vrot.lane.b32.xlu0 %v2656_v56, %s8162_s26  ;;  %3512 = vrot.lane.b32.xlu1 %v3337_v8, %s8162_s26  ;;  %v6438_v9 = vpop.f32.mrb[29].mxu0  ;;  %v5953_v8 = vld [vmem:[%s8114_s13 + $0x50] sm:$0xff] }
0x1aea   :  { %v5954_v9 = vld [vmem:[%s8114_s13 + $0x58] sm:$0xff] }
0x1aec   :  { %v3503_v48 = vpop.f32.mrb[30].mxu0 }
0x1aed   :  { %3516 = vrot.lane.b32.xlu1 %v3503_v48, %s8163_s1  ;;  %v6448_v10 = vpop.f32.mrb[31].mxu0  ;;  %v6737_v48 = vpack.c.bf16 %v5954_v9, %v5953_v8 }
0x1aee   :  { %v5955_v10 = vld [vmem:[%s8114_s13 + $0x60] sm:$0xff] }
0x1af1   :  { %2835 = vrot.lane.b32.xlu1 %v2822_v58, %s8163_s1  ;;  %v5941_v58 = vld [vmem:[%s8110_s9 + $0x1] ss:$0 sm:$0xff] }
0x1b1a   :  { %v2828_v43 = vpop.permute.xlu0 %2827 }
0x1b1b   :  { %v2838_v22 = vsel %vm311_vm4, %v2324_v51, %v2828_v43  ;;  %v5956_v43 = vld [vmem:[%s8114_s13 + $0x68] sm:$0xff] }
0x1b57   :  { %v3509_v11 = vpop.permute.xlu0 %3508 }
0x1b58   :  { %v3519_v14 = vsel %vm311_vm4, %v3005_v41, %v3509_v11  ;;  %v6741_v11 = vpack.c.bf16 %v5956_v43, %v5955_v10 }
0x1b5b   :  { %v3513_v13 = vpop.permute.xlu1 %3512  ;;  %v2832_v19 = vpop.permute.xlu0 %2831 }
0x1b5c   :  { %v3520_v15 = vsel %vm988_vm10, %v3519_v14, %v3513_v13  ;;  %v2839_v24 = vsel %vm988_vm10, %v2838_v22, %v2832_v19  ;;  %v5957_v13 = vld [vmem:[%s8114_s13 + $0x70] sm:$0xff]  ;;  %v5958_v14 = vld [vmem:[%s8114_s13 + $0x78] sm:$0xff] }
0x1b5f   :  { %v3517_v18 = vpop.permute.xlu1 %3516 }
0x1b60   :  { %v3521_v21 = vsel %vm990_vm9, %v3520_v15, %v3517_v18  ;;  %v6745_v15 = vpack.c.bf16 %v5958_v14, %v5957_v13  ;;  %v5948_v18 = vld [vmem:[%s8113_s12 + $0x1] ss:$0 sm:$0xff]  ;;  %v5966_v13 = vld [vmem:[%s8105_s4 + $0x2] ss:$0 sm:$0xff]  ;;  %s8164_s4 = smov 88  }
0x1b61   :  { %v3523_v26 = vrot.slane %v3521_v21, 3 }
0x1b63   :  { %v2836_v27 = vpop.permute.xlu1 %2835 }
0x1b64   :  { %v2840_v0 = vsel %vm990_vm9, %v2839_v24, %v2836_v27 }
0x1b65   :  { %v3525_v29 = vsel %vm404_vm6, %v2840_v0, %v3523_v26 }
0x1b66   :  { %6457 = vmatprep.mubr.msk.f32.mxu1 %vm171_vm1, %v3525_v29 }
0x1b67   :  { %6458 = vmatmul.mubr.msk.f32.vlgmr.msra.gmra.mrb[46].mxu1 %vm171_vm1, %v3523_v26 }
0x1b68   :  { %6736 = vmatpush3.bf16.msra.mxu1 %v6733_v25 }
0x1b69   :  { %6738 = vmatprep.subr.bf16.mxu1 %v6737_v48 }
0x1b6c   :  { %6740 = vmatpush3.bf16.msra.mxu1 %v6737_v48  ;;  %v5965_v48 = vld [vmem:[%s8104_s3 + $0x2] ss:$0 sm:$0xff] }
0x1b6d   :  { %6742 = vmatprep.subr.bf16.mxu1 %v6741_v11 }
0x1b70   :  { %6744 = vmatpush3.bf16.msra.mxu1 %v6741_v11 }
0x1b71   :  { %6746 = vmatprep.subr.bf16.mxu1 %v6745_v15 }
0x1b74   :  { %6748 = vmatpush3.bf16.msra.mxu1 %v6745_v15 }
0x1b75   :  { %6511 = vmatprep.subr.mxu1 %v6970_v20 }
0x1c3a   :  { %v6459_v1 = vpop.f32.mrb[46].mxu1 }
0x1c3b   :  { %v3616_v54 = vadd.f32 %v6459_v1, %v5936_v28  ;;  %v3610_v59 = vpop.f32.mrb[47].mxu1 }
0x1c3c   :  { %v3611_v12 = vadd.f32 %v5936_v28, %v3610_v59 }
0x1c3d   :  { %v7710_v30 = vadd.f32 %v3616_v54, %v7482_v16 }
0x1c3e   :  { %v7713_v31 = vadd.f32 %v3611_v12, %v7485_v17 }
0x1c3f   :  { %v3628_v23 = vsel %vm175_vm2, %v7710_v30, 0.0 }
0x1c40   :  { %3629 = vadd.xlane.f32.xlu1 %v3628_v23  ;;  %v3625_v32 = vsel %vm171_vm1, %v7713_v31, 0.0 }
0x1c41   :  { %3626 = vadd.xlane.f32.xlu0 %v3625_v32 }
0x1ccd   :  { %v3630_v33 = vpop.xlane.xlu1 %3629 }
0x1cce   :  { %v3632_v34 = vmul.f32 0.03125, %v3630_v33  ;;  %v3627_v35 = vpop.xlane.xlu0 %3626 }
0x1ccf   :  { %v3631_v36 = vmul.f32 0.03125, %v3627_v35 }
0x1cd0   :  { %v3634_v37 = vsub.f32 %v7710_v30, %v3632_v34 }
0x1cd1   :  { %v3633_v16 = vsub.f32 %v7713_v31, %v3631_v36 }
0x1cd2   :  { %v3636_v39 = vmul.f32 %v3634_v37, %v3634_v37 }
0x1cd3   :  { %v3635_v38 = vmul.f32 %v3633_v16, %v3633_v16 }
0x1cd4   :  { %v3640_v40 = vsel %vm175_vm2, %v3636_v39, 0.0 }
0x1cd5   :  { %v3637_v17 = vsel %vm171_vm1, %v3635_v38, 0.0 }
0x1cd6   :  { %3638 = vadd.xlane.f32.xlu0 %v3637_v17  ;;  %v5960_v17 = vld [vmem:[%s8115_s14 + $0x1] ss:$0 sm:$0xff] }
0x1cda   :  { %3641 = vadd.xlane.f32.xlu0 %v3640_v40 }
0x1d63   :  { %v3639_v50 = vpop.xlane.xlu0 %3638 }
0x1d64   :  { %v3643_v51 = vmul.f32 0.03125, %v3639_v50 }
0x1d66   :  { %v3645_v52 = vadd.f32 1e-06, %v3643_v51 }
0x1d67   :  { %v3642_v53 = vpop.xlane.xlu0 %3641 }
0x1d68   :  { %6893 = vrsqrt.f32 %v3645_v52  ;;  %v3644_v55 = vmul.f32 0.03125, %v3642_v53 }
0x1d6a   :  { %v3646_v56 = vadd.f32 1e-06, %v3644_v55 }
0x1d6c   :  { %6895 = vrsqrt.f32 %v3646_v56 }
0x1d72   :  { %v6894_v57 = vpop.eup %6893 }
0x1d73   :  { %v3649_v60 = vmul.f32 %v6894_v57, %v3633_v16 }
0x1d75   :  { %v3657_v62 = vmul.f32 %v5941_v58, %v3649_v60  ;;  %v5967_v60 = vld [vmem:[%s8106_s5 + $0x40] sm:$0xff] }
0x1d76   :  { %v6896_v63 = vpop.eup %6895 }
0x1d77   :  { %v3650_v41 = vmul.f32 %v6896_v63, %v3634_v37  ;;  %v3665_v2 = vadd.f32 %v5942_v61, %v3657_v62  ;;  %v5969_v63 = vld [vmem:[%s8106_s5 + $0x50] sm:$0xff] }
0x1d79   :  { %v3658_v4 = vmul.f32 %v5941_v58, %v3650_v41  ;;  %6468 = vmatprep.mubr.msk.f32.mxu0 %vm171_vm1, %v3665_v2  ;;  %v5970_v41 = vld [vmem:[%s8106_s5 + $0x58] sm:$0xff] }
0x1d7a   :  { %v6753_v2 = vpack.c.bf16 %v5970_v41, %v5969_v63 }
0x1d7b   :  { %v3666_v5 = vadd.f32 %v5942_v61, %v3658_v4  ;;  %v5968_v61 = vld [vmem:[%s8106_s5 + $0x48] sm:$0xff] }
0x1d7c   :  { %v6749_v62 = vpack.c.bf16 %v5968_v61, %v5967_v60 }
0x1d7d   :  { %6469 = vmatmul.mubr.msk.f32.vlgmr.msra.gmra.mrb[32].mxu0 %vm171_vm1, %v3666_v5 }
0x1d7e   :  { %6750 = vmatprep.subr.bf16.mxu0 %v6749_v62 }
0x1d7f   :  { %6752 = vmatpush3.bf16.msra.mxu0 %v6749_v62 }
0x1d80   :  { %6754 = vmatprep.subr.bf16.mxu0 %v6753_v2 }
0x1d83   :  { %6756 = vmatpush3.bf16.msra.mxu0 %v6753_v2 }
0x1d84   :  { %6501 = vmatprep.subr.mxu0 %v6970_v20 }
0x1e50   :  { %v6470_v19 = vpop.f32.mrb[32].mxu0 }
0x1e51   :  { %v3758_v21 = vadd.f32 %v6470_v19, %v5948_v18  ;;  %v3752_v22 = vpop.f32.mrb[33].mxu0 }
0x1e52   :  { %v3753_v24 = vadd.f32 %v5948_v18, %v3752_v22 }
0x1e53   :  { %v3764_v26 = vmul.f32 0.044715, %v3758_v21  ;;  %v3762_v37 = vmul.f32 0.5, %v3758_v21 }
0x1e54   :  { %v3763_v27 = vmul.f32 0.044715, %v3753_v24  ;;  %v3761_v35 = vmul.f32 0.5, %v3753_v24 }
0x1e55   :  { %v3766_v0 = vmul.f32 %v3764_v26, %v3758_v21 }
0x1e56   :  { %v3765_v29 = vmul.f32 %v3763_v27, %v3753_v24 }
0x1e57   :  { %v3768_v28 = vmul.f32 %v3766_v0, %v3758_v21 }
0x1e58   :  { %v3767_v1 = vmul.f32 %v3765_v29, %v3753_v24 }
0x1e59   :  { %v3770_v54 = vadd.f32 %v3768_v28, %v3758_v21  ;;  %v5972_v21 = vld [vmem:[%s8107_s6 + $0x2] ss:$0 sm:$0xff]  ;;  %s8168_s6 = smov 80  }
0x1e5a   :  { %v3769_v59 = vadd.f32 %v3767_v1, %v3753_v24 }
0x1e5b   :  { %v3772_v12 = vmul.f32 0.7978846, %v3770_v54 }
0x1e5c   :  { %v3771_v23 = vmul.f32 0.7978846, %v3769_v59 }
0x1e5d   :  { %6897 = vtanh.f32 %v3772_v12 }
0x1e5e   :  { %6899 = vtanh.f32 %v3771_v23 }
0x1e67   :  { %v6898_v32 = vpop.eup %6897 }
0x1e68   :  { %v6900_v33 = vpop.eup %6899  ;;  %v3776_v34 = vadd.f32 1.0, %v6898_v32 }
0x1e69   :  { %v3775_v36 = vadd.f32 1.0, %v6900_v33 }
0x1e6a   :  { %v3778_v38 = vmul.f32 %v3776_v34, %v3762_v37 }
0x1e6b   :  { %v3777_v16 = vmul.f32 %v3775_v36, %v3761_v35 }
0x1e6d   :  { %6487 = vmatprep.mubr.msk.f32.mxu1 %vm87_vm0, %v3777_v16 }
0x1e6e   :  { %6488 = vmatmul.mubr.msk.f32.vlgmr.msra.gmra.mrb[48].mxu1 %vm87_vm0, %v3778_v38 }
0x1e6f   :  { %6513 = vmatprep.mubr.msk.f32.mxu1 %vm6971_vm3, %v6970_v20 }
0x1f41   :  { %v6489_v39 = vpop.f32.mrb[48].mxu1 }
0x1f42   :  { %v3874_v40 = vadd.f32 %v6489_v39, %v5960_v17  ;;  %v3868_v42 = vpop.f32.mrb[49].mxu1 }
0x1f43   :  { %v3869_v44 = vadd.f32 %v5960_v17, %v3868_v42 }
0x1f44   :  { %v7779_v45 = vadd.f32 %v3874_v40, %v7710_v30 }
0x1f45   :  { %v7782_v46 = vadd.f32 %v3869_v44, %v7713_v31 }
0x1f46   :  { %v3886_v47 = vsel %vm175_vm2, %v7779_v45, 0.0 }
0x1f47   :  { %3887 = vadd.xlane.f32.xlu1 %v3886_v47  ;;  %v3883_v49 = vsel %vm171_vm1, %v7782_v46, 0.0 }
0x1f48   :  { %3884 = vadd.xlane.f32.xlu0 %v3883_v49 }
0x1fd4   :  { %v3888_v50 = vpop.xlane.xlu1 %3887 }
0x1fd5   :  { %v3890_v51 = vmul.f32 0.03125, %v3888_v50  ;;  %v3885_v52 = vpop.xlane.xlu0 %3884 }
0x1fd6   :  { %v3889_v53 = vmul.f32 0.03125, %v3885_v52 }
0x1fd7   :  { %v3892_v55 = vsub.f32 %v7779_v45, %v3890_v51 }
0x1fd8   :  { %v3891_v30 = vsub.f32 %v7782_v46, %v3889_v53 }
0x1fd9   :  { %v3894_v56 = vmul.f32 %v3892_v55, %v3892_v55 }
0x1fda   :  { %v3893_v57 = vmul.f32 %v3891_v30, %v3891_v30 }
0x1fdb   :  { %v3898_v31 = vsel %vm175_vm2, %v3894_v56, 0.0 }
0x1fdc   :  { %3899 = vadd.xlane.f32.xlu1 %v3898_v31  ;;  %v3895_v58 = vsel %vm171_vm1, %v3893_v57, 0.0 }
0x1fdd   :  { %3896 = vadd.xlane.f32.xlu0 %v3895_v58 }
0x2069   :  { %v3900_v4 = vpop.xlane.xlu1 %3899 }
0x206a   :  { %v3902_v5 = vmul.f32 0.03125, %v3900_v4  ;;  %v3897_v6 = vpop.xlane.xlu0 %3896 }
0x206b   :  { %v3901_v7 = vmul.f32 0.03125, %v3897_v6 }
0x206c   :  { %v3904_v25 = vadd.f32 1e-06, %v3902_v5 }
0x206d   :  { %v3903_v8 = vadd.f32 1e-06, %v3901_v7 }
0x206e   :  { %6901 = vrsqrt.f32 %v3904_v25 }
0x206f   :  { %6903 = vrsqrt.f32 %v3903_v8 }
0x2078   :  { %v6902_v9 = vpop.eup %6901 }
0x2079   :  { %v6904_v10 = vpop.eup %6903  ;;  %v3908_v43 = vmul.f32 %v6902_v9, %v3892_v55 }
0x207a   :  { %v3907_v11 = vmul.f32 %v6904_v10, %v3891_v30 }
0x207b   :  { %v3916_v14 = vmul.f32 %v5965_v48, %v3908_v43 }
0x207c   :  { %v3915_v15 = vmul.f32 %v5965_v48, %v3907_v11 }
0x207d   :  { %v3924_v19 = vadd.f32 %v5966_v13, %v3916_v14 }
0x207e   :  { %v3923_v18 = vadd.f32 %v5966_v13, %v3915_v15 }
0x2080   :  { %6498 = vmatprep.mubr.msk.f32.mxu0 %vm171_vm1, %v3923_v18 }
0x2081   :  { %6499 = vmatmul.mubr.msk.f32.vlgmr.msra.gmra.mrb[34].mxu0 %vm171_vm1, %v3924_v19 }
0x2082   :  { %6503 = vmatprep.mubr.msk.f32.mxu0 %vm6971_vm3, %v6970_v20 }
0x2154   :  { %v6500_v22 = vpop.f32.mrb[34].mxu0 }
0x2155   :  { %v4010_v24 = vpop.f32.mrb[35].mxu0  ;;  %v4016_v27 = vadd.f32 %v6500_v22, %v5972_v21 }
0x2156   :  { %v7818_v26 = vadd.f32 %v5972_v21, %v4010_v24 }
0x2157   :  { %v4699_v0 = vrot.slane %v4016_v27, 5 }
0x2158   :  { %4186 = vrot.lane.b32.xlu1 %v7818_v26, %s8164_s4  ;;  %4020 = vrot.lane.b32.xlu0 %v7818_v26, %s8165_s29  ;;  %v4698_v29 = vrot.slane %v7818_v26, 5 }
0x215a   :  { %v7834_v28 = vsel %vm993_vm8, %v4698_v29, %v4699_v0 }
0x215c   :  { %4184 = vrot.lane.b32.xlu1 %v7818_v26, %s8166_s19  ;;  %4350 = vrot.lane.b32.xlu0 %v7818_v26, %s8167_s21 }
0x2160   :  { %4352 = vrot.lane.b32.xlu1 %v7818_v26, %s8168_s6  ;;  %4516 = vrot.lane.b32.xlu0 %v7818_v26, %s8169_s28 }
0x2164   :  { %4518 = vrot.lane.b32.xlu1 %v7818_v26, %s8156_s22  ;;  %4867 = vrot.lane.b32.xlu0 %v7834_v28, %s8164_s4 }
0x2168   :  { %5033 = vrot.lane.b32.xlu0 %v7834_v28, %s8168_s6  ;;  %4701 = vrot.lane.b32.xlu1 %v7834_v28, %s8165_s29 }
0x216c   :  { %5199 = vrot.lane.b32.xlu0 %v7834_v28, %s8156_s22  ;;  %4865 = vrot.lane.b32.xlu1 %v7834_v28, %s8166_s19 }
0x2170   :  { %5031 = vrot.lane.b32.xlu1 %v7834_v28, %s8167_s21 }
0x2174   :  { %5197 = vrot.lane.b32.xlu1 %v7834_v28, %s8169_s28 }
0x21ca   :  { %v4187_v1 = vpop.permute.xlu1 %4186  ;;  %v4021_v54 = vpop.permute.xlu0 %4020 }
0x21cb   :  { %6502 = vmatpush3.xpose.msk.msra.mxu0 %vm311_vm4, %v4021_v54  ;;  %6512 = vmatpush3.xpose.msk.msra.mxu1 %vm311_vm4, %v4187_v1 }
0x21cc   :  { %6521 = vmatprep.subr.mxu1 %v6970_v20  ;;  %6506 = vmatprep.subr.mxu0 %v6970_v20 }
0x21ce   :  { %v4185_v59 = vpop.permute.xlu1 %4184  ;;  %6504 = vmatmul.mubr.msk.f32.vlgmr.msra.gmra.mrb[36].mxu0 %vm311_vm4, %v7818_v26  ;;  %v4351_v12 = vpop.permute.xlu0 %4350 }
0x21cf   :  { %6514 = vmatmul.mubr.msk.f32.vlgmr.msra.gmra.mrb[50].mxu1 %vm311_vm4, %v4185_v59  ;;  %6508 = vmatprep.mubr.msk.f32.mxu0 %vm6971_vm3, %v6970_v20 }
0x21d0   :  { %6523 = vmatprep.mubr.msk.f32.mxu1 %vm6971_vm3, %v6970_v20 }
0x21d2   :  { %v4353_v23 = vpop.permute.xlu1 %4352  ;;  %v4517_v32 = vpop.permute.xlu0 %4516 }
0x21d3   :  { %6522 = vmatpush3.xpose.msk.msra.mxu1 %vm311_vm4, %v4353_v23 }
0x21d4   :  { %6531 = vmatprep.subr.mxu1 %v6970_v20 }
0x21d6   :  { %v4519_v33 = vpop.permute.xlu1 %4518  ;;  %6524 = vmatmul.mubr.msk.f32.vlgmr.msra.gmra.mrb[52].mxu1 %vm311_vm4, %v4351_v12  ;;  %v4868_v34 = vpop.permute.xlu0 %4867 }
0x21d7   :  { %6532 = vmatpush3.xpose.msk.msra.mxu1 %vm311_vm4, %v4519_v33  ;;  %6533 = vmatprep.mubr.msk.f32.mxu1 %vm6971_vm3, %v6970_v20 }
0x21d8   :  { %6541 = vmatprep.subr.mxu1 %v6970_v20 }
0x21da   :  { %6534 = vmatmul.mubr.msk.f32.vlgmr.msra.gmra.mrb[54].mxu1 %vm311_vm4, %v4517_v32  ;;  %v4702_v35 = vpop.permute.xlu1 %4701  ;;  %v5034_v37 = vpop.permute.xlu0 %5033 }
0x21db   :  { %6542 = vmatpush3.xpose.msk.msra.mxu1 %vm311_vm4, %v4702_v35  ;;  %6543 = vmatprep.mubr.msk.f32.mxu1 %vm6971_vm3, %v6970_v20 }
0x21dc   :  { %6551 = vmatprep.subr.mxu1 %v6970_v20 }
0x21de   :  { %6544 = vmatmul.mubr.msk.f32.vlgmr.msra.gmra.mrb[56].mxu1 %vm311_vm4, %v7834_v28  ;;  %v4866_v36 = vpop.permute.xlu1 %4865  ;;  %v5200_v38 = vpop.permute.xlu0 %5199 }
0x21df   :  { %6552 = vmatpush3.xpose.msk.msra.mxu1 %vm311_vm4, %v4868_v34  ;;  %6553 = vmatprep.mubr.msk.f32.mxu1 %vm6971_vm3, %v6970_v20 }
0x21e0   :  { %6561 = vmatprep.subr.mxu1 %v6970_v20 }
0x21e2   :  { %6554 = vmatmul.mubr.msk.f32.vlgmr.msra.gmra.mrb[58].mxu1 %vm311_vm4, %v4866_v36  ;;  %v5032_v16 = vpop.permute.xlu1 %5031 }
0x21e3   :  { %6562 = vmatpush3.xpose.msk.msra.mxu1 %vm311_vm4, %v5034_v37  ;;  %6563 = vmatprep.mubr.msk.f32.mxu1 %vm6971_vm3, %v6970_v20 }
0x21e4   :  { %6571 = vmatprep.subr.mxu1 %v6970_v20 }
0x21e6   :  { %6564 = vmatmul.mubr.msk.f32.vlgmr.msra.gmra.mrb[60].mxu1 %vm311_vm4, %v5032_v16  ;;  %v5198_v17 = vpop.permute.xlu1 %5197 }
0x21e7   :  { %6572 = vmatpush3.xpose.msk.msra.mxu1 %vm311_vm4, %v5200_v38  ;;  %6573 = vmatprep.mubr.msk.f32.mxu1 %vm6971_vm3, %v6970_v20 }
0x21ea   :  { %6574 = vmatmul.mubr.msk.f32.vlgmr.msra.gmra.mrb[62].mxu1 %vm311_vm4, %v5198_v17 }
0x22a1   :  { %v4092_v39 = vpop.f32.mrb[36].mxu0 }
0x22a2   :  { %v6505_v40 = vpop.f32.mrb[37].mxu0  ;;  %v4258_v42 = vpop.f32.mrb[50].mxu1  ;;  %v4096_v44 = vsel %vm386_vm5, %v4092_v39, -inf }
0x22a3   :  { %v6515_v47 = vpop.f32.mrb[51].mxu1  ;;  %4097 = vmax.xlane.f32.xlu0 %v4096_v44  ;;  %v4262_v49 = vsel %vm386_vm5, %v4258_v42, -inf }
0x22a4   :  { %4263 = vmax.xlane.f32.xlu1 %v4262_v49 }
0x22a9   :  { %v4424_v50 = vpop.f32.mrb[52].mxu1 }
0x22aa   :  { %v6525_v51 = vpop.f32.mrb[53].mxu1  ;;  %v4428_v52 = vsel %vm386_vm5, %v4424_v50, -inf }
0x22ab   :  { %4429 = vmax.xlane.f32.xlu0 %v4428_v52 }
0x22ad   :  { %v4590_v53 = vpop.f32.mrb[54].mxu1 }
0x22ae   :  { %v6535_v55 = vpop.f32.mrb[55].mxu1  ;;  %v4594_v30 = vsel %vm386_vm5, %v4590_v53, -inf }
0x22af   :  { %4595 = vmax.xlane.f32.xlu0 %v4594_v30 }
0x22b1   :  { %v4773_v56 = vpop.f32.mrb[56].mxu1 }
0x22b2   :  { %v6545_v57 = vpop.f32.mrb[57].mxu1  ;;  %v4777_v31 = vsel %vm386_vm5, %v4773_v56, -inf }
0x22b3   :  { %4778 = vmax.xlane.f32.xlu0 %v4777_v31 }
0x22b5   :  { %v4939_v58 = vpop.f32.mrb[58].mxu1 }
0x22b6   :  { %v6555_v60 = vpop.f32.mrb[59].mxu1  ;;  %v4943_v61 = vsel %vm386_vm5, %v4939_v58, -inf }
0x22b7   :  { %4944 = vmax.xlane.f32.xlu1 %v4943_v61 }
0x22b9   :  { %v5105_v62 = vpop.f32.mrb[60].mxu1 }
0x22ba   :  { %v6565_v63 = vpop.f32.mrb[61].mxu1  ;;  %v5109_v41 = vsel %vm386_vm5, %v5105_v62, -inf }
0x22bb   :  { %5110 = vmax.xlane.f32.xlu0 %v5109_v41 }
0x22bd   :  { %v5271_v2 = vpop.f32.mrb[62].mxu1 }
0x22be   :  { %v6575_v4 = vpop.f32.mrb[63].mxu1  ;;  %v5275_v5 = vsel %vm386_vm5, %v5271_v2, -inf }
0x22c8   :  { %4107 = vrot.lane.b32.xlu1 %v7818_v26, %s8157_s23 }
0x22ec   :  { %5276 = vmax.xlane.f32.xlu1 %v5275_v5 }
0x22fd   :  { %4439 = vrot.lane.b32.xlu1 %v7818_v26, %s8158_s24 }
0x2301   :  { %4605 = vrot.lane.b32.xlu1 %v7818_v26, %s8159_s25 }
0x2305   :  { %4788 = vrot.lane.b32.xlu1 %v7834_v28, %s8157_s23 }
0x2330   :  { %v4098_v6 = vpop.xlane.xlu0 %4097 }
0x2331   :  { %v4099_v7 = vsub.f32 %v4092_v39, %v4098_v6  ;;  %v4264_v25 = vpop.xlane.xlu1 %4263 }
0x2332   :  { %v4265_v8 = vsub.f32 %v4258_v42, %v4264_v25 }
0x2333   :  { %v4100_v9 = vmul.f32 1.442695, %v4099_v7 }
0x2334   :  { %v4266_v48 = vmul.f32 1.442695, %v4265_v8 }
0x2335   :  { %6905 = vpow2.f32 %v4100_v9 }
0x2336   :  { %6907 = vpow2.f32 %v4266_v48 }
0x2338   :  { %v4430_v10 = vpop.xlane.xlu0 %4429 }
0x2339   :  { %v4431_v0 = vsub.f32 %v4424_v50, %v4430_v10 }
0x233b   :  { %v4432_v1 = vmul.f32 1.442695, %v4431_v0 }
0x233c   :  { %v4596_v43 = vpop.xlane.xlu0 %4595 }
0x233d   :  { %v4597_v11 = vsub.f32 %v4590_v53, %v4596_v43 }
0x233f   :  { %v6906_v13 = vpop.eup %6905  ;;  %v4598_v14 = vmul.f32 1.442695, %v4597_v11 }
0x2340   :  { %v7907_v15 = vpop.eup %6907  ;;  %v4102_v18 = vsel %vm386_vm5, %v6906_v13, 0.0  ;;  %v4779_v29 = vpop.xlane.xlu0 %4778 }
0x2341   :  { %6909 = vpow2.f32 %v4598_v14  ;;  %4103 = vadd.xlane.f32.xlu0 %v4102_v18  ;;  %v4268_v19 = vsel %vm386_vm5, %v7907_v15, 0.0  ;;  %v4780_v54 = vsub.f32 %v4773_v56, %v4779_v29  ;;  %v6007_v29 = vld [vmem:[%s8108_s7 + $0x40] sm:$0xff] }
0x2342   :  { %4269 = vadd.xlane.f32.xlu1 %v4268_v19  ;;  %6911 = vpow2.f32 %v4432_v1  ;;  %v6008_v1 = vld [vmem:[%s8108_s7 + $0x48] sm:$0xff] }
0x2343   :  { %v4781_v12 = vmul.f32 1.442695, %v4780_v54 }
0x2344   :  { %v4945_v21 = vpop.xlane.xlu1 %4944 }
0x2345   :  { %6913 = vpow2.f32 %v4781_v12  ;;  %v4946_v32 = vsub.f32 %v4939_v58, %v4945_v21 }
0x2347   :  { %v4947_v34 = vmul.f32 1.442695, %v4946_v32  ;;  %v6009_v32 = vld [vmem:[%s8108_s7 + $0x50] sm:$0xff] }
0x2348   :  { %v4108_v22 = vpop.permute.xlu1 %4107  ;;  %v5111_v59 = vpop.xlane.xlu0 %5110 }
0x2349   :  { %6507 = vmatpush3.msk.msra.mxu0 %vm404_vm6, %v4108_v22  ;;  %v5112_v23 = vsub.f32 %v5105_v62, %v5111_v59  ;;  %v6757_v59 = vpack.c.bf16 %v6008_v1, %v6007_v29  ;;  %v6018_v1 = vld [vmem:[%s8111_s10 + $0x2] ss:$0 sm:$0xff] }
0x234a   :  { %6516 = vmatprep.subr.mxu0 %v6970_v20 }
0x234b   :  { %v7914_v24 = vpop.eup %6909  ;;  %v5113_v33 = vmul.f32 1.442695, %v5112_v23  ;;  %6758 = vmatprep.subr.bf16.mxu1 %v6757_v59 }
0x234c   :  { %v4600_v27 = vsel %vm386_vm5, %v7914_v24, 0.0  ;;  %v6912_v35 = vpop.eup %6911  ;;  %6760 = vmatpush3.bf16.msra.mxu1 %v6757_v59 }
0x234d   :  { %4601 = vadd.xlane.f32.xlu1 %v4600_v27  ;;  %6915 = vpow2.f32 %v5113_v33  ;;  %v6010_v33 = vld [vmem:[%s8108_s7 + $0x58] sm:$0xff] }
0x234e   :  { %6917 = vpow2.f32 %v4947_v34  ;;  %v6761_v34 = vpack.c.bf16 %v6010_v33, %v6009_v32 }
0x234f   :  { %v6914_v36 = vpop.eup %6913 }
0x2350   :  { %v4783_v16 = vsel %vm386_vm5, %v6914_v36, 0.0  ;;  %6762 = vmatprep.subr.bf16.mxu1 %v6761_v34 }
0x2351   :  { %6764 = vmatpush3.bf16.msra.mxu1 %v6761_v34  ;;  %v6027_v34 = vld [vmem:[%s8114_s13 + $0x80] sm:$0xff] }
0x2357   :  { %4273 = vrot.lane.b32.xlu0 %v7818_v26, %s8160_s18  ;;  %v4434_v26 = vsel %vm386_vm5, %v6912_v35, 0.0  ;;  %v7924_v38 = vpop.eup %6915 }
0x2358   :  { %v5115_v40 = vsel %vm386_vm5, %v7924_v38, 0.0  ;;  %v6918_v42 = vpop.eup %6917 }
0x2359   :  { %v4949_v44 = vsel %vm386_vm5, %v6918_v42, 0.0 }
0x235e   :  { %4954 = vrot.lane.b32.xlu1 %v7834_v28, %s8160_s18 }
0x2376   :  { %4435 = vadd.xlane.f32.xlu0 %v4434_v26 }
0x2379   :  { %v5277_v37 = vpop.xlane.xlu1 %5276 }
0x237a   :  { %v5278_v17 = vsub.f32 %v5271_v2, %v5277_v37  ;;  %4784 = vadd.xlane.f32.xlu0 %v4783_v16 }
0x237c   :  { %v5279_v39 = vmul.f32 1.442695, %v5278_v17 }
0x237d   :  { %v4440_v50 = vpop.permute.xlu1 %4439 }
0x237e   :  { %6919 = vpow2.f32 %v5279_v39  ;;  %5116 = vadd.xlane.f32.xlu0 %v5115_v40 }
0x2381   :  { %v4606_v51 = vpop.permute.xlu1 %4605 }
0x2382   :  { %4950 = vadd.xlane.f32.xlu1 %v4949_v44 }
0x2385   :  { %v4789_v52 = vpop.permute.xlu1 %4788 }
0x2388   :  { %v7929_v47 = vpop.eup %6919 }
0x2389   :  { %v5281_v49 = vsel %vm386_vm5, %v7929_v47, 0.0 }
0x238a   :  { %5282 = vadd.xlane.f32.xlu0 %v5281_v49 }
0x2393   :  { %5286 = vrot.lane.b32.xlu1 %v7834_v28, %s8159_s25 }
0x23a0   :  { %5120 = vrot.lane.b32.xlu0 %v7834_v28, %s8158_s24 }
0x23ce   :  { %v4104_v53 = vpop.xlane.xlu0 %4103 }
0x23cf   :  { %6921 = vrcp.f32 %v4104_v53  ;;  %v4270_v55 = vpop.xlane.xlu1 %4269 }
0x23d0   :  { %6923 = vrcp.f32 %v4270_v55 }
0x23d2   :  { %v4274_v31 = vpop.permute.xlu0 %4273 }
0x23d9   :  { %v6922_v30 = vpop.eup %6921 }
0x23da   :  { %v4106_v56 = vmul.f32 %v6922_v30, %v6906_v13  ;;  %v6924_v57 = vpop.eup %6923  ;;  %v4602_v58 = vpop.xlane.xlu1 %4601 }
0x23db   :  { %v4272_v28 = vmul.f32 %v6924_v57, %v7907_v15  ;;  %v6012_v57 = vld [vmem:[%s8109_s8 + $0x2] ss:$0 sm:$0xff] }
0x23dc   :  { %6509 = vmatmul.mubr.msk.f32.vlgmr.msra.gmra.mrb[38].mxu0 %vm400_vm7, %v4106_v56 }
0x23dd   :  { %6517 = vmatpush3.msk.msra.mxu0 %vm404_vm6, %v4274_v31  ;;  %6518 = vmatprep.mubr.msk.f32.mxu0 %vm6971_vm3, %v6970_v20 }
0x23de   :  { %6526 = vmatprep.subr.mxu0 %v6970_v20  ;;  %v4955_v62 = vpop.permute.xlu1 %4954 }
0x23e0   :  { %6519 = vmatmul.mubr.msk.f32.vlgmr.msra.gmra.mrb[40].mxu0 %vm400_vm7, %v4272_v28 }
0x23e1   :  { %6527 = vmatpush3.msk.msra.mxu0 %vm404_vm6, %v4440_v50  ;;  %6528 = vmatprep.mubr.msk.f32.mxu0 %vm6971_vm3, %v6970_v20 }
0x23e2   :  { %6536 = vmatprep.subr.mxu0 %v6970_v20 }
0x2403   :  { %v4436_v60 = vpop.xlane.xlu0 %4435 }
0x2404   :  { %6925 = vrcp.f32 %v4436_v60 }
0x2405   :  { %6927 = vrcp.f32 %v4602_v58 }
0x2407   :  { %v4785_v61 = vpop.xlane.xlu0 %4784 }
0x2408   :  { %6929 = vrcp.f32 %v4785_v61 }
0x240b   :  { %v5117_v2 = vpop.xlane.xlu0 %5116 }
0x240e   :  { %v6926_v63 = vpop.eup %6925 }
0x240f   :  { %v4438_v41 = vmul.f32 %v6926_v63, %v6912_v35  ;;  %v4951_v4 = vpop.xlane.xlu1 %4950  ;;  %v6928_v5 = vpop.eup %6927 }
0x2410   :  { %6931 = vrcp.f32 %v4951_v4  ;;  %v4604_v6 = vmul.f32 %v6928_v5, %v7914_v24 }
0x2411   :  { %6529 = vmatmul.mubr.msk.f32.vlgmr.msra.gmra.mrb[42].mxu0 %vm400_vm7, %v4438_v41  ;;  %6933 = vrcp.f32 %v5117_v2 }
0x2412   :  { %6537 = vmatpush3.msk.msra.mxu0 %vm404_vm6, %v4606_v51  ;;  %6538 = vmatprep.mubr.msk.f32.mxu0 %vm6971_vm3, %v6970_v20  ;;  %v6930_v7 = vpop.eup %6929 }
0x2413   :  { %6546 = vmatprep.subr.mxu0 %v6970_v20  ;;  %v4787_v25 = vmul.f32 %v6930_v7, %v6914_v36  ;;  %v5287_v13 = vpop.permute.xlu1 %5286 }
0x2415   :  { %6539 = vmatmul.mubr.msk.f32.vlgmr.msra.gmra.mrb[44].mxu0 %vm400_vm7, %v4604_v6 }
0x2416   :  { %6547 = vmatpush3.msk.msra.mxu0 %vm404_vm6, %v4789_v52  ;;  %6548 = vmatprep.mubr.msk.f32.mxu0 %vm6971_vm3, %v6970_v20 }
0x2417   :  { %v5283_v8 = vpop.xlane.xlu0 %5282  ;;  %6556 = vmatprep.subr.mxu0 %v6970_v20 }
0x2418   :  { %6935 = vrcp.f32 %v5283_v8 }
0x2419   :  { %6549 = vmatmul.mubr.msk.f32.vlgmr.msra.gmra.mrb[46].mxu0 %vm400_vm7, %v4787_v25 }
0x241a   :  { %v6932_v9 = vpop.eup %6931  ;;  %6557 = vmatpush3.msk.msra.mxu0 %vm404_vm6, %v4955_v62  ;;  %6558 = vmatprep.mubr.msk.f32.mxu0 %vm6971_vm3, %v6970_v20 }
0x241b   :  { %v4953_v48 = vmul.f32 %v6932_v9, %v6918_v42  ;;  %v5121_v10 = vpop.permute.xlu0 %5120  ;;  %6566 = vmatprep.subr.mxu0 %v6970_v20  ;;  %v6934_v43 = vpop.eup %6933 }
0x241c   :  { %v5119_v11 = vmul.f32 %v6934_v43, %v7924_v38 }
0x241d   :  { %6559 = vmatmul.mubr.msk.f32.vlgmr.msra.gmra.mrb[48].mxu0 %vm400_vm7, %v4953_v48  ;;  %v6019_v48 = vld [vmem:[%s8112_s11 + $0x40] sm:$0xff] }
0x241e   :  { %6567 = vmatpush3.msk.msra.mxu0 %vm404_vm6, %v5121_v10  ;;  %6568 = vmatprep.mubr.msk.f32.mxu0 %vm6971_vm3, %v6970_v20  ;;  %v6020_v10 = vld [vmem:[%s8112_s11 + $0x48] sm:$0xff] }
0x241f   :  { %6576 = vmatprep.subr.mxu0 %v6970_v20  ;;  %v6765_v43 = vpack.c.bf16 %v6020_v10, %v6019_v48  ;;  %v6036_v10 = vld [vmem:[%s8115_s14 + $0x2] ss:$0 sm:$0xff] }
0x2421   :  { %6569 = vmatmul.mubr.msk.f32.vlgmr.msra.gmra.mrb[50].mxu0 %vm400_vm7, %v5119_v11  ;;  %v6021_v11 = vld [vmem:[%s8112_s11 + $0x50] sm:$0xff] }
0x2422   :  { %v6936_v14 = vpop.eup %6935  ;;  %6577 = vmatpush3.msk.msra.mxu0 %vm404_vm6, %v5287_v13  ;;  %6578 = vmatprep.mubr.msk.f32.mxu0 %vm6971_vm3, %v6970_v20  ;;  %v6022_v13 = vld [vmem:[%s8112_s11 + $0x58] sm:$0xff] }
0x2423   :  { %v5285_v15 = vmul.f32 %v6936_v14, %v7929_v47  ;;  %6766 = vmatprep.subr.bf16.mxu0 %v6765_v43  ;;  %v6769_v14 = vpack.c.bf16 %v6022_v13, %v6021_v11 }
0x2425   :  { %6579 = vmatmul.mubr.msk.f32.vlgmr.msra.gmra.mrb[52].mxu0 %vm400_vm7, %v5285_v15 }
0x2426   :  { %6768 = vmatpush3.bf16.msra.mxu0 %v6765_v43 }
0x2427   :  { %6770 = vmatprep.subr.bf16.mxu0 %v6769_v14 }
0x242a   :  { %6772 = vmatpush3.bf16.msra.mxu0 %v6769_v14 }
0x242b   :  { %6789 = vmatprep.subr.bf16.mxu0 %v6969_v3 }
0x24af   :  { %v4180_v18 = vpop.f32.mrb[38].mxu0 }
0x24b0   :  { %v6510_v19 = vpop.f32.mrb[39].mxu0 }
0x24b3   :  { %v4346_v21 = vpop.f32.mrb[40].mxu0 }
0x24b4   :  { %4683 = vrot.lane.b32.xlu0 %v4346_v21, %s8161_s27  ;;  %v6520_v22 = vpop.f32.mrb[41].mxu0 }
0x24e4   :  { %v4512_v24 = vpop.f32.mrb[42].mxu0 }
0x24e5   :  { %v6530_v27 = vpop.f32.mrb[43].mxu0 }
0x24e8   :  { %v4678_v0 = vpop.f32.mrb[44].mxu0 }
0x24e9   :  { %v6540_v54 = vpop.f32.mrb[45].mxu0 }
0x24ec   :  { %v4861_v12 = vpop.f32.mrb[46].mxu0 }
0x24ed   :  { %v6550_v23 = vpop.f32.mrb[47].mxu0 }
0x24f0   :  { %v5027_v35 = vpop.f32.mrb[48].mxu0 }
0x24f1   :  { %5364 = vrot.lane.b32.xlu0 %v5027_v35, %s8161_s27  ;;  %v6560_v26 = vpop.f32.mrb[49].mxu0  ;;  %v6028_v35 = vld [vmem:[%s8114_s13 + $0x88] sm:$0xff] }
0x24f2   :  { %v6773_v26 = vpack.c.bf16 %v6028_v35, %v6027_v34 }
0x24f4   :  { %v5193_v36 = vpop.f32.mrb[50].mxu0  ;;  %6774 = vmatprep.subr.bf16.mxu1 %v6773_v26 }
0x24f5   :  { %4687 = vrot.lane.b32.xlu0 %v4512_v24, %s8162_s26  ;;  %5368 = vrot.lane.b32.xlu1 %v5193_v36, %s8162_s26  ;;  %v6570_v37 = vpop.f32.mrb[51].mxu0  ;;  %v6029_v36 = vld [vmem:[%s8114_s13 + $0x90] sm:$0xff] }
0x24f6   :  { %v6030_v37 = vld [vmem:[%s8114_s13 + $0x98] sm:$0xff] }
0x24f8   :  { %v5359_v16 = vpop.f32.mrb[52].mxu0 }
0x24f9   :  { %5372 = vrot.lane.b32.xlu1 %v5359_v16, %s8163_s1  ;;  %v6580_v38 = vpop.f32.mrb[53].mxu0  ;;  %v6777_v16 = vpack.c.bf16 %v6030_v37, %v6029_v36 }
0x24fa   :  { %v6032_v38 = vld [vmem:[%s8114_s13 + $0xa8] sm:$0xff] }
0x24fd   :  { %4691 = vrot.lane.b32.xlu1 %v4678_v0, %s8163_s1  ;;  %v6017_v0 = vld [vmem:[%s8110_s9 + $0x2] ss:$0 sm:$0xff]  ;;  %s8170_s9 = sld [smem:[#allocation7_spill]] }
0x2526   :  { %v4684_v17 = vpop.permute.xlu0 %4683 }
0x2527   :  { %v4694_v51 = vsel %vm311_vm4, %v4180_v18, %v4684_v17 }
0x2563   :  { %v5365_v39 = vpop.permute.xlu0 %5364 }
0x2564   :  { %v5375_v42 = vsel %vm311_vm4, %v4861_v12, %v5365_v39  ;;  %v6033_v39 = vld [vmem:[%s8114_s13 + $0xb0] sm:$0xff] }
0x2567   :  { %v5369_v40 = vpop.permute.xlu1 %5368  ;;  %v4688_v49 = vpop.permute.xlu0 %4687 }
0x2568   :  { %v5376_v44 = vsel %vm988_vm10, %v5375_v42, %v5369_v40  ;;  %v4695_v52 = vsel %vm988_vm10, %v4694_v51, %v4688_v49  ;;  %v6034_v40 = vld [vmem:[%s8114_s13 + $0xb8] sm:$0xff] }
0x2569   :  { %v6785_v42 = vpack.c.bf16 %v6034_v40, %v6033_v39 }
0x256b   :  { %v5373_v47 = vpop.permute.xlu1 %5372 }
0x256c   :  { %v5377_v50 = vsel %vm990_vm9, %v5376_v44, %v5373_v47  ;;  %v6024_v44 = vld [vmem:[%s8113_s12 + $0x2] ss:$0 sm:$0xff] }
0x256d   :  { %v5379_v53 = vrot.slane %v5377_v50, 3 }
0x256f   :  { %v4692_v55 = vpop.permute.xlu1 %4691 }
0x2570   :  { %v4696_v30 = vsel %vm990_vm9, %v4695_v52, %v4692_v55 }
0x2571   :  { %v5381_v56 = vsel %vm404_vm6, %v4696_v30, %v5379_v53 }
0x2572   :  { %6589 = vmatprep.mubr.msk.f32.mxu1 %vm171_vm1, %v5381_v56 }
0x2573   :  { %6590 = vmatmul.mubr.msk.f32.vlgmr.msra.gmra.mrb[64].mxu1 %vm171_vm1, %v5379_v53 }
0x2574   :  { %6776 = vmatpush3.bf16.msra.mxu1 %v6773_v26 }
0x2575   :  { %6778 = vmatprep.subr.bf16.mxu1 %v6777_v16 }
0x2578   :  { %6780 = vmatpush3.bf16.msra.mxu1 %v6777_v16 }
0x2646   :  { %v6591_v31 = vpop.f32.mrb[64].mxu1 }
0x2647   :  { %v5472_v28 = vadd.f32 %v6591_v31, %v6012_v57  ;;  %v5466_v58 = vpop.f32.mrb[65].mxu1 }
0x2648   :  { %v5467_v60 = vadd.f32 %v6012_v57, %v5466_v58 }
0x2649   :  { %v5476_v61 = vadd.f32 %v5472_v28, %v7779_v45 }
0x264a   :  { %v8008_v62 = vadd.f32 %v5467_v60, %v7782_v46 }
0x264b   :  { %v5484_v63 = vsel %vm175_vm2, %v5476_v61, 0.0 }
0x264c   :  { %5485 = vadd.xlane.f32.xlu1 %v5484_v63  ;;  %v5481_v41 = vsel %vm171_vm1, %v8008_v62, 0.0 }
0x264d   :  { %5482 = vadd.xlane.f32.xlu0 %v5481_v41 }
0x26d9   :  { %v5486_v2 = vpop.xlane.xlu1 %5485 }
0x26da   :  { %v5488_v4 = vmul.f32 0.03125, %v5486_v2  ;;  %v5483_v5 = vpop.xlane.xlu0 %5482 }
0x26db   :  { %v5487_v6 = vmul.f32 0.03125, %v5483_v5 }
0x26dc   :  { %v5490_v7 = vsub.f32 %v5476_v61, %v5488_v4 }
0x26dd   :  { %v5489_v25 = vsub.f32 %v8008_v62, %v5487_v6 }
0x26de   :  { %v5492_v9 = vmul.f32 %v5490_v7, %v5490_v7 }
0x26df   :  { %v5491_v8 = vmul.f32 %v5489_v25, %v5489_v25 }
0x26e0   :  { %v5496_v46 = vsel %vm175_vm2, %v5492_v9, 0.0  ;;  %v5740_v9 = vld [vmem:[%s8116_s15 + $0x10] sm:$0xff] }
0x26e1   :  { %v5493_v45 = vsel %vm171_vm1, %v5491_v8, 0.0  ;;  %v5739_v8 = vld [vmem:[%s8116_s15 + $0x8] sm:$0xff] }
0x26e2   :  { %5494 = vadd.xlane.f32.xlu0 %v5493_v45 }
0x26e6   :  { %5497 = vadd.xlane.f32.xlu0 %v5496_v46  ;;  %v5741_v46 = vld [vmem:[%s8116_s15 + $0x18] sm:$0xff] }
0x26e7   :  { %v6793_v48 = vpack.c.bf16 %v5741_v46, %v5740_v9 }
0x276f   :  { %v5495_v15 = vpop.xlane.xlu0 %5494 }
0x2770   :  { %v5499_v18 = vmul.f32 0.03125, %v5495_v15 }
0x2772   :  { %v5501_v19 = vadd.f32 1e-06, %v5499_v18  ;;  %v6039_v18 = vld [vmem:[%s8170_s9] ss:$0 sm:$0xff] }
0x2773   :  { %v5498_v21 = vpop.xlane.xlu0 %5497 }
0x2774   :  { %6937 = vrsqrt.f32 %v5501_v19  ;;  %v5500_v22 = vmul.f32 0.03125, %v5498_v21 }
0x2776   :  { %v5502_v24 = vadd.f32 1e-06, %v5500_v22 }
0x2778   :  { %6939 = vrsqrt.f32 %v5502_v24 }
0x277e   :  { %v6938_v27 = vpop.eup %6937 }
0x277f   :  { %v5505_v29 = vmul.f32 %v6938_v27, %v5489_v25  ;;  %v5738_v25 = vld [vmem:[%s8116_s15] sm:$0xff]  ;;  %s6986_s15 = smov [#allocation2]  }
0x2780   :  { %v6790_v45 = vpack.c.bf16 %v5739_v8, %v5738_v25  ;;  %s5829_s6 = sshll.u32 %s6986_s15, 4  ;;  %s5830_s6 = int_to_ptr.vmem [resolvable:$true] %s5829_s6 }
0x2781   :  { %v5513_v54 = vmul.f32 %v6017_v0, %v5505_v29  ;;  %s6945_s14 = scalar_lea.vmem %s5830_s6, 32  ;;  %p6950_p1 = scmp.lt.s32.totalorder %s5830_s6, %s5830_s6 }
0x2782   :  { %v6940_v59 = vpop.eup %6939  ;;  %p6946_p0 = scmp.ne.s32.totalorder %s5830_s6, %s6945_s14  ;;  %p6951_p2 = scmp.lt.s32.totalorder %s6945_s14, %s6945_s14 }
0x2783   :  { %v5506_v12 = vmul.f32 %v6940_v59, %v5490_v7  ;;  %v5521_v23 = vadd.f32 %v6018_v1, %v5513_v54 }
0x2784   :  { %p6952_p3 = por %p6951_p2, %p6950_p1 }
0x2785   :  { %v5514_v32 = vmul.f32 %v6017_v0, %v5506_v12  ;;  %6600 = vmatprep.mubr.msk.f32.mxu0 %vm171_vm1, %v5521_v23 }
0x2786   :  { %p6953_p4 = pnand %p6952_p3, %p6946_p0 }
0x2787   :  { %v5522_v33 = vadd.f32 %v6018_v1, %v5514_v32 }
0x2789   :  { %6601 = vmatmul.mubr.msk.f32.vlgmr.msra.gmra.mrb[54].mxu0 %vm171_vm1, %v5522_v33 }
0x278a   :  { %6630 = vmatprep.mubr.msk.f32.mxu0 %vm6971_vm3, %v6970_v20  ;;  %v6031_v20 = vld [vmem:[%s8114_s13 + $0xa0] sm:$0xff]  ;;  %6791 = vmatpush3.bf16.msra.mxu0 %v6790_v45 }
0x278b   :  { %v6781_v17 = vpack.c.bf16 %v6032_v38, %v6031_v20  ;;  %6792 = vmatprep.subr.bf16.mxu0 %v6969_v3 }
0x278d   :  { %6782 = vmatprep.subr.bf16.mxu1 %v6781_v17 }
0x278e   :  { %6784 = vmatpush3.bf16.msra.mxu1 %v6781_v17  ;;  %6794 = vmatpush3.bf16.msra.mxu0 %v6793_v48 }
0x278f   :  { %6786 = vmatprep.subr.bf16.mxu1 %v6785_v42 }
0x2792   :  { %6788 = vmatpush3.bf16.msra.mxu1 %v6785_v42 }
0x285c   :  { %v6602_v47 = vpop.f32.mrb[54].mxu0 }
0x285d   :  { %v5614_v49 = vadd.f32 %v6602_v47, %v6024_v44  ;;  %v5608_v50 = vpop.f32.mrb[55].mxu0 }
0x285e   :  { %v5609_v51 = vadd.f32 %v6024_v44, %v5608_v50 }
0x285f   :  { %v5620_v52 = vmul.f32 0.044715, %v5614_v49  ;;  %v5618_v5 = vmul.f32 0.5, %v5614_v49 }
0x2860   :  { %v5619_v53 = vmul.f32 0.044715, %v5609_v51  ;;  %v5617_v2 = vmul.f32 0.5, %v5609_v51 }
0x2861   :  { %v5622_v55 = vmul.f32 %v5620_v52, %v5614_v49 }
0x2862   :  { %v5621_v30 = vmul.f32 %v5619_v53, %v5609_v51 }
0x2863   :  { %v5624_v56 = vmul.f32 %v5622_v55, %v5614_v49 }
0x2864   :  { %v5623_v57 = vmul.f32 %v5621_v30, %v5609_v51 }
0x2865   :  { %v5626_v31 = vadd.f32 %v5624_v56, %v5614_v49 }
0x2866   :  { %v5625_v28 = vadd.f32 %v5623_v57, %v5609_v51 }
0x2867   :  { %v5628_v58 = vmul.f32 0.7978846, %v5626_v31 }
0x2868   :  { %v5627_v60 = vmul.f32 0.7978846, %v5625_v28 }
0x2869   :  { %6941 = vtanh.f32 %v5628_v58 }
0x286a   :  { %6943 = vtanh.f32 %v5627_v60 }
0x2873   :  { %v6942_v61 = vpop.eup %6941 }
0x2874   :  { %v6944_v63 = vpop.eup %6943  ;;  %v5632_v41 = vadd.f32 1.0, %v6942_v61 }
0x2875   :  { %v5631_v4 = vadd.f32 1.0, %v6944_v63 }
0x2876   :  { %v5634_v7 = vmul.f32 %v5632_v41, %v5618_v5 }
0x2877   :  { %v5633_v6 = vmul.f32 %v5631_v4, %v5617_v2 }
0x2879   :  { %6619 = vmatprep.mubr.msk.f32.mxu1 %vm87_vm0, %v5633_v6 }
0x287a   :  { %6620 = vmatmul.mubr.msk.f32.vlgmr.msra.gmra.mrb[66].mxu1 %vm87_vm0, %v5634_v7 }
0x294d   :  { %v6621_v43 = vpop.f32.mrb[66].mxu1 }
0x294e   :  { %v5724_v11 = vpop.f32.mrb[67].mxu1 }
0x294f   :  { %v5725_v13 = vadd.f32 %v6036_v10, %v5724_v11 }
0x2951   :  { %v5732_v14 = vadd.f32 %v5725_v13, %v8008_v62 }
0x2953   :  { %v5734_v3 = vrot.slane %v5732_v14, 4 }
0x2955   :  { %v5737_v15 = vsel %vm5736_vm11, %v5732_v14, %v5734_v3 }
0x2956   :  { %6631 = vmatmul.mubr.msk.f32.vlgmr.msra.gmra.mrb[56].mxu0 %vm171_vm1, %v5737_v15 }
0x2a29   :  { %v5818_v19 = vpop.f32.mrb[56].mxu0 }
0x2a2a   :  { %v5819_v21 = vadd.f32 %v6039_v18, %v5818_v19  ;;  %v6632_v22 = vpop.f32.mrb[57].mxu0 }
0x2a2c   :  { %5822 = vst [vmem:[#allocation2] sm:$0x3] %v5819_v21 }
0x2a2d   :  { %6956 = shalt.err (!%p6953_p4)
}
0x2a2e   :  { %s8171_s22 = sld [smem:[#allocation8_spill]] }
0x2a34   :  { %s6957_s23 = scalar_lea.hbm %s8171_s22, 32 }
0x2a35   :  { %p6958_p5 = scmp.ne.s32.totalorder %s8171_s22, %s6957_s23  ;;  %p6961_p6 = scmp.lt.u32.totalorder %s6957_s23, %s8171_s22 }
0x2a37   :  { %p6963_p7 = pnand %p6961_p6, %p6958_p5 }
0x2a39   :  { %6966 = shalt.err (!%p6963_p7)
}
0x2a3a   :  { %5832 = dma.vmem_to_hbm [thread:$0]  %s5830_s6, 32, %s8171_s22, [#allocation3]  }
0x2a3b   :  { %6967 = dma.done.wait [#allocation3], 32  }
0x2a3c   :  { %6968 = vsyncadd [#allocation3], 4294967264 }
0x2a3d   :  { %5836 = vsyncpa [#allocation3], 1 }

</bundles_post_ra>
